<compile_context>
chip_gen: v5e
topology: v5e:2x2
jax: 0.10.0
libtpu: 0.0.40
codegen_flags: <defaults>
</compile_context>

<pallas_src>
import math
import jax
import jax.numpy as jnp
from jax import lax
from jax.experimental import pallas as pl
from jax.experimental.pallas import tpu as pltpu

# ----------------------------- model config ---------------------------------
VOCAB_SIZE    = 16
SEQ_LEN       = 20          # == num_positions (per the assignment)
D_MODEL       = 32
D_INTERNAL    = 16
NUM_CLASSES   = 3
NUM_LAYERS    = 2
ADD_POSITIONAL_ENCODING = True
SCALE = 1.0 / math.sqrt(D_INTERNAL)

LANES = 128
D_QKV = 2 * D_INTERNAL + D_MODEL            # 64 : [q | k | v]

# --------------------------- batch / block tiling ----------------------------
SEQ_PER_BLOCK = 6                           # sequences per grid step (M = 120,
                                            # ~one 128-row MXU pass on v5e)
M_BLOCK = SEQ_PER_BLOCK * SEQ_LEN           # 120 rows per block
OUT_ROWS_PER_BLOCK = (1 + NUM_LAYERS) * M_BLOCK   # [logp | attn L0 | attn L1]
BATCH = 12                                  # demo batch -> grid=(2,)


def _round8(n):
    return (n + 7) // 8 * 8


# -------------------- static layout of the packed param slab -----------------
# All row offsets are multiples of 8 -> every in-kernel load is sublane-aligned.
R_W0     = 0                                         # (16, 32)  embedding weight
R_POSB   = R_W0 + _round8(VOCAB_SIZE)                # (120, 32) tiled pos + b0
R_LAYER0 = R_POSB + M_BLOCK
OFF_WQKV = 0                                         # (32, 64)  [Wq*s | Wk | Wv]
OFF_W1   = D_MODEL                                   # (32, 32)
OFF_W2   = 2 * D_MODEL                               # (32, 32)
OFF_BIAS = 3 * D_MODEL                               # (8, 128): row0 bqkv, row1 b1, row2 b2
LAYER_STRIDE = 3 * D_MODEL + 8                       # 104
R_WOUT   = R_LAYER0 + NUM_LAYERS * LAYER_STRIDE      # (32, 3)
R_BOUT   = R_WOUT + _round8(D_MODEL)                 # (1, 3) in row 0
R_MASK   = R_BOUT + 8                                # (120, 120) block-diag mask
PARAM_ROWS = R_MASK + M_BLOCK                        # 504 rows (~258 KiB)


# ------------------------------ Pallas kernel --------------------------------
def transformer_kernel(idx_ref, p_ref, out_ref):
    # ---- in-kernel one-hot embedding (the torch scatter_) ----
    idx = idx_ref[...]                                               # (M, 1) int32
    vocab_iota = lax.broadcasted_iota(jnp.int32, (M_BLOCK, VOCAB_SIZE), 1)
    onehot = (idx == vocab_iota).astype(jnp.float32)                 # (M, 16)

    w0   = p_ref[R_W0:R_W0 + VOCAB_SIZE, 0:D_MODEL]                  # (16, 32)
    posb = p_ref[R_POSB:R_POSB + M_BLOCK, 0:D_MODEL]                 # (M, 32) pos tiled + b0
    x = jnp.dot(onehot, w0, preferred_element_type=jnp.float32) + posb

    # block-diagonal additive mask (0 within a sequence, -1e9 across sequences)
    mask = p_ref[R_MASK:R_MASK + M_BLOCK, 0:M_BLOCK]                 # (M, M)

    for l in range(NUM_LAYERS):                                      # static unroll
        base = R_LAYER0 + l * LAYER_STRIDE
        wqkv = p_ref[base + OFF_WQKV:base + OFF_WQKV + D_MODEL, :]   # (32, 128), lanes[0:64)
        bias = p_ref[base + OFF_BIAS:base + OFF_BIAS + 8, :]         # (8, 128) aligned block
        bqkv = bias[0:1, :]                                          # (1, 128)
        b1   = bias[1:2, 0:D_MODEL]                                  # (1, 32)
        b2   = bias[2:3, 0:D_MODEL]                                  # (1, 32)

        # fused QKV projection; 1/sqrt(d_internal) folded into W_Q/b_Q offline
        qkv = jnp.dot(x, wqkv, preferred_element_type=jnp.float32) + bqkv
        q = qkv[:, 0:D_INTERNAL]
        k = qkv[:, D_INTERNAL:2 * D_INTERNAL]
        v = qkv[:, 2 * D_INTERNAL:2 * D_INTERNAL + D_MODEL]

        # A = Q @ K^T (block-diagonal across the stacked sequences), no transpose
        a = lax.dot_general(q, k, (((1,), (1,)), ((), ())),
                            preferred_element_type=jnp.float32)      # (M, M)
        a = a + mask
        m = jnp.max(a, axis=-1, keepdims=True)
        e = jnp.exp(a - m)
        s = jnp.sum(e, axis=-1, keepdims=True)
        r = pl.reciprocal(s, approx=True)
        r = r * (2.0 - s * r)                                        # one Newton step
        attn = e * r                                                 # softmax

        # direct per-layer store of the attention block (no end-of-kernel concat)
        out_ref[(l + 1) * M_BLOCK:(l + 2) * M_BLOCK, 0:M_BLOCK] = attn

        att_out = jnp.dot(attn, v, preferred_element_type=jnp.float32) + x

        w1 = p_ref[base + OFF_W1:base + OFF_W1 + D_MODEL, 0:D_MODEL]
        w2 = p_ref[base + OFF_W2:base + OFF_W2 + D_MODEL, 0:D_MODEL]
        h = jnp.tanh(jnp.dot(att_out, w1, preferred_element_type=jnp.float32) + b1)
        x = jnp.dot(h, w2, preferred_element_type=jnp.float32) + b2 + att_out

    # output projection + log-softmax, restricted to the real NUM_CLASSES lanes
    wout = p_ref[R_WOUT:R_WOUT + D_MODEL, 0:NUM_CLASSES]             # (32, 3)
    bout = p_ref[R_BOUT:R_BOUT + 1, 0:NUM_CLASSES]                   # (1, 3)
    logits = jnp.dot(x, wout, preferred_element_type=jnp.float32) + bout
    m = jnp.max(logits, axis=-1, keepdims=True)
    z = logits - m
    logp = z - jnp.log(jnp.sum(jnp.exp(z), axis=-1, keepdims=True))
    out_ref[0:M_BLOCK, 0:NUM_CLASSES] = logp


def transformer_forward(indices, packed_params):
    """indices: (B, SEQ_LEN) int32 token ids.
    Returns (log_probs (B, SEQ_LEN, 3), attentions (B, NUM_LAYERS, SEQ_LEN, SEQ_LEN))."""
    B = indices.shape[0]
    assert B % SEQ_PER_BLOCK == 0, "batch must be a multiple of SEQ_PER_BLOCK"
    # TODO(synk): pad + mask ragged batches (B % SEQ_PER_BLOCK != 0).
    nb = B // SEQ_PER_BLOCK
    idx_col = indices.reshape(B * SEQ_LEN, 1).astype(jnp.int32)

    out = pl.pallas_call(
        transformer_kernel,
        out_shape=jax.ShapeDtypeStruct((nb * OUT_ROWS_PER_BLOCK, LANES), jnp.float32),
        grid=(nb,),
        in_specs=[
            pl.BlockSpec((M_BLOCK, 1), lambda b: (b, 0)),            # token ids
            pl.BlockSpec((PARAM_ROWS, LANES), lambda b: (0, 0)),     # weights: DMA'd once,
        ],                                                           # VMEM-resident
        out_specs=pl.BlockSpec((OUT_ROWS_PER_BLOCK, LANES), lambda b: (b, 0)),
        compiler_params=pltpu.CompilerParams(
            dimension_semantics=("parallel",),          # megacore sharding on v7x
            vmem_limit_bytes=32 * 1024 * 1024),         # safe on v7x's 64 MiB VMEM
    )(idx_col, packed_params)

    out = out.reshape(nb, 1 + NUM_LAYERS, M_BLOCK, LANES)
    logp = out[:, 0, :, :NUM_CLASSES].reshape(B, SEQ_LEN, NUM_CLASSES)

    # extract per-sequence 20x20 diagonal blocks of the block-diagonal attention
    att = out[:, 1:, :, :M_BLOCK]                                    # (nb, L, M, M)
    att = att.reshape(nb, NUM_LAYERS, SEQ_PER_BLOCK, SEQ_LEN, SEQ_PER_BLOCK, SEQ_LEN)
    att = jnp.diagonal(att, axis1=2, axis2=4)                        # (nb, L, T, T, S)
    att = jnp.moveaxis(att, -1, 2)                                   # (nb, L, S, T, T)
    att = jnp.transpose(att, (0, 2, 1, 3, 4)).reshape(
        B, NUM_LAYERS, SEQ_LEN, SEQ_LEN)
    return logp, att


# -------------------------- parameter construction --------------------------
def make_params(key):
    """Deterministic synthetic parameters (PyTorch-style U(-1/sqrt(fan_in), ..))."""
    def linear(key, fan_in, fan_out):
        k1, k2 = jax.random.split(key)
        bound = 1.0 / math.sqrt(fan_in)
        w = jax.random.uniform(k1, (fan_in, fan_out), jnp.float32, -bound, bound)
        b = jax.random.uniform(k2, (1, fan_out), jnp.float32, -bound, bound)
        return w, b

    keys = jax.random.split(key, 4 + 5 * NUM_LAYERS)
    it = iter(keys)

    w0, b0 = linear(next(it), VOCAB_SIZE, D_MODEL)
    if ADD_POSITIONAL_ENCODING:
        pos = jax.random.normal(next(it), (SEQ_LEN, D_MODEL), jnp.float32)
    else:
        _ = next(it)
        pos = jnp.zeros((SEQ_LEN, D_MODEL), jnp.float32)

    wq, bq, wk, bk, wv, bv, w1, b1, w2, b2 = ([] for _ in range(10))
    for _ in range(NUM_LAYERS):
        w, b = linear(next(it), D_MODEL, D_INTERNAL); wq.append(w); bq.append(b)
        w, b = linear(next(it), D_MODEL, D_INTERNAL); wk.append(w); bk.append(b)
        w, b = linear(next(it), D_MODEL, D_MODEL);    wv.append(w); bv.append(b)
        w, b = linear(next(it), D_MODEL, D_MODEL);    w1.append(w); b1.append(b)
        w, b = linear(next(it), D_MODEL, D_MODEL);    w2.append(w); b2.append(b)

    wout, bout = linear(next(it), D_MODEL, NUM_CLASSES)
    _ = next(it)  # unused key (kept for determinism of split count)

    stack = lambda xs: jnp.stack(xs, axis=0)
    return (w0, b0, pos,
            stack(wq), stack(bq), stack(wk), stack(bk), stack(wv), stack(bv),
            stack(w1), stack(b1), stack(w2), stack(b2),
            wout, bout)


def pack_params(params):
    """Pack (and fuse) all parameters into one (PARAM_ROWS, 128) f32 slab, ONCE,
    offline: scale folded into W_Q/b_Q, fused QKV, b0 folded into the tiled
    positional block, per-layer biases sublane-co-packed, block-diag mask baked."""
    (w0, b0, pos, wq, bq, wk, bk, wv, bv, w1, b1, w2, b2, wout, bout) = params
    slab = jnp.zeros((PARAM_ROWS, LANES), jnp.float32)

    def put(slab, r0, val):
        h, w = val.shape
        return slab.at[r0:r0 + h, 0:w].set(val)

    slab = put(slab, R_W0, w0)
    posb = jnp.tile(pos, (SEQ_PER_BLOCK, 1)) + b0                 # (M, 32)
    slab = put(slab, R_POSB, posb)

    for l in range(NUM_LAYERS):
        base = R_LAYER0 + l * LAYER_STRIDE
        wqkv = jnp.concatenate([wq[l] * SCALE, wk[l], wv[l]], axis=1)   # (32, 64)
        slab = put(slab, base + OFF_WQKV, wqkv)
        slab = put(slab, base + OFF_W1, w1[l])
        slab = put(slab, base + OFF_W2, w2[l])
        bias_blk = jnp.zeros((8, LANES), jnp.float32)
        bias_blk = bias_blk.at[0, 0:D_QKV].set(
            jnp.concatenate([bq[l] * SCALE, bk[l], bv[l]], axis=1)[0])
        bias_blk = bias_blk.at[1, 0:D_MODEL].set(b1[l][0])
        bias_blk = bias_blk.at[2, 0:D_MODEL].set(b2[l][0])
        slab = put(slab, base + OFF_BIAS, bias_blk)

    slab = put(slab, R_WOUT, wout)
    slab = put(slab, R_BOUT, bout)

    seq_id = jnp.arange(M_BLOCK) // SEQ_LEN
    mask = jnp.where(seq_id[:, None] == seq_id[None, :], 0.0, -1e9)
    slab = put(slab, R_MASK, mask.astype(jnp.float32))
    return slab


# ------------------------------ JAX reference --------------------------------
def reference_forward(indices, params):
    (w0, b0, pos, wq, bq, wk, bk, wv, bv, w1, b1, w2, b2, wout, bout) = params
    hp = lax.Precision.HIGHEST

    def single(idx):
        onehot = jax.nn.one_hot(idx, VOCAB_SIZE, dtype=jnp.float32)   # torch scatter_
        x = jnp.dot(onehot, w0, precision=hp) + b0 + pos
        attns = []
        for l in range(NUM_LAYERS):
            q = jnp.dot(x, wq[l], precision=hp) + bq[l]
            k = jnp.dot(x, wk[l], precision=hp) + bk[l]
            v = jnp.dot(x, wv[l], precision=hp) + bv[l]
            a = jnp.dot(q, k.T, precision=hp) * SCALE
            attn = jax.nn.softmax(a, axis=-1)
            attns.append(attn)
            att_out = jnp.dot(attn, v, precision=hp) + x
            h = jnp.tanh(jnp.dot(att_out, w1[l], precision=hp) + b1[l])
            x = jnp.dot(h, w2[l], precision=hp) + b2[l] + att_out
        logits = jnp.dot(x, wout, precision=hp) + bout
        logp = jnp.log(jax.nn.softmax(logits, axis=-1))
        return logp, jnp.stack(attns, axis=0)

    return jax.vmap(single)(indices)


# ----------------------------------- main ------------------------------------
if __name__ == "__main__":
    key = jax.random.PRNGKey(0)
    k_param, k_idx = jax.random.split(key)

    params = make_params(k_param)
    packed = pack_params(params)            # one-time, offline packing

    # batch of token-id sequences (one id per position, len == SEQ_LEN)
    indices = jax.random.randint(k_idx, (BATCH, SEQ_LEN), 0, VOCAB_SIZE,
                                 dtype=jnp.int32)

    fwd = jax.jit(transformer_forward)
    log_probs, attentions = fwd(indices, packed)
    jax.block_until_ready((log_probs, attentions))

    ref_logp, ref_attn = reference_forward(indices, params)
    assert log_probs.shape == (BATCH, SEQ_LEN, NUM_CLASSES)
    assert attentions.shape == (BATCH, NUM_LAYERS, SEQ_LEN, SEQ_LEN)
    assert jnp.allclose(log_probs, ref_logp, atol=1e-5, rtol=1e-5), \
        float(jnp.max(jnp.abs(log_probs - ref_logp)))
    assert jnp.allclose(attentions, ref_attn, atol=1e-5, rtol=1e-5), \
        float(jnp.max(jnp.abs(attentions - ref_attn)))

    print("KERNEL_OK")
</pallas_src>

<mosaic_0001>
module attributes {stable_mosaic.version = 11 : i64} {
  func.func @transformer_kernel(%arg0: i32, %arg1: memref<120x1xi32, #tpu.memory_space<vmem>>, %arg2: memref<504x128xf32, #tpu.memory_space<vmem>>, %arg3: memref<360x128xf32, #tpu.memory_space<vmem>>) attributes {dimension_semantics = [#tpu.dimension_semantics<parallel>], iteration_bounds = array<i64: 2>, scalar_prefetch = 0 : i64, scratch_operands = 0 : i64, tpu.core_type = #tpu.core_type<tc>, window_params = [{transform_indices = @transform_0, window_bounds = array<i64: 120, 1>}, {pipeline_mode = #tpu.pipeline_mode<synchronous>, transform_indices = @transform_1, window_bounds = array<i64: 504, 128>}, {transform_indices = @transform_2, window_bounds = array<i64: 360, 128>}]} {
    %c0 = arith.constant 0 : index
    %c0_0 = arith.constant 0 : index
    %0 = vector.load %arg1[%c0, %c0_0] : memref<120x1xi32, #tpu.memory_space<vmem>>, vector<120x1xi32>
    %1 = tpu.iota {dimensions = array<i32: 1>} : vector<120x16xi32>
    %2 = vector.broadcast %0 : vector<120x1xi32> to vector<120x16xi32>
    %3 = arith.cmpi eq, %2, %1 : vector<120x16xi32>
    %4 = arith.extui %3 : vector<120x16xi1> to vector<120x16xi32>
    %5 = arith.sitofp %4 : vector<120x16xi32> to vector<120x16xf32>
    %c0_1 = arith.constant 0 : index
    %c0_2 = arith.constant 0 : index
    %6 = vector.load %arg2[%c0_1, %c0_2] : memref<504x128xf32, #tpu.memory_space<vmem>>, vector<16x32xf32>
    %c16 = arith.constant 16 : index
    %c0_3 = arith.constant 0 : index
    %7 = vector.load %arg2[%c16, %c0_3] : memref<504x128xf32, #tpu.memory_space<vmem>>, vector<120x32xf32>
    %cst = arith.constant dense<0.000000e+00> : vector<120x32xf32>
    %8 = tpu.matmul %5, %6, %cst {dimension_numbers = #tpu.dot_dimension_numbers<[1], [0], [0], [1], [0, 0, 1, 1], [], []>} : vector<120x16xf32>, vector<16x32xf32>, vector<120x32xf32> -> vector<120x32xf32>
    %9 = arith.addf %8, %7 : vector<120x32xf32>
    %c384 = arith.constant 384 : index
    %c0_4 = arith.constant 0 : index
    %10 = vector.load %arg2[%c384, %c0_4] : memref<504x128xf32, #tpu.memory_space<vmem>>, vector<120x120xf32>
    %c136 = arith.constant 136 : index
    %c0_5 = arith.constant 0 : index
    %11 = vector.load %arg2[%c136, %c0_5] : memref<504x128xf32, #tpu.memory_space<vmem>>, vector<32x128xf32>
    %c232 = arith.constant 232 : index
    %c0_6 = arith.constant 0 : index
    %12 = vector.load %arg2[%c232, %c0_6] : memref<504x128xf32, #tpu.memory_space<vmem>>, vector<8x128xf32>
    %13 = vector.extract_strided_slice %12 {offsets = [0, 0], sizes = [1, 128], strides = [1, 1]} : vector<8x128xf32> to vector<1x128xf32>
    %14 = vector.extract_strided_slice %12 {offsets = [1, 0], sizes = [1, 32], strides = [1, 1]} : vector<8x128xf32> to vector<1x32xf32>
    %15 = vector.extract_strided_slice %12 {offsets = [2, 0], sizes = [1, 32], strides = [1, 1]} : vector<8x128xf32> to vector<1x32xf32>
    %cst_7 = arith.constant dense<0.000000e+00> : vector<120x128xf32>
    %16 = tpu.matmul %9, %11, %cst_7 {dimension_numbers = #tpu.dot_dimension_numbers<[1], [0], [0], [1], [0, 0, 1, 1], [], []>} : vector<120x32xf32>, vector<32x128xf32>, vector<120x128xf32> -> vector<120x128xf32>
    %17 = vector.broadcast %13 : vector<1x128xf32> to vector<120x128xf32>
    %18 = arith.addf %16, %17 : vector<120x128xf32>
    %19 = vector.extract_strided_slice %18 {offsets = [0, 0], sizes = [120, 16], strides = [1, 1]} : vector<120x128xf32> to vector<120x16xf32>
    %20 = vector.extract_strided_slice %18 {offsets = [0, 16], sizes = [120, 16], strides = [1, 1]} : vector<120x128xf32> to vector<120x16xf32>
    %21 = vector.extract_strided_slice %18 {offsets = [0, 32], sizes = [120, 32], strides = [1, 1]} : vector<120x128xf32> to vector<120x32xf32>
    %cst_8 = arith.constant dense<0.000000e+00> : vector<120x120xf32>
    %22 = tpu.matmul %19, %20, %cst_8 {dimension_numbers = #tpu.dot_dimension_numbers<[1], [1], [0], [0], [0, 0, 1, 0], [], []>} : vector<120x16xf32>, vector<120x16xf32>, vector<120x120xf32> -> vector<120x120xf32>
    %23 = arith.addf %22, %10 : vector<120x120xf32>
    %cst_9 = arith.constant dense<0xFF800000> : vector<120xf32>
    %24 = vector.multi_reduction <maximumf>, %23, %cst_9 [1] : vector<120x120xf32> to vector<120xf32>
    %25 = vector.shape_cast %24 : vector<120xf32> to vector<120x1xf32>
    %26 = vector.broadcast %25 : vector<120x1xf32> to vector<120x120xf32>
    %27 = arith.subf %23, %26 : vector<120x120xf32>
    %28 = math.exp %27 : vector<120x120xf32>
    %cst_10 = arith.constant dense<0.000000e+00> : vector<120xf32>
    %29 = vector.multi_reduction <add>, %28, %cst_10 [1] : vector<120x120xf32> to vector<120xf32>
    %30 = vector.shape_cast %29 : vector<120xf32> to vector<120x1xf32>
    %31 = tpu.reciprocal %30 {approx = true} : vector<120x1xf32> -> vector<120x1xf32>
    %32 = arith.mulf %30, %31 : vector<120x1xf32>
    %cst_11 = arith.constant 2.000000e+00 : f32
    %33 = vector.broadcast %cst_11 : f32 to vector<120x1xf32>
    %34 = arith.subf %33, %32 : vector<120x1xf32>
    %35 = arith.mulf %31, %34 : vector<120x1xf32>
    %36 = vector.broadcast %35 : vector<120x1xf32> to vector<120x120xf32>
    %37 = arith.mulf %28, %36 : vector<120x120xf32>
    %c120 = arith.constant 120 : index
    %c0_12 = arith.constant 0 : index
    %38 = vector.load %arg3[%c120, %c0_12] : memref<360x128xf32, #tpu.memory_space<vmem>>, vector<120x120xf32>
    tpu.vector_store %arg3[%c120, %c0_12], %37 {strides = array<i32>} : memref<360x128xf32, #tpu.memory_space<vmem>>, vector<120x120xf32>,
    %cst_13 = arith.constant dense<0.000000e+00> : vector<120x32xf32>
    %39 = tpu.matmul %37, %21, %cst_13 {dimension_numbers = #tpu.dot_dimension_numbers<[1], [0], [0], [1], [0, 0, 1, 1], [], []>} : vector<120x120xf32>, vector<120x32xf32>, vector<120x32xf32> -> vector<120x32xf32>
    %40 = arith.addf %39, %9 : vector<120x32xf32>
    %c168 = arith.constant 168 : index
    %c0_14 = arith.constant 0 : index
    %41 = vector.load %arg2[%c168, %c0_14] : memref<504x128xf32, #tpu.memory_space<vmem>>, vector<32x32xf32>
    %c200 = arith.constant 200 : index
    %c0_15 = arith.constant 0 : index
    %42 = vector.load %arg2[%c200, %c0_15] : memref<504x128xf32, #tpu.memory_space<vmem>>, vector<32x32xf32>
    %cst_16 = arith.constant dense<0.000000e+00> : vector<120x32xf32>
    %43 = tpu.matmul %40, %41, %cst_16 {dimension_numbers = #tpu.dot_dimension_numbers<[1], [0], [0], [1], [0, 0, 1, 1], [], []>} : vector<120x32xf32>, vector<32x32xf32>, vector<120x32xf32> -> vector<120x32xf32>
    %44 = vector.broadcast %14 : vector<1x32xf32> to vector<120x32xf32>
    %45 = arith.addf %43, %44 : vector<120x32xf32>
    %46 = math.tanh %45 : vector<120x32xf32>
    %cst_17 = arith.constant dense<0.000000e+00> : vector<120x32xf32>
    %47 = tpu.matmul %46, %42, %cst_17 {dimension_numbers = #tpu.dot_dimension_numbers<[1], [0], [0], [1], [0, 0, 1, 1], [], []>} : vector<120x32xf32>, vector<32x32xf32>, vector<120x32xf32> -> vector<120x32xf32>
    %48 = vector.broadcast %15 : vector<1x32xf32> to vector<120x32xf32>
    %49 = arith.addf %47, %48 : vector<120x32xf32>
    %50 = arith.addf %49, %40 : vector<120x32xf32>
    %c240 = arith.constant 240 : index
    %c0_18 = arith.constant 0 : index
    %51 = vector.load %arg2[%c240, %c0_18] : memref<504x128xf32, #tpu.memory_space<vmem>>, vector<32x128xf32>
    %c336 = arith.constant 336 : index
    %c0_19 = arith.constant 0 : index
    %52 = vector.load %arg2[%c336, %c0_19] : memref<504x128xf32, #tpu.memory_space<vmem>>, vector<8x128xf32>
    %53 = vector.extract_strided_slice %52 {offsets = [0, 0], sizes = [1, 128], strides = [1, 1]} : vector<8x128xf32> to vector<1x128xf32>
    %54 = vector.extract_strided_slice %52 {offsets = [1, 0], sizes = [1, 32], strides = [1, 1]} : vector<8x128xf32> to vector<1x32xf32>
    %55 = vector.extract_strided_slice %52 {offsets = [2, 0], sizes = [1, 32], strides = [1, 1]} : vector<8x128xf32> to vector<1x32xf32>
    %cst_20 = arith.constant dense<0.000000e+00> : vector<120x128xf32>
    %56 = tpu.matmul %50, %51, %cst_20 {dimension_numbers = #tpu.dot_dimension_numbers<[1], [0], [0], [1], [0, 0, 1, 1], [], []>} : vector<120x32xf32>, vector<32x128xf32>, vector<120x128xf32> -> vector<120x128xf32>
    %57 = vector.broadcast %53 : vector<1x128xf32> to vector<120x128xf32>
    %58 = arith.addf %56, %57 : vector<120x128xf32>
    %59 = vector.extract_strided_slice %58 {offsets = [0, 0], sizes = [120, 16], strides = [1, 1]} : vector<120x128xf32> to vector<120x16xf32>
    %60 = vector.extract_strided_slice %58 {offsets = [0, 16], sizes = [120, 16], strides = [1, 1]} : vector<120x128xf32> to vector<120x16xf32>
    %61 = vector.extract_strided_slice %58 {offsets = [0, 32], sizes = [120, 32], strides = [1, 1]} : vector<120x128xf32> to vector<120x32xf32>
    %cst_21 = arith.constant dense<0.000000e+00> : vector<120x120xf32>
    %62 = tpu.matmul %59, %60, %cst_21 {dimension_numbers = #tpu.dot_dimension_numbers<[1], [1], [0], [0], [0, 0, 1, 0], [], []>} : vector<120x16xf32>, vector<120x16xf32>, vector<120x120xf32> -> vector<120x120xf32>
    %63 = arith.addf %62, %10 : vector<120x120xf32>
    %cst_22 = arith.constant dense<0xFF800000> : vector<120xf32>
    %64 = vector.multi_reduction <maximumf>, %63, %cst_22 [1] : vector<120x120xf32> to vector<120xf32>
    %65 = vector.shape_cast %64 : vector<120xf32> to vector<120x1xf32>
    %66 = vector.broadcast %65 : vector<120x1xf32> to vector<120x120xf32>
    %67 = arith.subf %63, %66 : vector<120x120xf32>
    %68 = math.exp %67 : vector<120x120xf32>
    %cst_23 = arith.constant dense<0.000000e+00> : vector<120xf32>
    %69 = vector.multi_reduction <add>, %68, %cst_23 [1] : vector<120x120xf32> to vector<120xf32>
    %70 = vector.shape_cast %69 : vector<120xf32> to vector<120x1xf32>
    %71 = tpu.reciprocal %70 {approx = true} : vector<120x1xf32> -> vector<120x1xf32>
    %72 = arith.mulf %70, %71 : vector<120x1xf32>
    %cst_24 = arith.constant 2.000000e+00 : f32
    %73 = vector.broadcast %cst_24 : f32 to vector<120x1xf32>
    %74 = arith.subf %73, %72 : vector<120x1xf32>
    %75 = arith.mulf %71, %74 : vector<120x1xf32>
    %76 = vector.broadcast %75 : vector<120x1xf32> to vector<120x120xf32>
    %77 = arith.mulf %68, %76 : vector<120x120xf32>
    %c240_25 = arith.constant 240 : index
    %c0_26 = arith.constant 0 : index
    %78 = vector.load %arg3[%c240_25, %c0_26] : memref<360x128xf32, #tpu.memory_space<vmem>>, vector<120x120xf32>
    tpu.vector_store %arg3[%c240_25, %c0_26], %77 {strides = array<i32>} : memref<360x128xf32, #tpu.memory_space<vmem>>, vector<120x120xf32>,
    %cst_27 = arith.constant dense<0.000000e+00> : vector<120x32xf32>
    %79 = tpu.matmul %77, %61, %cst_27 {dimension_numbers = #tpu.dot_dimension_numbers<[1], [0], [0], [1], [0, 0, 1, 1], [], []>} : vector<120x120xf32>, vector<120x32xf32>, vector<120x32xf32> -> vector<120x32xf32>
    %80 = arith.addf %79, %50 : vector<120x32xf32>
    %c272 = arith.constant 272 : index
    %c0_28 = arith.constant 0 : index
    %81 = vector.load %arg2[%c272, %c0_28] : memref<504x128xf32, #tpu.memory_space<vmem>>, vector<32x32xf32>
    %c304 = arith.constant 304 : index
    %c0_29 = arith.constant 0 : index
    %82 = vector.load %arg2[%c304, %c0_29] : memref<504x128xf32, #tpu.memory_space<vmem>>, vector<32x32xf32>
    %cst_30 = arith.constant dense<0.000000e+00> : vector<120x32xf32>
    %83 = tpu.matmul %80, %81, %cst_30 {dimension_numbers = #tpu.dot_dimension_numbers<[1], [0], [0], [1], [0, 0, 1, 1], [], []>} : vector<120x32xf32>, vector<32x32xf32>, vector<120x32xf32> -> vector<120x32xf32>
    %84 = vector.broadcast %54 : vector<1x32xf32> to vector<120x32xf32>
    %85 = arith.addf %83, %84 : vector<120x32xf32>
    %86 = math.tanh %85 : vector<120x32xf32>
    %cst_31 = arith.constant dense<0.000000e+00> : vector<120x32xf32>
    %87 = tpu.matmul %86, %82, %cst_31 {dimension_numbers = #tpu.dot_dimension_numbers<[1], [0], [0], [1], [0, 0, 1, 1], [], []>} : vector<120x32xf32>, vector<32x32xf32>, vector<120x32xf32> -> vector<120x32xf32>
    %88 = vector.broadcast %55 : vector<1x32xf32> to vector<120x32xf32>
    %89 = arith.addf %87, %88 : vector<120x32xf32>
    %90 = arith.addf %89, %80 : vector<120x32xf32>
    %c344 = arith.constant 344 : index
    %c0_32 = arith.constant 0 : index
    %91 = vector.load %arg2[%c344, %c0_32] : memref<504x128xf32, #tpu.memory_space<vmem>>, vector<32x3xf32>
    %c376 = arith.constant 376 : index
    %c0_33 = arith.constant 0 : index
    %92 = vector.load %arg2[%c376, %c0_33] : memref<504x128xf32, #tpu.memory_space<vmem>>, vector<1x3xf32>
    %cst_34 = arith.constant dense<0.000000e+00> : vector<120x3xf32>
    %93 = tpu.matmul %90, %91, %cst_34 {dimension_numbers = #tpu.dot_dimension_numbers<[1], [0], [0], [1], [0, 0, 1, 1], [], []>} : vector<120x32xf32>, vector<32x3xf32>, vector<120x3xf32> -> vector<120x3xf32>
    %94 = vector.broadcast %92 : vector<1x3xf32> to vector<120x3xf32>
    %95 = arith.addf %93, %94 : vector<120x3xf32>
    %cst_35 = arith.constant dense<0xFF800000> : vector<120xf32>
    %96 = vector.multi_reduction <maximumf>, %95, %cst_35 [1] : vector<120x3xf32> to vector<120xf32>
    %97 = vector.shape_cast %96 : vector<120xf32> to vector<120x1xf32>
    %98 = vector.broadcast %97 : vector<120x1xf32> to vector<120x3xf32>
    %99 = arith.subf %95, %98 : vector<120x3xf32>
    %100 = math.exp %99 : vector<120x3xf32>
    %cst_36 = arith.constant dense<0.000000e+00> : vector<120xf32>
    %101 = vector.multi_reduction <add>, %100, %cst_36 [1] : vector<120x3xf32> to vector<120xf32>
    %102 = vector.shape_cast %101 : vector<120xf32> to vector<120x1xf32>
    %103 = math.log %102 : vector<120x1xf32>
    %104 = vector.broadcast %103 : vector<120x1xf32> to vector<120x3xf32>
    %105 = arith.subf %99, %104 : vector<120x3xf32>
    %c0_37 = arith.constant 0 : index
    %c0_38 = arith.constant 0 : index
    %106 = vector.load %arg3[%c0_37, %c0_38] : memref<360x128xf32, #tpu.memory_space<vmem>>, vector<120x3xf32>
    tpu.vector_store %arg3[%c0_37, %c0_38], %105 {strides = array<i32>} : memref<360x128xf32, #tpu.memory_space<vmem>>, vector<120x3xf32>,
    return
  }
  func.func @transform_0(%arg0: i32) -> (i32, i32) {
    %c0_i32 = arith.constant 0 : i32
    %c0_i32_0 = arith.constant 0 : i32
    return %arg0, %c0_i32 : i32, i32
  }
  func.func @transform_1(%arg0: i32) -> (i32, i32) {
    %c0_i32 = arith.constant 0 : i32
    %c0_i32_0 = arith.constant 0 : i32
    %c0_i32_1 = arith.constant 0 : i32
    return %c0_i32, %c0_i32_0 : i32, i32
  }
  func.func @transform_2(%arg0: i32) -> (i32, i32) {
    %c0_i32 = arith.constant 0 : i32
    %c0_i32_0 = arith.constant 0 : i32
    return %arg0, %c0_i32 : i32, i32
  }
}

</mosaic_0001>

<bundles_post_ra>
// kernel: squeeze.1
= control target key start
LH: loop header
LB: loop body
LE: loop exit
PB: predicated region body
PF: predicated region fallthrough
CT: control target
= control target key end

     0   :  { %vm15_vm0 = vcmask 162816   ;;  %vm30_vm1 = vcmask 1045508   ;;  %s121_s17 = smov 68   ;;  %s122_s18 = smov 108   ;;  %s222_s0 = inlined_call_operand.vmem [shape: f32[2,1,120,3], index: 0, kind: input, shape index: {}]   ;;  %s223_s1 = inlined_call_operand.vmem [shape: f32[12,20,3], index: 1, kind: output, shape index: {}]  }
   0x1   :  { %v97_v0 = vld [vmem:[%s222_s0 + $0x4] sm:$0x3]  ;;  %v98_v1 = vld [vmem:[%s222_s0 + $0x2] sm:$0x3]  ;;  %v12_v2 = vld [vmem:[%s222_s0] sm:$0x3] }
   0x2   :  { %7 = vst [vmem:[#allocation0 + $0x10] sm:$0x3] %v97_v0  ;;  %s123_s19 = smov 28   ;;  %s124_s20 = smov 48  }
   0x3   :  { %11 = vst [vmem:[#allocation0 + $0x8] sm:$0x3] %v98_v1  ;;  %s125_s21 = smov 88  }
   0x4   :  { %13 = vst [vmem:[#allocation0] sm:$0x3] %v12_v2 }
   0x9   :  { %v57_v3 = vld [vmem:[#allocation0 + $0xc] sm:$0x30]  }
   0xa   :  { %v29_v4 = vld [vmem:[#allocation0 + $0xc] sm:$0x30]   ;;  %v18_v6 = vld [vmem:[#allocation0 + $0x8] sm:$0x3]  }
   0xb   :  { %v23_v5 = vld [vmem:[#allocation0 + $0x10] sm:$0x3]   ;;  %v14_v7 = vld [vmem:[#allocation0] sm:$0x3]  }
   0xc   :  { %100 = vst.msk [vmem:[%s223_s1 + $0x20] ss:$6 sm:$0x3] %vm15_vm0, %v23_v5   ;;  %v55_v8 = vld.sshfl [vmem:[#allocation0] sm:$0xff pattern:$0x99999810]  }
   0xd   :  { %99 = vst.msk [vmem:[%s223_s1 + $0x10] ss:$6 sm:$0x3] %vm15_vm0, %v18_v6   ;;  %v59_v9 = vsel %vm30_vm1, %v57_v3, %v55_v8  ;;  %v31_v10 = vsel %vm30_vm1, %v29_v4, %v55_v8  ;;  %v85_v11 = vld [vmem:[#allocation0 + $0xc] sm:$0x30]  }
   0xe   :  { %16 = vst.msk [vmem:[%s223_s1] ss:$6 sm:$0x3] %vm15_vm0, %v14_v7   ;;  %60 = vrot.lane.b32.xlu1 %v59_v9, %s121_s17  ;;  %32 = vrot.lane.b32.xlu0 %v31_v10, %s122_s18  ;;  %v87_v12 = vsel %vm30_vm1, %v85_v11, %v55_v8  ;;  %v71_v13 = vld [vmem:[#allocation0 + $0xc] sm:$0x30]  }
   0xf   :  { %88 = vrot.lane.b32.xlu2 %v87_v12, %s123_s19  ;;  %v43_v14 = vld [vmem:[#allocation0 + $0xc] sm:$0x30]   ;;  %v73_v15 = vsel %vm30_vm1, %v71_v13, %v55_v8 }
  0x10   :  { %v45_v16 = vsel %vm30_vm1, %v43_v14, %v55_v8 }
  0x16   :  { %74 = vrot.lane.b32.xlu1 %v73_v15, %s124_s20  ;;  %46 = vrot.lane.b32.xlu0 %v45_v16, %s125_s21 }
  0x69   :  { %v89_v17 = vpop.permute.xlu2 %88  }
  0x6a   :  { %113 = vst.msk [vmem:[%s223_s1 + $0x5] ss:$6 sm:$0x3] %vm15_vm0, %v89_v17  }
  0x6b   :  { %114 = vst.msk [vmem:[%s223_s1 + $0x9] ss:$6 sm:$0xc] %vm15_vm0, %v89_v17  }
  0x6c   :  { %115 = vst.msk [vmem:[%s223_s1 + $0xd] ss:$6 sm:$0x30] %vm15_vm0, %v89_v17  }
  0x80   :  { %v61_v18 = vpop.permute.xlu1 %60   ;;  %v33_v19 = vpop.permute.xlu0 %32  }
  0x81   :  { %107 = vst.msk [vmem:[%s223_s1 + $0x3] ss:$6 sm:$0x3] %vm15_vm0, %v61_v18  }
  0x82   :  { %108 = vst.msk [vmem:[%s223_s1 + $0x7] ss:$6 sm:$0xc] %vm15_vm0, %v61_v18  }
  0x83   :  { %109 = vst.msk [vmem:[%s223_s1 + $0xb] ss:$6 sm:$0x30] %vm15_vm0, %v61_v18  }
  0x84   :  { %101 = vst.msk [vmem:[%s223_s1 + $0x1] ss:$6 sm:$0x3] %vm15_vm0, %v33_v19  }
  0x85   :  { %102 = vst.msk [vmem:[%s223_s1 + $0x5] ss:$6 sm:$0xc] %vm15_vm0, %v33_v19  }
  0x86   :  { %103 = vst.msk [vmem:[%s223_s1 + $0x9] ss:$6 sm:$0x30] %vm15_vm0, %v33_v19  }
  0x88   :  { %v75_v20 = vpop.permute.xlu1 %74   ;;  %v47_v21 = vpop.permute.xlu0 %46  }
  0x89   :  { %110 = vst.msk [vmem:[%s223_s1 + $0x4] ss:$6 sm:$0x3] %vm15_vm0, %v75_v20  }
  0x8a   :  { %111 = vst.msk [vmem:[%s223_s1 + $0x8] ss:$6 sm:$0xc] %vm15_vm0, %v75_v20  }
  0x8b   :  { %112 = vst.msk [vmem:[%s223_s1 + $0xc] ss:$6 sm:$0x30] %vm15_vm0, %v75_v20  }
  0x8c   :  { %104 = vst.msk [vmem:[%s223_s1 + $0x2] ss:$6 sm:$0x3] %vm15_vm0, %v47_v21  }
  0x8d   :  { %105 = vst.msk [vmem:[%s223_s1 + $0x6] ss:$6 sm:$0xc] %vm15_vm0, %v47_v21  }
  0x8e   :  { %106 = vst.msk [vmem:[%s223_s1 + $0xa] ss:$6 sm:$0x30] %vm15_vm0, %v47_v21  }

// kernel: transformer_forward.1
= control target key start
LH: loop header
LB: loop body
LE: loop exit
PB: predicated region body
PF: predicated region fallthrough
CT: control target
= control target key end

     0   :  { %7 = vsyncpa [#allocation3], 0  ;;  %s3285_s9 = smov 0   ;;  %s4579_s0 = inlined_call_operand.vmem [shape: s32[240,1], index: 0, kind: input, shape index: {}]   ;;  %s4580_s1 = inlined_call_operand.hbm [shape: f32[504,128], index: 1, kind: input, shape index: {}]   ;;  %s4581_s2 = inlined_call_operand.vmem [shape: f32[720,128], index: 2, kind: output, shape index: {}]  }
   0x1 LB: > { %s102_s12 = sshll.u32 %s4580_s1, 4  ;;  %s3294_s13 = sadd.s32 4294967295, %s3261_s9   ;;  %s3261_s9 = sphi %s3285_s9, %s13_s9   ;;  %s103_s12 = int_to_ptr.hbm [resolvable:$true] %s102_s12 }
   0x2   : > { %p2614_p0 = scmp.ge.s32.totalorder %s3261_s9, 1  ;;  %p91_p1 = scmp.lt.s32.totalorder %s3261_s9, 3 }
   0x3   : > { %p2873_p2 = scmp.eq.s32.totalorder %s3294_s13, 0  ;;  %s3263_s14 = smov [#allocation2]  }
   0x4   : > { %p92_p3 = pnand %p2614_p0, %p91_p1  ;;  %s104_s15 = sshll.u32 %s3263_s14, 4  ;;  %s105_s15 = int_to_ptr.vmem [resolvable:$true] %s104_s15 }
   0x5   : > { %s3264_s16 = smov 128   ;;  %s3265_s17 = smov 8  }
   0x6   : > { %p2869_p4 = pneg %p92_p3  ;;  %129 = sbr.rel (%p92_p3) target bundleno = 3423 (0xd5f), region = 28 }
   0x8   : > { %p2870_p5 = pnand %p2873_p2, %p2869_p4 }
   0xa   : > { %2872 = dma.hbm_to_vmem [thread:$0]  (!%p2870_p5), %s103_s12, 8064, %s105_s15, [#allocation3], %s3264_s16, %s3264_s16, %s3265_s17  }
   0xb   : > { %3256 = dma.done.wait (%p2873_p2), [#allocation3], 8064  }
   0xc   : > { %3258 = vsyncadd (%p2873_p2), [#allocation3], 4294959232  ;;  %s152_s18 = smul.u32 15, %s3294_s13  ;;  %v3266_v0 = vmov 0   ;;  %v272_v4 = vld [vmem:[#allocation2 + $0x8] sm:$0xff]  ;;  %v271_v17 = vld [vmem:[#allocation2] sm:$0xff]  ;;  %v179_v20 = vlaneseq }
   0xd   : > { %2891 = vset.pattern.permute.xlu1 %v3266_v0  ;;  %2890 = vset.pattern.permute.xlu0 %v3266_v0  ;;  %vm288_vm0 = vcmask 130048   ;;  %v3267_v25 = vmov 0.0   ;;  %v414_v51 = vld [vmem:[#allocation2 + $0xa0] sm:$0xff]  ;;  %v413_v52 = vld [vmem:[#allocation2 + $0x98] sm:$0xff]  ;;  %v412_v53 = vld [vmem:[#allocation2 + $0x90] sm:$0xff]  ;;  %s3268_s23 = smov 112  }
   0xe   : > { %p153_p6 = scmp.lt.s32.totalorder %s152_s18, 29  ;;  %2892 = vset.pattern.permute.xlu2 %v3266_v0  ;;  %348 = vmatpush.msra.mxu0 %v272_v4  ;;  %v180_v22 = vand.u32 127, %v179_v20  ;;  %v411_v54 = vld [vmem:[#allocation2 + $0x88] sm:$0xff]  ;;  %v273_v55 = vld [vmem:[#allocation2 + $0x10] sm:$0xff]  ;;  %v274_v58 = vld [vmem:[#allocation2 + $0x18] sm:$0xff]  ;;  %s3269_s24 = smov 96  }
   0xf   : > { %2848 = vmatpush.msra.mxu1 %v272_v4  ;;  %v275_v61 = vld [vmem:[#allocation2 + $0x20] sm:$0xff]  ;;  %v276_v0 = vld [vmem:[#allocation2 + $0x28] sm:$0xff]  ;;  %s158_s25 = smul.u32 45, %s3294_s13 }
  0x10   : > { %s4583_s18 = smov (!%p153_p6, %s152_s18), 29  ;;  %349 = vmatpush.msra.mxu0 %v271_v17 }
  0x11   : > { %s2619_s19 = sshll.u32 %s4583_s18, 3  ;;  %2849 = vmatpush.msra.mxu1 %v271_v17  ;;  %p159_p7 = scmp.lt.s32.totalorder %s158_s25, 89 }
  0x12   : > { %s156_s22 = scalar_lea.vmem %s4579_s0, %s2619_s19 }
  0x13   : > { %v166_v1 = vld [vmem:[%s156_s22 + $0x10] sm:$0xff]  ;;  %v164_v2 = vld [vmem:[%s156_s22] sm:$0xff]  ;;  %v167_v5 = vld [vmem:[%s156_s22 + $0x18] sm:$0xff]  ;;  %475 = vmatpush.msrb.mxu1 %v414_v51  ;;  %s4585_s25 = smov (!%p159_p7, %s158_s25), 89 }
  0x14   : > { %188 = vperm.xlu1 %2891, %v166_v1   ;;  %182 = vperm.xlu0 %2890, %v164_v2   ;;  %v168_v3 = vld [vmem:[%s156_s22 + $0x20] sm:$0xff]  ;;  %v165_v6 = vld [vmem:[%s156_s22 + $0x8] sm:$0xff]  ;;  %v171_v8 = vld [vmem:[%s156_s22 + $0x38] sm:$0xff]  ;;  %s2620_s26 = sshll.u32 %s4585_s25, 3 }
  0x15   : > { %194 = vperm.xlu2 %2892, %v168_v3   ;;  %v169_v7 = vld [vmem:[%s156_s22 + $0x28] sm:$0xff]  ;;  %v170_v9 = vld [vmem:[%s156_s22 + $0x30] sm:$0xff]  ;;  %v172_v10 = vld [vmem:[%s156_s22 + $0x40] sm:$0xff]  ;;  %476 = vmatpush.msrb.mxu1 %v413_v52  ;;  %s3620_s29 = scalar_lea.vmem %s4581_s2, %s2620_s26 }
  0x16   : > { %v174_v11 = vld [vmem:[%s156_s22 + $0x50] sm:$0xff]  ;;  %v173_v12 = vld [vmem:[%s156_s22 + $0x48] sm:$0xff]  ;;  %v175_v13 = vld [vmem:[%s156_s22 + $0x58] sm:$0xff] }
  0x17   : > { %v177_v14 = vld [vmem:[%s156_s22 + $0x68] sm:$0xff]  ;;  %v176_v15 = vld [vmem:[%s156_s22 + $0x60] sm:$0xff]  ;;  %v178_v16 = vld [vmem:[%s156_s22 + $0x70] sm:$0xff]  ;;  %477 = vmatpush.msrb.mxu1 %v412_v53 }
  0x18   : > { %v277_v3 = vld [vmem:[#allocation2 + $0x30] sm:$0xff] }
  0x19   : > { %478 = vmatpush.msrb.mxu1 %v411_v54 }
  0x1c   : > { %191 = vperm.xlu1 %2891, %v167_v5   ;;  %185 = vperm.xlu0 %2890, %v165_v6   ;;  %v278_v6 = vld [vmem:[#allocation2 + $0x38] sm:$0xff] }
  0x1d   : > { %197 = vperm.xlu2 %2892, %v169_v7  }
  0x24   : > { %203 = vperm.xlu1 %2891, %v171_v8   ;;  %200 = vperm.xlu0 %2890, %v170_v9   ;;  %v279_v9 = vld [vmem:[#allocation2 + $0x40] sm:$0xff] }
  0x25   : > { %206 = vperm.xlu2 %2892, %v172_v10  }
  0x2c   : > { %212 = vperm.xlu1 %2891, %v174_v11   ;;  %209 = vperm.xlu0 %2890, %v173_v12   ;;  %v280_v12 = vld [vmem:[#allocation2 + $0x48] sm:$0xff] }
  0x2d   : > { %215 = vperm.xlu2 %2892, %v175_v13  }
  0x34   : > { %221 = vperm.xlu1 %2891, %v177_v14   ;;  %218 = vperm.xlu0 %2890, %v176_v15   ;;  %v281_v15 = vld [vmem:[#allocation2 + $0x50] sm:$0xff] }
  0x35   : > { %224 = vperm.xlu2 %2892, %v178_v16  }
  0x6f   : > { %v195_v18 = vpop.permute.xlu2 %194 }
  0x70   : > { %vm230_vm10 = vcmp.eq.s32.totalorder %v195_v18, %v180_v22  ;;  %v282_v18 = vld [vmem:[#allocation2 + $0x58] sm:$0xff] }
  0x71   : > { %v2625_v45 = vsel %vm230_vm10, 1.0, %v3267_v25 }
  0x77   : > { %v198_v19 = vpop.permute.xlu2 %197 }
  0x78   : > { %vm231_vm13 = vcmp.eq.s32.totalorder %v198_v19, %v180_v22 }
  0x79   : > { %v2626_v48 = vsel %vm231_vm13, 1.0, %v3267_v25 }
  0x7f   : > { %v207_v21 = vpop.permute.xlu2 %206 }
  0x80   : > { %vm234_vm1 = vcmp.eq.s32.totalorder %v207_v21, %v180_v22  ;;  %v283_v21 = vld [vmem:[#allocation2 + $0x60] sm:$0xff] }
  0x81   : > { %v2629_v28 = vsel %vm234_vm1, 1.0, %v3267_v25  ;;  %vm417_vm1 = vcmask 261120  }
  0x86   : > { %v189_v23 = vpop.permute.xlu1 %188  ;;  %v183_v24 = vpop.permute.xlu0 %182 }
  0x87   : > { %vm226_vm2 = vcmp.eq.s32.totalorder %v183_v24, %v180_v22  ;;  %v216_v27 = vpop.permute.xlu2 %215  ;;  %vm228_vm6 = vcmp.eq.s32.totalorder %v189_v23, %v180_v22  ;;  %v284_v24 = vld [vmem:[#allocation2 + $0x68] sm:$0xff] }
  0x88   : > { %v2621_v26 = vsel %vm226_vm2, 1.0, %v3267_v25  ;;  %vm237_vm3 = vcmp.eq.s32.totalorder %v216_v27, %v180_v22  ;;  %v2623_v35 = vsel %vm228_vm6, 1.0, %v3267_v25  ;;  %v285_v27 = vld [vmem:[#allocation2 + $0x70] sm:$0xff]  ;;  %vm692_vm2 = vcmask 982016  }
  0x89   : > { %2636 = vmatmul.msk.f32.vlgmr.msra.gmra.mxu0 %vm288_vm0, %v2621_v26  ;;  %v2632_v29 = vsel %vm237_vm3, 1.0, %v3267_v25 }
  0x8e   : > { %v192_v30 = vpop.permute.xlu1 %191  ;;  %v186_v31 = vpop.permute.xlu0 %185 }
  0x8f   : > { %vm227_vm4 = vcmp.eq.s32.totalorder %v186_v31, %v180_v22  ;;  %v225_v33 = vpop.permute.xlu2 %224  ;;  %vm229_vm7 = vcmp.eq.s32.totalorder %v192_v30, %v180_v22  ;;  %v286_v30 = vld [vmem:[#allocation2 + $0x78] sm:$0xff] }
  0x90   : > { %v2622_v32 = vsel %vm227_vm4, 1.0, %v3267_v25  ;;  %vm240_vm5 = vcmp.eq.s32.totalorder %v225_v33, %v180_v22  ;;  %v2624_v40 = vsel %vm229_vm7, 1.0, %v3267_v25  ;;  %v287_v33 = vld [vmem:[#allocation2 + $0x80] sm:$0xff] }
  0x91   : > { %2637 = vmatmul.msk.f32.gmra.mxu0 %vm288_vm0, %v2622_v32  ;;  %v2635_v34 = vsel %vm240_vm5, 1.0, %v3267_v25 }
  0x92   : > { %2650 = vmatmul.msk.f32.vlgmr.msra.gmra.mxu1 %vm288_vm0, %v2635_v34 }
  0x96   : > { %v204_v36 = vpop.permute.xlu1 %203  ;;  %v201_v37 = vpop.permute.xlu0 %200 }
  0x97   : > { %vm232_vm14 = vcmp.eq.s32.totalorder %v201_v37, %v180_v22  ;;  %vm233_vm15 = vcmp.eq.s32.totalorder %v204_v36, %v180_v22 }
  0x98   : > { %v2627_v49 = vsel %vm232_vm14, 1.0, %v3267_v25  ;;  %v2628_v50 = vsel %vm233_vm15, 1.0, %v3267_v25 }
  0x99   : > { %2638 = vmatmul.msk.f32.gmra.mxu0 %vm288_vm0, %v2623_v35 }
  0x9e   : > { %v213_v38 = vpop.permute.xlu1 %212  ;;  %v210_v39 = vpop.permute.xlu0 %209 }
  0x9f   : > { %vm236_vm8 = vcmp.eq.s32.totalorder %v213_v38, %v180_v22  ;;  %vm235_vm9 = vcmp.eq.s32.totalorder %v210_v39, %v180_v22 }
  0xa0   : > { %v2631_v41 = vsel %vm236_vm8, 1.0, %v3267_v25  ;;  %v2630_v42 = vsel %vm235_vm9, 1.0, %v3267_v25 }
  0xa1   : > { %2639 = vmatmul.msk.f32.gmra.mxu0 %vm288_vm0, %v2624_v40 }
  0xa6   : > { %v222_v43 = vpop.permute.xlu1 %221  ;;  %v219_v44 = vpop.permute.xlu0 %218 }
  0xa7   : > { %vm239_vm11 = vcmp.eq.s32.totalorder %v222_v43, %v180_v22  ;;  %vm238_vm12 = vcmp.eq.s32.totalorder %v219_v44, %v180_v22 }
  0xa8   : > { %v2634_v46 = vsel %vm239_vm11, 1.0, %v3267_v25  ;;  %v2633_v47 = vsel %vm238_vm12, 1.0, %v3267_v25 }
  0xa9   : > { %2640 = vmatmul.msk.f32.gmra.mxu0 %vm288_vm0, %v2625_v45 }
  0xb1   : > { %2641 = vmatmul.msk.f32.gmra.mxu0 %vm288_vm0, %v2626_v48  ;;  %v415_v48 = vld [vmem:[#allocation2 + $0xe8] sm:$0xff] }
  0xb9   : > { %2642 = vmatmul.msk.f32.gmra.mxu0 %vm288_vm0, %v2627_v49  ;;  %v416_v49 = vperm.slane %v415_v48, 0 }
  0xc1   : > { %2643 = vmatmul.msk.f32.gmra.mxu0 %vm288_vm0, %v2628_v50 }
  0xc9   : > { %2644 = vmatmul.msk.f32.gmra.mxu0 %vm288_vm0, %v2629_v28 }
  0xd1   : > { %2645 = vmatmul.msk.f32.gmra.mxu0 %vm288_vm0, %v2630_v42 }
  0xd9   : > { %2646 = vmatmul.msk.f32.gmra.mxu0 %vm288_vm0, %v2631_v41 }
  0xe1   : > { %2647 = vmatmul.msk.f32.gmra.mxu0 %vm288_vm0, %v2632_v29 }
  0xe9   : > { %2648 = vmatmul.msk.f32.gmra.mxu0 %vm288_vm0, %v2633_v47 }
  0xf1   : > { %2649 = vmatmul.msk.f32.gmra.mxu0 %vm288_vm0, %v2634_v46 }
 0x106   : > { %v351_v56 = vpop.f32.mrf.mxu0 }
 0x107   : > { %v3318_v57 = vadd.f32 %v351_v56, %v273_v55 }
 0x109   : > { %2651 = vmatmul.msk.f32.vlgmr.msrb.gmra.mxu1 %vm417_vm1, %v3318_v57 }
 0x10e   : > { %v354_v59 = vpop.f32.mrf.mxu0 }
 0x10f   : > { %v3322_v60 = vadd.f32 %v354_v59, %v274_v58  ;;  %v393_v34 = vpop.f32.mrf.mxu1 }
 0x110   : > { %v3374_v35 = vadd.f32 %v393_v34, %v287_v33 }
 0x111   : > { %2652 = vmatmul.msk.f32.gmra.mxu1 %vm417_vm1, %v3322_v60 }
 0x116   : > { %v357_v62 = vpop.f32.mrf.mxu0 }
 0x117   : > { %v3326_v63 = vadd.f32 %v357_v62, %v275_v61 }
 0x119   : > { %2653 = vmatmul.msk.f32.gmra.mxu1 %vm417_vm1, %v3326_v63 }
 0x11e   : > { %v360_v1 = vpop.f32.mrf.mxu0 }
 0x11f   : > { %v3330_v2 = vadd.f32 %v360_v1, %v276_v0 }
 0x121   : > { %2654 = vmatmul.msk.f32.gmra.mxu1 %vm417_vm1, %v3330_v2 }
 0x126   : > { %v363_v4 = vpop.f32.mrf.mxu0 }
 0x127   : > { %v3334_v5 = vadd.f32 %v363_v4, %v277_v3 }
 0x129   : > { %2655 = vmatmul.msk.f32.gmra.mxu1 %vm417_vm1, %v3334_v5 }
 0x12e   : > { %v366_v7 = vpop.f32.mrf.mxu0 }
 0x12f   : > { %v3338_v8 = vadd.f32 %v366_v7, %v278_v6 }
 0x131   : > { %2656 = vmatmul.msk.f32.gmra.mxu1 %vm417_vm1, %v3338_v8 }
 0x136   : > { %v369_v10 = vpop.f32.mrf.mxu0 }
 0x137   : > { %v3342_v11 = vadd.f32 %v369_v10, %v279_v9 }
 0x139   : > { %2657 = vmatmul.msk.f32.gmra.mxu1 %vm417_vm1, %v3342_v11 }
 0x13e   : > { %v372_v13 = vpop.f32.mrf.mxu0 }
 0x13f   : > { %v3346_v14 = vadd.f32 %v372_v13, %v280_v12 }
 0x141   : > { %2658 = vmatmul.msk.f32.gmra.mxu1 %vm417_vm1, %v3346_v14 }
 0x146   : > { %v375_v16 = vpop.f32.mrf.mxu0 }
 0x147   : > { %v3350_v17 = vadd.f32 %v375_v16, %v281_v15 }
 0x149   : > { %2659 = vmatmul.msk.f32.gmra.mxu1 %vm417_vm1, %v3350_v17 }
 0x14e   : > { %v378_v19 = vpop.f32.mrf.mxu0 }
 0x14f   : > { %v3354_v20 = vadd.f32 %v378_v19, %v282_v18 }
 0x151   : > { %2660 = vmatmul.msk.f32.gmra.mxu1 %vm417_vm1, %v3354_v20 }
 0x156   : > { %v381_v22 = vpop.f32.mrf.mxu0 }
 0x157   : > { %v3358_v23 = vadd.f32 %v381_v22, %v283_v21 }
 0x159   : > { %2661 = vmatmul.msk.f32.gmra.mxu1 %vm417_vm1, %v3358_v23 }
 0x15e   : > { %v384_v25 = vpop.f32.mrf.mxu0 }
 0x15f   : > { %v3362_v26 = vadd.f32 %v384_v25, %v284_v24 }
 0x161   : > { %2662 = vmatmul.msk.f32.gmra.mxu1 %vm417_vm1, %v3362_v26 }
 0x166   : > { %v387_v28 = vpop.f32.mrf.mxu0 }
 0x167   : > { %v3366_v29 = vadd.f32 %v387_v28, %v285_v27 }
 0x169   : > { %2663 = vmatmul.msk.f32.gmra.mxu1 %vm417_vm1, %v3366_v29 }
 0x16e   : > { %v390_v31 = vpop.f32.mrf.mxu0 }
 0x16f   : > { %v3370_v32 = vadd.f32 %v390_v31, %v286_v30 }
 0x171   : > { %2664 = vmatmul.msk.f32.gmra.mxu1 %vm417_vm1, %v3370_v32 }
 0x179   : > { %2665 = vmatmul.msk.f32.gmra.mxu1 %vm417_vm1, %v3374_v35 }
 0x186   : > { %v480_v36 = vpop.f32.mrf.mxu1 }
 0x187   : > { %v3418_v4 = vadd.f32 %v480_v36, %v416_v49 }
 0x18e   : > { %v483_v37 = vpop.f32.mrf.mxu1 }
 0x18f   : > { %v3426_v6 = vadd.f32 %v483_v37, %v416_v49 }
 0x196   : > { %v486_v38 = vpop.f32.mrf.mxu1 }
 0x197   : > { %v3437_v10 = vadd.f32 %v486_v38, %v416_v49 }
 0x19e   : > { %v489_v39 = vpop.f32.mrf.mxu1 }
 0x19f   : > { %v3406_v0 = vadd.f32 %v489_v39, %v416_v49 }
 0x1a6   : > { %v492_v40 = vpop.f32.mrf.mxu1 }
 0x1a7   : > { %v3414_v1 = vadd.f32 %v492_v40, %v416_v49 }
 0x1ae   : > { %v495_v41 = vpop.f32.mrf.mxu1 }
 0x1af   : > { %v3428_v7 = vadd.f32 %v495_v41, %v416_v49 }
 0x1b6   : > { %v498_v42 = vpop.f32.mrf.mxu1 }
 0x1b7   : > { %v3394_v59 = vadd.f32 %v498_v42, %v416_v49 }
 0x1be   : > { %v501_v43 = vpop.f32.mrf.mxu1 }
 0x1bf   : > { %v3402_v61 = vadd.f32 %v501_v43, %v416_v49 }
 0x1c6   : > { %v504_v44 = vpop.f32.mrf.mxu1 }
 0x1c7   : > { %v3416_v3 = vadd.f32 %v504_v44, %v416_v49 }
 0x1c9   : > { %v2903_v15 = vpack.i.bf16 %v3402_v61, %v3416_v3 }
 0x1ce   : > { %v507_v45 = vpop.f32.mrf.mxu1 }
 0x1cf   : > { %v3382_v53 = vadd.f32 %v507_v45, %v416_v49 }
 0x1d6   : > { %v510_v46 = vpop.f32.mrf.mxu1 }
 0x1d7   : > { %v3390_v56 = vadd.f32 %v510_v46, %v416_v49 }
 0x1d9   : > { %v2898_v9 = vpack.i.bf16 %v3382_v53, %v3390_v56 }
 0x1de   : > { %v513_v47 = vpop.f32.mrf.mxu1 }
 0x1df   : > { %v3404_v62 = vadd.f32 %v513_v47, %v416_v49 }
 0x1e6   : > { %v516_v50 = vpop.f32.mrf.mxu1 }
 0x1e7   : > { %v3378_v51 = vadd.f32 %v516_v50, %v416_v49  ;;  %v396_v50 = vld [vmem:[#allocation2 + $0x180] sm:$0xff] }
 0x1e9   : > { %564 = vrot.lane.b32.xlu2 %v3378_v51, %s3268_s23  ;;  %v2893_v13 = vpack.i.bf16 %v3404_v62, %v3378_v51 }
 0x1ee   : > { %v519_v52 = vpop.f32.mrf.mxu1 }
 0x1ef   : > { %v3384_v54 = vadd.f32 %v519_v52, %v416_v49 }
 0x1f1   : > { %566 = vrot.lane.b32.xlu1 %v3384_v54, %s3268_s23  ;;  %558 = vrot.lane.b32.xlu2 %v3382_v53, %s3268_s23 }
 0x1f6   : > { %v522_v55 = vpop.f32.mrf.mxu1 }
 0x1f7   : > { %v3392_v58 = vadd.f32 %v522_v55, %v416_v49 }
 0x1f9   : > { %568 = vrot.lane.b32.xlu0 %v3392_v58, %s3268_s23  ;;  %560 = vrot.lane.b32.xlu1 %v3390_v56, %s3268_s23  ;;  %v2908_v12 = vpack.i.bf16 %v3384_v54, %v3392_v58 }
 0x1fa   : > { %552 = vrot.lane.b32.xlu2 %v3394_v59, %s3268_s23 }
 0x201   : > { %562 = vrot.lane.b32.xlu0 %v3404_v62, %s3268_s23  ;;  %554 = vrot.lane.b32.xlu1 %v3402_v61, %s3268_s23 }
 0x202   : > { %546 = vrot.lane.b32.xlu2 %v3406_v0, %s3268_s23 }
 0x209   : > { %556 = vrot.lane.b32.xlu0 %v3416_v3, %s3268_s23  ;;  %548 = vrot.lane.b32.xlu1 %v3414_v1, %s3268_s23 }
 0x20a   : > { %540 = vrot.lane.b32.xlu2 %v3418_v4, %s3268_s23 }
 0x211   : > { %550 = vrot.lane.b32.xlu0 %v3428_v7, %s3268_s23  ;;  %542 = vrot.lane.b32.xlu1 %v3426_v6, %s3268_s23 }
 0x212   : > { %2899 = vrot.lane.b32.xlu2 %v2898_v9, %s3269_s24 }
 0x219   : > { %544 = vrot.lane.b32.xlu0 %v3437_v10, %s3268_s23  ;;  %2909 = vrot.lane.b32.xlu1 %v2908_v12, %s3269_s24 }
 0x221   : > { %2894 = vrot.lane.b32.xlu0 %v2893_v13, %s3269_s24 }
 0x229   : > { %2904 = vrot.lane.b32.xlu0 %v2903_v15, %s3269_s24 }
 0x243   : > { %v565_v18 = vpop.permute.xlu2 %564 }
 0x24b   : > { %v559_v22 = vpop.permute.xlu2 %558 }
 0x254   : > { %v553_v27 = vpop.permute.xlu2 %552 }
 0x25c   : > { %v547_v31 = vpop.permute.xlu2 %546 }
 0x263   : > { %v567_v16 = vpop.permute.xlu1 %566 }
 0x264   : > { %v541_v38 = vpop.permute.xlu2 %540 }
 0x26b   : > { %v569_v19 = vpop.permute.xlu0 %568  ;;  %v561_v21 = vpop.permute.xlu1 %560 }
 0x26c   : > { %2666 = vmatpush.xpose.msk.msrb.mxu0 %vm288_vm0, %v569_v19  ;;  %2850 = vmatpush.xpose.msk.msra.mxu2 %vm288_vm0, %v569_v19  ;;  %v2900_v43 = vpop.permute.xlu2 %2899  ;;  %v398_v19 = vld [vmem:[#allocation2 + $0x190] sm:$0xff] }
 0x26d   : > { %v2901_v45 = vunpack.i.l.bf16 %v2900_v43  ;;  %v2902_v47 = vunpack.i.h.bf16 %v2900_v43 }
 0x270   : > { %2667 = vmatpush.xpose.msk.msrb.mxu0 %vm288_vm0, %v567_v16  ;;  %2851 = vmatpush.xpose.msk.msra.mxu2 %vm288_vm0, %v567_v16 }
 0x273   : > { %v563_v24 = vpop.permute.xlu0 %562  ;;  %v555_v25 = vpop.permute.xlu1 %554 }
 0x274   : > { %2668 = vmatpush.xpose.msk.msrb.mxu0 %vm288_vm0, %v565_v18  ;;  %2852 = vmatpush.xpose.msk.msra.mxu2 %vm288_vm0, %v565_v18 }
 0x278   : > { %2669 = vmatpush.xpose.msk.msrb.mxu0 %vm288_vm0, %v563_v24  ;;  %2853 = vmatpush.xpose.msk.msra.mxu2 %vm288_vm0, %v563_v24 }
 0x27b   : > { %v557_v28 = vpop.permute.xlu0 %556  ;;  %v549_v30 = vpop.permute.xlu1 %548 }
 0x27c   : > { %2670 = vmatpush.xpose.msk.msrb.mxu0 %vm288_vm0, %v561_v21  ;;  %2854 = vmatpush.xpose.msk.msra.mxu2 %vm288_vm0, %v561_v21  ;;  %v402_v21 = vld [vmem:[#allocation2 + $0x1b0] sm:$0xff] }
 0x280   : > { %2671 = vmatpush.xpose.msk.msrb.mxu0 %vm288_vm0, %v559_v22  ;;  %2855 = vmatpush.xpose.msk.msra.mxu2 %vm288_vm0, %v559_v22 }
 0x283   : > { %v551_v33 = vpop.permute.xlu0 %550  ;;  %v543_v34 = vpop.permute.xlu1 %542 }
 0x284   : > { %2672 = vmatpush.xpose.msk.msrb.mxu0 %vm288_vm0, %v557_v28  ;;  %2856 = vmatpush.xpose.msk.msra.mxu2 %vm288_vm0, %v557_v28 }
 0x288   : > { %2673 = vmatpush.xpose.msk.msrb.mxu0 %vm288_vm0, %v555_v25  ;;  %2857 = vmatpush.xpose.msk.msra.mxu2 %vm288_vm0, %v555_v25 }
 0x28b   : > { %v545_v36 = vpop.permute.xlu0 %544  ;;  %v2910_v37 = vpop.permute.xlu1 %2909 }
 0x28c   : > { %2674 = vmatpush.xpose.msk.msrb.mxu0 %vm288_vm0, %v553_v27  ;;  %2858 = vmatpush.xpose.msk.msra.mxu2 %vm288_vm0, %v553_v27  ;;  %v2911_v39 = vunpack.i.l.bf16 %v2910_v37  ;;  %v2912_v40 = vunpack.i.h.bf16 %v2910_v37  ;;  %v2913_v37 = vpack.i.bf16 %v3428_v7, %v3394_v59 }
 0x28e   : > { %1009 = vmatpush.msra.mxu3 %v2911_v39 }
 0x290   : > { %2675 = vmatpush.xpose.msk.msrb.mxu0 %vm288_vm0, %v551_v33  ;;  %2859 = vmatpush.xpose.msk.msra.mxu2 %vm288_vm0, %v551_v33 }
 0x291   : > { %1010 = vmatpush.msra.mxu3 %v2912_v40  ;;  %v403_v40 = vld [vmem:[#allocation2 + $0x1b8] sm:$0xff] }
 0x293   : > { %v2895_v41 = vpop.permute.xlu0 %2894 }
 0x294   : > { %2676 = vmatpush.xpose.msk.msrb.mxu0 %vm288_vm0, %v549_v30  ;;  %2860 = vmatpush.xpose.msk.msra.mxu2 %vm288_vm0, %v549_v30  ;;  %v2896_v42 = vunpack.i.l.bf16 %v2895_v41  ;;  %v2897_v44 = vunpack.i.h.bf16 %v2895_v41  ;;  %v399_v30 = vld [vmem:[#allocation2 + $0x198] sm:$0xff]  ;;  %v405_v41 = vld [vmem:[#allocation2 + $0x1c8] sm:$0xff] }
 0x296   : > { %1011 = vmatpush.msra.mxu3 %v2896_v42 }
 0x298   : > { %2677 = vmatpush.xpose.msk.msrb.mxu0 %vm288_vm0, %v547_v31  ;;  %2861 = vmatpush.xpose.msk.msra.mxu2 %vm288_vm0, %v547_v31 }
 0x299   : > { %1012 = vmatpush.msra.mxu3 %v2897_v44 }
 0x29b   : > { %1013 = vmatpush.msra.mxu3 %v2901_v45  ;;  %v2905_v46 = vpop.permute.xlu0 %2904 }
 0x29c   : > { %2678 = vmatpush.xpose.msk.msrb.mxu0 %vm288_vm0, %v545_v36  ;;  %2862 = vmatpush.xpose.msk.msra.mxu2 %vm288_vm0, %v545_v36  ;;  %v2906_v48 = vunpack.i.l.bf16 %v2905_v46  ;;  %v2907_v49 = vunpack.i.h.bf16 %v2905_v46  ;;  %v2918_v36 = vpack.i.bf16 %v3406_v0, %v3414_v1 }
 0x29d   : > { %1014 = vmatpush.msra.mxu3 %v2902_v47 }
 0x29f   : > { %1015 = vmatpush.msra.mxu3 %v2906_v48 }
 0x2a0   : > { %2679 = vmatpush.xpose.msk.msrb.mxu0 %vm288_vm0, %v543_v34  ;;  %2863 = vmatpush.xpose.msk.msra.mxu2 %vm288_vm0, %v543_v34 }
 0x2a1   : > { %1016 = vmatpush.msra.mxu3 %v2907_v49 }
 0x2a4   : > { %2680 = vmatpush.xpose.msk.msrb.mxu0 %vm288_vm0, %v541_v38  ;;  %2864 = vmatpush.xpose.msk.msra.mxu2 %vm288_vm0, %v541_v38 }
 0x2a7   : > { %2681 = vmatmul.msk.f32.vlgmr.msrb.gmra.mxu0 %vm288_vm0, %v3418_v4  ;;  %2685 = vmatmul.msk.f32.vlgmr.msra.gmra.mxu2 %vm288_vm0, %v3414_v1  ;;  %v404_v1 = vld [vmem:[#allocation2 + $0x1c0] sm:$0xff] }
 0x2af   : > { %2682 = vmatmul.msk.f32.gmra.mxu0 %vm288_vm0, %v3426_v6  ;;  %2686 = vmatmul.msk.f32.gmra.mxu2 %vm288_vm0, %v3428_v7 }
 0x2b7   : > { %2683 = vmatmul.msk.f32.gmra.mxu0 %vm288_vm0, %v3437_v10  ;;  %2687 = vmatmul.msk.f32.gmra.mxu2 %vm288_vm0, %v3394_v59 }
 0x2bf   : > { %2684 = vmatmul.msk.f32.gmra.mxu0 %vm288_vm0, %v3406_v0  ;;  %2688 = vmatmul.msk.f32.gmra.mxu2 %vm288_vm0, %v3402_v61 }
 0x2c7   : > { %2689 = vmatmul.msk.f32.gmra.mxu2 %vm288_vm0, %v3416_v3  ;;  %v397_v3 = vld [vmem:[#allocation2 + $0x188] sm:$0xff] }
 0x2cf   : > { %2690 = vmatmul.msk.f32.gmra.mxu2 %vm288_vm0, %v3382_v53 }
 0x2d7   : > { %2691 = vmatmul.msk.f32.gmra.mxu2 %vm288_vm0, %v3390_v56  ;;  %v400_v56 = vld [vmem:[#allocation2 + $0x1a0] sm:$0xff] }
 0x2df   : > { %2692 = vmatmul.msk.f32.gmra.mxu2 %vm288_vm0, %v3404_v62 }
 0x2e7   : > { %2693 = vmatmul.msk.f32.gmra.mxu2 %vm288_vm0, %v3378_v51 }
 0x2ef   : > { %2694 = vmatmul.msk.f32.gmra.mxu2 %vm288_vm0, %v3384_v54 }
 0x2f7   : > { %2695 = vmatmul.msk.f32.gmra.mxu2 %vm288_vm0, %v3392_v58  ;;  %v401_v58 = vld [vmem:[#allocation2 + $0x1a8] sm:$0xff] }
 0x324   : > { %v647_v52 = vpop.f32.mrf.mxu0 }
 0x325   : > { %v648_v55 = vadd.f32 %v647_v52, %v396_v50 }
 0x327   : > { %v693_v53 = vsel %vm692_vm2, %v648_v55, -inf }
 0x328   : > { %694 = vmax.xlane.f32.xlu0 %v693_v53 }
 0x32a   : > { %v659_v61 = vpop.f32.mrf.mxu2 }
 0x32b   : > { %v660_v62 = vadd.f32 %v659_v61, %v400_v56 }
 0x32c   : > { %v650_v9 = vpop.f32.mrf.mxu0 }
 0x32d   : > { %v651_v12 = vadd.f32 %v650_v9, %v397_v3  ;;  %v705_v54 = vsel %vm692_vm2, %v660_v62, -inf }
 0x32f   : > { %v696_v51 = vsel %vm692_vm2, %v651_v12, -inf }
 0x330   : > { %697 = vmax.xlane.f32.xlu1 %v696_v51  ;;  %706 = vmax.xlane.f32.xlu0 %v705_v54 }
 0x332   : > { %v662_v13 = vpop.f32.mrf.mxu2 }
 0x333   : > { %v3513_v15 = vadd.f32 %v662_v13, %v401_v58 }
 0x334   : > { %v653_v16 = vpop.f32.mrf.mxu0 }
 0x335   : > { %v708_v18 = vsel %vm692_vm2, %v3513_v15, -inf  ;;  %v3517_v22 = vadd.f32 %v653_v16, %v398_v19 }
 0x336   : > { %709 = vmax.xlane.f32.xlu2 %v708_v18 }
 0x337   : > { %v699_v27 = vsel %vm692_vm2, %v3517_v22, -inf }
 0x33a   : > { %v665_v24 = vpop.f32.mrf.mxu2 }
 0x33b   : > { %v666_v25 = vadd.f32 %v665_v24, %v402_v21 }
 0x33c   : > { %v656_v31 = vpop.f32.mrf.mxu0 }
 0x33d   : > { %v711_v28 = vsel %vm692_vm2, %v666_v25, -inf  ;;  %v657_v33 = vadd.f32 %v656_v31, %v399_v30 }
 0x33e   : > { %700 = vmax.xlane.f32.xlu2 %v699_v27  ;;  %712 = vmax.xlane.f32.xlu1 %v711_v28 }
 0x33f   : > { %v702_v34 = vsel %vm692_vm2, %v657_v33, -inf }
 0x342   : > { %v668_v38 = vpop.f32.mrf.mxu2 }
 0x343   : > { %v3531_v43 = vadd.f32 %v668_v38, %v403_v40 }
 0x345   : > { %v714_v0 = vsel %vm692_vm2, %v3531_v43, -inf }
 0x346   : > { %703 = vmax.xlane.f32.xlu2 %v702_v34 }
 0x34a   : > { %v671_v39 = vpop.f32.mrf.mxu2 }
 0x34b   : > { %v3539_v7 = vadd.f32 %v671_v39, %v404_v1  ;;  %v410_v39 = vld [vmem:[#allocation2 + $0x1f0] sm:$0xff] }
 0x352   : > { %v674_v42 = vpop.f32.mrf.mxu2 }
 0x353   : > { %v3533_v44 = vadd.f32 %v674_v42, %v405_v41 }
 0x355   : > { %v720_v59 = vsel %vm692_vm2, %v3533_v44, -inf }
 0x357   : > { %2919 = vrot.lane.b32.xlu1 %v2918_v36, %s3269_s24 }
 0x35a   : > { %v3543_v45 = vpop.f32.mrf.mxu2 }
 0x35e   : > { %2914 = vrot.lane.b32.xlu2 %v2913_v37, %s3269_s24 }
 0x35f   : > { %918 = vrot.lane.b32.xlu1 %v3418_v4, %s3269_s24  ;;  %v717_v4 = vsel %vm692_vm2, %v3539_v7, -inf }
 0x362   : > { %v680_v49 = vpop.f32.mrf.mxu2 }
 0x36a   : > { %v683_v58 = vpop.f32.mrf.mxu2 }
 0x372   : > { %v686_v24 = vpop.f32.mrf.mxu2 }
 0x37a   : > { %v689_v40 = vpop.f32.mrf.mxu2 }
 0x387   : > { %715 = vmax.xlane.f32.xlu2 %v714_v0 }
 0x389   : > { %721 = vmax.xlane.f32.xlu1 %v720_v59 }
 0x38f   : > { %718 = vmax.xlane.f32.xlu2 %v717_v4 }
 0x39b   : > { %v695_v46 = vpop.xlane.xlu0 %694 }
 0x39c   : > { %v738_v47 = vsub.f32 %v648_v55, %v695_v46 }
 0x39e   : > { %v753_v48 = vmul.f32 1.442695, %v738_v47  ;;  %v407_v47 = vld [vmem:[#allocation2 + $0x1d8] sm:$0xff] }
 0x3a0   : > { %2964 = vpow2.f32 %v753_v48  ;;  %v3578_v48 = vadd.f32 %v680_v49, %v407_v47 }
 0x3a3   : > { %v698_v50 = vpop.xlane.xlu1 %697  ;;  %v707_v52 = vpop.xlane.xlu0 %706 }
 0x3a4   : > { %v739_v53 = vsub.f32 %v651_v12, %v698_v50  ;;  %v742_v56 = vsub.f32 %v660_v62, %v707_v52 }
 0x3a6   : > { %v3545_v61 = vpop.eup %2964  ;;  %v755_v3 = vmul.f32 1.442695, %v739_v53  ;;  %v761_v9 = vmul.f32 1.442695, %v742_v56 }
 0x3a7   : > { %v783_v51 = vsel %vm692_vm2, %v3545_v61, 0.0 }
 0x3a8   : > { %2966 = vpow2.f32 %v755_v3  ;;  %784 = vadd.xlane.f32.xlu0 %v783_v51  ;;  %v408_v3 = vld [vmem:[#allocation2 + $0x1e0] sm:$0xff]  ;;  %v409_v51 = vld [vmem:[#allocation2 + $0x1e8] sm:$0xff] }
 0x3a9   : > { %2968 = vpow2.f32 %v761_v9  ;;  %v710_v54 = vpop.xlane.xlu2 %709  ;;  %v3586_v9 = vadd.f32 %v683_v58, %v408_v3 }
 0x3aa   : > { %v743_v59 = vsub.f32 %v3513_v15, %v710_v54  ;;  %v726_v15 = vsel %vm692_vm2, %v3578_v48, -inf  ;;  %v3590_v54 = vadd.f32 %v686_v24, %v409_v51 }
 0x3ab   : > { %v729_v49 = vsel %vm692_vm2, %v3586_v9, -inf }
 0x3ae   : > { %v3549_v55 = vpop.eup %2966 }
 0x3af   : > { %v3551_v13 = vpop.eup %2968  ;;  %v786_v12 = vsel %vm692_vm2, %v3549_v55, 0.0 }
 0x3b0   : > { %787 = vadd.xlane.f32.xlu0 %v786_v12  ;;  %v795_v62 = vsel %vm692_vm2, %v3551_v13, 0.0  ;;  %v406_v12 = vld [vmem:[#allocation2 + $0x1d0] sm:$0xff] }
 0x3b1   : > { %796 = vadd.xlane.f32.xlu2 %v795_v62  ;;  %v713_v16 = vpop.xlane.xlu1 %712  ;;  %v701_v18 = vpop.xlane.xlu2 %700  ;;  %v732_v62 = vsel %vm692_vm2, %v3590_v54, -inf }
 0x3b2   : > { %v744_v19 = vsub.f32 %v666_v25, %v713_v16  ;;  %v740_v21 = vsub.f32 %v3517_v22, %v701_v18  ;;  %v3566_v25 = vadd.f32 %v689_v40, %v410_v39  ;;  %v3595_v16 = vadd.f32 %v3543_v45, %v406_v12 }
 0x3b4   : > { %v765_v27 = vmul.f32 1.442695, %v744_v19  ;;  %v757_v28 = vmul.f32 1.442695, %v740_v21  ;;  %v735_v4 = vsel %vm692_vm2, %v3566_v25, -inf  ;;  %v723_v18 = vsel %vm692_vm2, %v3595_v16, -inf }
 0x3b6   : > { %2970 = vpow2.f32 %v765_v27 }
 0x3b7   : > { %2972 = vpow2.f32 %v757_v28 }
 0x3b9   : > { %v704_v30 = vpop.xlane.xlu2 %703 }
 0x3ba   : > { %v741_v31 = vsub.f32 %v657_v33, %v704_v30  ;;  %v2923_v33 = vpack.i.bf16 %v3426_v6, %v3437_v10  ;;  %v763_v6 = vmul.f32 1.442695, %v743_v59 }
 0x3bc   : > { %v3558_v34 = vpop.eup %2970  ;;  %v759_v36 = vmul.f32 1.442695, %v741_v31 }
 0x3bd   : > { %v3560_v37 = vpop.eup %2972  ;;  %v801_v38 = vsel %vm692_vm2, %v3558_v34, 0.0 }
 0x3be   : > { %2974 = vpow2.f32 %v759_v36  ;;  %802 = vadd.xlane.f32.xlu1 %v801_v38  ;;  %v789_v22 = vsel %vm692_vm2, %v3560_v37, 0.0 }
 0x3bf   : > { %790 = vadd.xlane.f32.xlu2 %v789_v22  ;;  %2976 = vpow2.f32 %v763_v6 }
 0x3c1   : > { %v2915_v41 = vpop.permute.xlu2 %2914 }
 0x3c2   : > { %v2916_v42 = vunpack.i.l.bf16 %v2915_v41  ;;  %v2917_v1 = vunpack.i.h.bf16 %v2915_v41 }
 0x3c4   : > { %v3570_v0 = vpop.eup %2974  ;;  %2924 = vrot.lane.b32.xlu0 %v2923_v33, %s3269_s24  ;;  %1017 = vmatpush.msra.mxu3 %v2916_v42 }
 0x3c5   : > { %v792_v46 = vsel %vm692_vm2, %v3570_v0, 0.0  ;;  %v3582_v53 = vpop.eup %2976 }
 0x3c6   : > { %736 = vmax.xlane.f32.xlu1 %v735_v4  ;;  %1018 = vmatpush.msra.mxu3 %v2917_v1  ;;  %v798_v56 = vsel %vm692_vm2, %v3582_v53, 0.0 }
 0x3c7   : > { %793 = vadd.xlane.f32.xlu2 %v792_v46 }
 0x3c9   : > { %v2920_v10 = vpop.permute.xlu1 %2919 }
 0x3ca   : > { %v2921_v50 = vunpack.i.l.bf16 %v2920_v10  ;;  %v2922_v52 = vunpack.i.h.bf16 %v2920_v10 }
 0x3cc   : > { %1019 = vmatpush.msra.mxu3 %v2921_v50 }
 0x3ce   : > { %1020 = vmatpush.msra.mxu3 %v2922_v52 }
 0x3cf   : > { %727 = vmax.xlane.f32.xlu2 %v726_v15 }
 0x3d1   : > { %v3599_v58 = vpop.permute.xlu1 %918 }
 0x3d7   : > { %799 = vadd.xlane.f32.xlu2 %v798_v56 }
 0x3df   : > { %730 = vmax.xlane.f32.xlu2 %v729_v49 }
 0x3e7   : > { %733 = vmax.xlane.f32.xlu2 %v732_v62 }
 0x3ee   : > { %724 = vmax.xlane.f32.xlu0 %v723_v18 }
 0x3fa   : > { %v716_v19 = vpop.xlane.xlu2 %715 }
 0x3fb   : > { %v745_v21 = vsub.f32 %v3531_v43, %v716_v19 }
 0x3fc   : > { %v722_v27 = vpop.xlane.xlu1 %721 }
 0x3fd   : > { %v767_v24 = vmul.f32 1.442695, %v745_v21  ;;  %v747_v28 = vsub.f32 %v3533_v44, %v722_v27 }
 0x3ff   : > { %2978 = vpow2.f32 %v767_v24  ;;  %v771_v30 = vmul.f32 1.442695, %v747_v28 }
 0x401   : > { %2980 = vpow2.f32 %v771_v30 }
 0x402   : > { %v719_v31 = vpop.xlane.xlu2 %718 }
 0x403   : > { %v746_v45 = vsub.f32 %v3539_v7, %v719_v31 }
 0x405   : > { %v3604_v36 = vpop.eup %2978  ;;  %v769_v38 = vmul.f32 1.442695, %v746_v45 }
 0x406   : > { %v804_v39 = vsel %vm692_vm2, %v3604_v36, 0.0 }
 0x407   : > { %2982 = vpow2.f32 %v769_v38  ;;  %805 = vadd.xlane.f32.xlu0 %v804_v39  ;;  %v3608_v43 = vpop.eup %2980 }
 0x408   : > { %v810_v44 = vsel %vm692_vm2, %v3608_v43, 0.0 }
 0x40d   : > { %v3610_v40 = vpop.eup %2982 }
 0x40e   : > { %v807_v22 = vsel %vm692_vm2, %v3610_v40, 0.0 }
 0x40f   : > { %811 = vadd.xlane.f32.xlu0 %v810_v44  ;;  %808 = vadd.xlane.f32.xlu2 %v807_v22 }
 0x41b   : > { %v785_v7 = vpop.xlane.xlu0 %784 }
 0x41c   : > { %2984 = vrcp.f32 %v785_v7 }
 0x422   : > { %v2985_v41 = vpop.eup %2984 }
 0x423   : > { %v843_v33 = vmul.f32 %v2985_v41, %v785_v7  ;;  %v788_v42 = vpop.xlane.xlu0 %787 }
 0x424   : > { %2986 = vrcp.f32 %v788_v42  ;;  %v797_v1 = vpop.xlane.xlu2 %796 }
 0x425   : > { %v858_v59 = vsub.f32 2.0, %v843_v33  ;;  %2988 = vrcp.f32 %v797_v1 }
 0x427   : > { %v873_v4 = vmul.f32 %v2985_v41, %v858_v59 }
 0x429   : > { %v888_v46 = vmul.f32 %v3545_v61, %v873_v4 }
 0x42a   : > { %v2987_v47 = vpop.eup %2986 }
 0x42b   : > { %v2989_v6 = vpop.eup %2988  ;;  %v844_v10 = vmul.f32 %v2987_v47, %v788_v42  ;;  %903 = vst.msk [vmem:[%s3620_s29 + $0x78] sm:$0xff] %vm692_vm2, %v888_v46 }
 0x42c   : > { %v847_v50 = vmul.f32 %v2989_v6, %v797_v1 }
 0x42d   : > { %v859_v52 = vsub.f32 2.0, %v844_v10 }
 0x42e   : > { %v862_v15 = vsub.f32 2.0, %v847_v50 }
 0x42f   : > { %v874_v56 = vmul.f32 %v2987_v47, %v859_v52 }
 0x430   : > { %v877_v3 = vmul.f32 %v2989_v6, %v862_v15 }
 0x431   : > { %v803_v49 = vpop.xlane.xlu1 %802  ;;  %v889_v51 = vmul.f32 %v3549_v55, %v874_v56 }
 0x432   : > { %2990 = vrcp.f32 %v803_v49  ;;  %v791_v12 = vpop.xlane.xlu2 %790  ;;  %v892_v62 = vmul.f32 %v3551_v13, %v877_v3 }
 0x433   : > { %2992 = vrcp.f32 %v791_v12  ;;  %904 = vst.msk [vmem:[%s3620_s29 + $0x80] sm:$0xff] %vm692_vm2, %v889_v51 }
 0x434   : > { %907 = vst.msk [vmem:[%s3620_s29 + $0x98] sm:$0xff] %vm692_vm2, %v892_v62 }
 0x436   : > { %v2925_v61 = vpop.permute.xlu0 %2924 }
 0x437   : > { %v2926_v18 = vunpack.i.l.bf16 %v2925_v61  ;;  %v2927_v24 = vunpack.i.h.bf16 %v2925_v61 }
 0x438   : > { %v2991_v19 = vpop.eup %2990 }
 0x439   : > { %v2993_v21 = vpop.eup %2992  ;;  %v849_v27 = vmul.f32 %v2991_v19, %v803_v49  ;;  %1021 = vmatpush.msra.mxu3 %v2926_v18  ;;  %v737_v22 = vpop.xlane.xlu1 %736 }
 0x43a   : > { %v845_v28 = vmul.f32 %v2993_v21, %v791_v12  ;;  %v794_v30 = vpop.xlane.xlu2 %793 }
 0x43b   : > { %v864_v55 = vsub.f32 2.0, %v849_v27  ;;  %2994 = vrcp.f32 %v794_v30  ;;  %1022 = vmatpush.msra.mxu3 %v2927_v24  ;;  %v1073_v24 = vld [vmem:[#allocation2 + $0xc0] sm:$0xff] }
 0x43c   : > { %v860_v13 = vsub.f32 2.0, %v845_v28  ;;  %v1072_v28 = vld [vmem:[#allocation2 + $0xb8] sm:$0xff]  ;;  %1136 = vmatpush.msra.mxu0 %v1073_v24 }
 0x43d   : > { %v879_v31 = vmul.f32 %v2991_v19, %v864_v55  ;;  %1023 = vmatpush.msra.mxu3 %v3599_v58  ;;  %v752_v58 = vsub.f32 %v3566_v25, %v737_v22 }
 0x43e   : > { %v875_v45 = vmul.f32 %v2993_v21, %v860_v13  ;;  %2696 = vmatmul.msk.f32.vlgmr.msra.gmra.mxu3 %vm692_vm2, %v888_v46  ;;  %1137 = vmatpush.msra.mxu0 %v1072_v28 }
 0x43f   : > { %v894_v38 = vmul.f32 %v3558_v34, %v879_v31 }
 0x440   : > { %v890_v39 = vmul.f32 %v3560_v37, %v875_v45  ;;  %v781_v37 = vmul.f32 1.442695, %v752_v58 }
 0x441   : > { %v2995_v44 = vpop.eup %2994  ;;  %909 = vst.msk [vmem:[%s3620_s29 + $0xa8] sm:$0xff] %vm692_vm2, %v894_v38 }
 0x442   : > { %v846_v7 = vmul.f32 %v2995_v44, %v794_v30  ;;  %v728_v41 = vpop.xlane.xlu2 %727  ;;  %905 = vst.msk [vmem:[%s3620_s29 + $0x88] sm:$0xff] %vm692_vm2, %v890_v39  ;;  %v1071_v30 = vld [vmem:[#allocation2 + $0xb0] sm:$0xff] }
 0x443   : > { %v749_v33 = vsub.f32 %v3578_v48, %v728_v41  ;;  %1138 = vmatpush.msra.mxu0 %v1071_v30 }
 0x444   : > { %v861_v42 = vsub.f32 2.0, %v846_v7 }
 0x445   : > { %v775_v1 = vmul.f32 1.442695, %v749_v33 }
 0x446   : > { %v876_v59 = vmul.f32 %v2995_v44, %v861_v42  ;;  %2697 = vmatmul.msk.f32.gmra.mxu3 %vm692_vm2, %v889_v51 }
 0x447   : > { %2996 = vpow2.f32 %v775_v1 }
 0x448   : > { %v891_v34 = vmul.f32 %v3570_v0, %v876_v59 }
 0x44a   : > { %v800_v4 = vpop.xlane.xlu2 %799  ;;  %906 = vst.msk [vmem:[%s3620_s29 + $0x90] sm:$0xff] %vm692_vm2, %v891_v34 }
 0x44b   : > { %2998 = vrcp.f32 %v800_v4 }
 0x44c   : > { %3000 = vpow2.f32 %v781_v37 }
 0x44d   : > { %v3645_v46 = vpop.eup %2996 }
 0x44e   : > { %v816_v48 = vsel %vm692_vm2, %v3645_v46, 0.0  ;;  %2698 = vmatmul.msk.f32.gmra.mxu3 %vm692_vm2, %v890_v39 }
 0x44f   : > { %817 = vadd.xlane.f32.xlu2 %v816_v48 }
 0x451   : > { %v2999_v25 = vpop.eup %2998 }
 0x452   : > { %v848_v47 = vmul.f32 %v2999_v25, %v800_v4  ;;  %v731_v6 = vpop.xlane.xlu2 %730  ;;  %v3650_v10 = vpop.eup %3000 }
 0x453   : > { %v750_v0 = vsub.f32 %v3586_v9, %v731_v6  ;;  %v825_v56 = vsel %vm692_vm2, %v3650_v10, 0.0 }
 0x454   : > { %v863_v50 = vsub.f32 2.0, %v848_v47 }
 0x455   : > { %v777_v52 = vmul.f32 1.442695, %v750_v0 }
 0x456   : > { %v878_v15 = vmul.f32 %v2999_v25, %v863_v50  ;;  %2699 = vmatmul.msk.f32.gmra.mxu3 %vm692_vm2, %v891_v34 }
 0x457   : > { %3002 = vpow2.f32 %v777_v52  ;;  %826 = vadd.xlane.f32.xlu2 %v825_v56 }
 0x458   : > { %v893_v3 = vmul.f32 %v3582_v53, %v878_v15 }
 0x45a   : > { %908 = vst.msk [vmem:[%s3620_s29 + $0xa0] sm:$0xff] %vm692_vm2, %v893_v3  ;;  %v734_v9 = vpop.xlane.xlu2 %733 }
 0x45b   : > { %v751_v18 = vsub.f32 %v3590_v54, %v734_v9 }
 0x45d   : > { %v3659_v49 = vpop.eup %3002  ;;  %v779_v53 = vmul.f32 1.442695, %v751_v18 }
 0x45e   : > { %v819_v51 = vsel %vm692_vm2, %v3659_v49, 0.0  ;;  %2700 = vmatmul.msk.f32.gmra.mxu3 %vm692_vm2, %v892_v62 }
 0x45f   : > { %820 = vadd.xlane.f32.xlu0 %v819_v51 }
 0x461   : > { %v725_v12 = vpop.xlane.xlu0 %724 }
 0x462   : > { %v748_v61 = vsub.f32 %v3595_v16, %v725_v12 }
 0x464   : > { %v773_v19 = vmul.f32 1.442695, %v748_v61 }
 0x466   : > { %3004 = vpow2.f32 %v773_v19  ;;  %2701 = vmatmul.msk.f32.gmra.mxu3 %vm692_vm2, %v893_v3 }
 0x467   : > { %3006 = vpow2.f32 %v779_v53 }
 0x46c   : > { %v3667_v21 = vpop.eup %3004 }
 0x46d   : > { %v813_v27 = vsel %vm692_vm2, %v3667_v21, 0.0  ;;  %v3672_v62 = vpop.eup %3006 }
 0x46e   : > { %814 = vadd.xlane.f32.xlu1 %v813_v27  ;;  %2702 = vmatmul.msk.f32.gmra.mxu3 %vm692_vm2, %v894_v38  ;;  %v822_v16 = vsel %vm692_vm2, %v3672_v62, 0.0 }
 0x476   : > { %823 = vadd.xlane.f32.xlu1 %v822_v16 }
 0x47a   : > { %v806_v54 = vpop.xlane.xlu0 %805 }
 0x47b   : > { %3008 = vrcp.f32 %v806_v54 }
 0x481   : > { %v3009_v55 = vpop.eup %3008 }
 0x482   : > { %v850_v13 = vmul.f32 %v3009_v55, %v806_v54  ;;  %v812_v31 = vpop.xlane.xlu0 %811  ;;  %v809_v45 = vpop.xlane.xlu2 %808 }
 0x483   : > { %3010 = vrcp.f32 %v812_v31 }
 0x484   : > { %v865_v38 = vsub.f32 2.0, %v850_v13  ;;  %3012 = vrcp.f32 %v809_v45 }
 0x486   : > { %v880_v39 = vmul.f32 %v3009_v55, %v865_v38 }
 0x488   : > { %v895_v44 = vmul.f32 %v3604_v36, %v880_v39  ;;  %v1070_v36 = vld [vmem:[#allocation2 + $0xa8] sm:$0xff] }
 0x489   : > { %v3011_v22 = vpop.eup %3010  ;;  %1139 = vmatpush.msra.mxu0 %v1070_v36 }
 0x48a   : > { %v3013_v7 = vpop.eup %3012  ;;  %v852_v41 = vmul.f32 %v3011_v22, %v812_v31  ;;  %910 = vst.msk [vmem:[%s3620_s29 + $0xb0] sm:$0xff] %vm692_vm2, %v895_v44  ;;  %2703 = vmatmul.msk.f32.gmra.mxu3 %vm692_vm2, %v895_v44 }
 0x48b   : > { %v851_v33 = vmul.f32 %v3013_v7, %v809_v45 }
 0x48c   : > { %v867_v42 = vsub.f32 2.0, %v852_v41 }
 0x48d   : > { %v866_v58 = vsub.f32 2.0, %v851_v33 }
 0x48e   : > { %v882_v1 = vmul.f32 %v3011_v22, %v867_v42 }
 0x48f   : > { %v881_v59 = vmul.f32 %v3013_v7, %v866_v58  ;;  %v1076_v58 = vld [vmem:[#allocation2 + $0xd8] sm:$0xff] }
 0x490   : > { %v897_v34 = vmul.f32 %v3608_v43, %v882_v1  ;;  %v1075_v1 = vld [vmem:[#allocation2 + $0xd0] sm:$0xff] }
 0x491   : > { %v896_v37 = vmul.f32 %v3610_v40, %v881_v59  ;;  %v1074_v59 = vld [vmem:[#allocation2 + $0xc8] sm:$0xff] }
 0x492   : > { %912 = vst.msk [vmem:[%s3620_s29 + $0xc0] sm:$0xff] %vm692_vm2, %v897_v34 }
 0x493   : > { %911 = vst.msk [vmem:[%s3620_s29 + $0xb8] sm:$0xff] %vm692_vm2, %v896_v37  ;;  %2704 = vmatmul.msk.f32.gmra.mxu3 %vm692_vm2, %v896_v37 }
 0x49b   : > { %2705 = vmatmul.msk.f32.gmra.mxu3 %vm692_vm2, %v897_v34 }
 0x4c1   : > { %v1025_v4 = vpop.f32.mrf.mxu3 }
 0x4c2   : > { %v818_v48 = vpop.xlane.xlu2 %817  ;;  %v3689_v25 = vadd.f32 %v1025_v4, %v3318_v57 }
 0x4c3   : > { %3014 = vrcp.f32 %v818_v48 }
 0x4c4   : > { %2711 = vmatmul.msk.f32.vlgmr.msra.gmra.mxu0 %vm417_vm1, %v3689_v25 }
 0x4c9   : > { %v3015_v43 = vpop.eup %3014  ;;  %v1028_v40 = vpop.f32.mrf.mxu3 }
 0x4ca   : > { %v854_v47 = vmul.f32 %v3015_v43, %v818_v48  ;;  %v827_v6 = vpop.xlane.xlu2 %826  ;;  %v3694_v0 = vadd.f32 %v1028_v40, %v3322_v60 }
 0x4cb   : > { %3016 = vrcp.f32 %v827_v6 }
 0x4cc   : > { %v869_v50 = vsub.f32 2.0, %v854_v47  ;;  %2712 = vmatmul.msk.f32.gmra.mxu0 %vm417_vm1, %v3694_v0 }
 0x4ce   : > { %v884_v52 = vmul.f32 %v3015_v43, %v869_v50 }
 0x4d0   : > { %v899_v57 = vmul.f32 %v3645_v46, %v884_v52 }
 0x4d1   : > { %v3017_v15 = vpop.eup %3016  ;;  %v1031_v56 = vpop.f32.mrf.mxu3 }
 0x4d2   : > { %v857_v3 = vmul.f32 %v3017_v15, %v827_v6  ;;  %v821_v51 = vpop.xlane.xlu0 %820  ;;  %v3700_v9 = vadd.f32 %v1031_v56, %v3326_v63  ;;  %914 = vst.msk [vmem:[%s3620_s29 + $0xd0] sm:$0xff] %vm692_vm2, %v899_v57 }
 0x4d3   : > { %3018 = vrcp.f32 %v821_v51 }
 0x4d4   : > { %v872_v60 = vsub.f32 2.0, %v857_v3  ;;  %2713 = vmatmul.msk.f32.gmra.mxu0 %vm417_vm1, %v3700_v9 }
 0x4d6   : > { %v887_v12 = vmul.f32 %v3017_v15, %v872_v60 }
 0x4d8   : > { %v902_v61 = vmul.f32 %v3650_v10, %v887_v12 }
 0x4d9   : > { %v3019_v46 = vpop.eup %3018  ;;  %v1034_v18 = vpop.f32.mrf.mxu3 }
 0x4da   : > { %v855_v19 = vmul.f32 %v3019_v46, %v821_v51  ;;  %v3708_v53 = vadd.f32 %v1034_v18, %v3330_v2  ;;  %917 = vst.msk [vmem:[%s3620_s29 + $0xe8] sm:$0xff] %vm692_vm2, %v902_v61 }
 0x4dc   : > { %v870_v63 = vsub.f32 2.0, %v855_v19  ;;  %2714 = vmatmul.msk.f32.gmra.mxu0 %vm417_vm1, %v3708_v53 }
 0x4de   : > { %v885_v27 = vmul.f32 %v3019_v46, %v870_v63 }
 0x4e0   : > { %v900_v16 = vmul.f32 %v3659_v49, %v885_v27 }
 0x4e1   : > { %v815_v54 = vpop.xlane.xlu1 %814  ;;  %v1037_v24 = vpop.f32.mrf.mxu3 }
 0x4e2   : > { %3020 = vrcp.f32 %v815_v54  ;;  %v3716_v10 = vadd.f32 %v1037_v24, %v3334_v5  ;;  %915 = vst.msk [vmem:[%s3620_s29 + $0xd8] sm:$0xff] %vm692_vm2, %v900_v16 }
 0x4e4   : > { %2715 = vmatmul.msk.f32.gmra.mxu0 %vm417_vm1, %v3716_v10 }
 0x4e8   : > { %v3021_v2 = vpop.eup %3020 }
 0x4e9   : > { %v853_v28 = vmul.f32 %v3021_v2, %v815_v54  ;;  %v824_v30 = vpop.xlane.xlu1 %823  ;;  %v1040_v55 = vpop.f32.mrf.mxu3 }
 0x4ea   : > { %3022 = vrcp.f32 %v824_v30  ;;  %v3723_v13 = vadd.f32 %v1040_v55, %v3338_v8 }
 0x4eb   : > { %v868_v49 = vsub.f32 2.0, %v853_v28 }
 0x4ec   : > { %2716 = vmatmul.msk.f32.gmra.mxu0 %vm417_vm1, %v3723_v13 }
 0x4ed   : > { %v883_v5 = vmul.f32 %v3021_v2, %v868_v49 }
 0x4ef   : > { %v898_v31 = vmul.f32 %v3667_v21, %v883_v5 }
 0x4f0   : > { %v3023_v45 = vpop.eup %3022 }
 0x4f1   : > { %v856_v38 = vmul.f32 %v3023_v45, %v824_v30  ;;  %v1043_v39 = vpop.f32.mrf.mxu3  ;;  %913 = vst.msk [vmem:[%s3620_s29 + $0xc8] sm:$0xff] %vm692_vm2, %v898_v31  ;;  %2706 = vmatmul.msk.f32.gmra.mxu3 %vm692_vm2, %v898_v31 }
 0x4f2   : > { %v3732_v44 = vadd.f32 %v1043_v39, %v3342_v11 }
 0x4f3   : > { %v871_v8 = vsub.f32 2.0, %v856_v38 }
 0x4f4   : > { %2717 = vmatmul.msk.f32.gmra.mxu0 %vm417_vm1, %v3732_v44 }
 0x4f5   : > { %v886_v22 = vmul.f32 %v3023_v45, %v871_v8  ;;  %v1325_v8 = vld [vmem:[#allocation2 + $0xf8] sm:$0xff] }
 0x4f7   : > { %v901_v7 = vmul.f32 %v3672_v62, %v886_v22  ;;  %v1324_v22 = vld [vmem:[#allocation2 + $0xf0] sm:$0xff] }
 0x4f9   : > { %2707 = vmatmul.msk.f32.gmra.mxu3 %vm692_vm2, %v899_v57  ;;  %916 = vst.msk [vmem:[%s3620_s29 + $0xe0] sm:$0xff] %vm692_vm2, %v901_v7 }
 0x501   : > { %2708 = vmatmul.msk.f32.gmra.mxu3 %vm692_vm2, %v900_v16 }
 0x509   : > { %2709 = vmatmul.msk.f32.gmra.mxu3 %vm692_vm2, %v901_v7 }
 0x50d   : > { %v1046_v21 = vpop.f32.mrf.mxu3 }
 0x50e   : > { %v3743_v41 = vadd.f32 %v1046_v21, %v3346_v14  ;;  %v1077_v14 = vld [vmem:[#allocation2 + $0xe0] sm:$0xff] }
 0x50f   : > { %1259 = vmatpush.msra.mxu1 %v1077_v14 }
 0x510   : > { %2718 = vmatmul.msk.f32.gmra.mxu0 %vm417_vm1, %v3743_v41 }
 0x511   : > { %2710 = vmatmul.msk.f32.gmra.mxu3 %vm692_vm2, %v902_v61  ;;  %1260 = vmatpush.msra.mxu1 %v1076_v58 }
 0x513   : > { %1261 = vmatpush.msra.mxu1 %v1075_v1 }
 0x515   : > { %1262 = vmatpush.msra.mxu1 %v1074_v59 }
 0x516   : > { %v1049_v11 = vpop.f32.mrf.mxu3 }
 0x517   : > { %v3749_v62 = vadd.f32 %v1049_v11, %v3350_v17  ;;  %v3758_v17 = vld [vmem:[#allocation2 + $0xe8] sm:$0xff] }
 0x518   : > { %v3761_v34 = vperm.slane %v3758_v17, 1  ;;  %v3809_v7 = vperm.slane %v3758_v17, 2 }
 0x519   : > { %2719 = vmatmul.msk.f32.gmra.mxu0 %vm417_vm1, %v3749_v62 }
 0x51e   : > { %v1052_v33 = vpop.f32.mrf.mxu3 }
 0x51f   : > { %v3754_v42 = vadd.f32 %v1052_v33, %v3354_v20 }
 0x521   : > { %2720 = vmatmul.msk.f32.gmra.mxu0 %vm417_vm1, %v3754_v42 }
 0x541   : > { %v1141_v37 = vpop.f32.mrf.mxu0 }
 0x542   : > { %v1142_v20 = vadd.f32 %v1141_v37, %v3761_v34 }
 0x544   : > { %3024 = vtanh.f32 %v1142_v20 }
 0x549   : > { %v1144_v36 = vpop.f32.mrf.mxu0 }
 0x54a   : > { %v3025_v4 = vpop.eup %3024  ;;  %v1145_v48 = vadd.f32 %v1144_v36, %v3761_v34 }
 0x54b   : > { %2726 = vmatmul.msk.f32.vlgmr.msra.gmra.mxu1 %vm417_vm1, %v3025_v4 }
 0x54c   : > { %3026 = vtanh.f32 %v1145_v48 }
 0x551   : > { %v1147_v43 = vpop.f32.mrf.mxu0 }
 0x552   : > { %v3027_v40 = vpop.eup %3026  ;;  %v1148_v47 = vadd.f32 %v1147_v43, %v3761_v34 }
 0x553   : > { %2727 = vmatmul.msk.f32.gmra.mxu1 %vm417_vm1, %v3027_v40 }
 0x554   : > { %3028 = vtanh.f32 %v1148_v47 }
 0x559   : > { %v1150_v6 = vpop.f32.mrf.mxu0 }
 0x55a   : > { %v3029_v50 = vpop.eup %3028  ;;  %v1151_v52 = vadd.f32 %v1150_v6, %v3761_v34 }
 0x55b   : > { %2728 = vmatmul.msk.f32.gmra.mxu1 %vm417_vm1, %v3029_v50 }
 0x55c   : > { %3030 = vtanh.f32 %v1151_v52 }
 0x561   : > { %v1153_v57 = vpop.f32.mrf.mxu0 }
 0x562   : > { %v3031_v15 = vpop.eup %3030  ;;  %v1154_v56 = vadd.f32 %v1153_v57, %v3761_v34 }
 0x563   : > { %2729 = vmatmul.msk.f32.gmra.mxu1 %vm417_vm1, %v3031_v15 }
 0x564   : > { %3032 = vtanh.f32 %v1154_v56 }
 0x569   : > { %v1156_v3 = vpop.f32.mrf.mxu0 }
 0x56a   : > { %v3033_v51 = vpop.eup %3032  ;;  %v1157_v60 = vadd.f32 %v1156_v3, %v3761_v34 }
 0x56b   : > { %2730 = vmatmul.msk.f32.gmra.mxu1 %vm417_vm1, %v3033_v51 }
 0x56c   : > { %3034 = vtanh.f32 %v1157_v60 }
 0x571   : > { %v1159_v12 = vpop.f32.mrf.mxu0 }
 0x572   : > { %v3035_v61 = vpop.eup %3034  ;;  %v1160_v46 = vadd.f32 %v1159_v12, %v3761_v34 }
 0x573   : > { %2731 = vmatmul.msk.f32.gmra.mxu1 %vm417_vm1, %v3035_v61 }
 0x574   : > { %3036 = vtanh.f32 %v1160_v46  ;;  %v1055_v18 = vpop.f32.mrf.mxu3 }
 0x575   : > { %v3777_v19 = vadd.f32 %v1055_v18, %v3358_v23  ;;  %v1327_v23 = vld [vmem:[#allocation2 + $0x108] sm:$0xff] }
 0x576   : > { %1387 = vmatpush.msrb.mxu3 %v1327_v23 }
 0x577   : > { %2721 = vmatmul.msk.f32.gmra.mxu0 %vm417_vm1, %v3777_v19 }
 0x57a   : > { %v3037_v63 = vpop.eup %3036 }
 0x57b   : > { %2732 = vmatmul.msk.f32.gmra.mxu1 %vm417_vm1, %v3037_v63 }
 0x57c   : > { %v1058_v27 = vpop.f32.mrf.mxu3 }
 0x57d   : > { %v3783_v16 = vadd.f32 %v1058_v27, %v3362_v26 }
 0x57f   : > { %2722 = vmatmul.msk.f32.gmra.mxu0 %vm417_vm1, %v3783_v16 }
 0x584   : > { %v1061_v54 = vpop.f32.mrf.mxu3 }
 0x585   : > { %v3788_v24 = vadd.f32 %v1061_v54, %v3366_v29 }
 0x587   : > { %2723 = vmatmul.msk.f32.gmra.mxu0 %vm417_vm1, %v3788_v24 }
 0x58c   : > { %v1064_v2 = vpop.f32.mrf.mxu3 }
 0x58d   : > { %v3793_v28 = vadd.f32 %v1064_v2, %v3370_v32  ;;  %v1162_v30 = vpop.f32.mrf.mxu0 }
 0x58e   : > { %v1163_v26 = vadd.f32 %v1162_v30, %v3761_v34 }
 0x58f   : > { %2724 = vmatmul.msk.f32.gmra.mxu0 %vm417_vm1, %v3793_v28 }
 0x590   : > { %3038 = vtanh.f32 %v1163_v26 }
 0x594   : > { %v1067_v55 = vpop.f32.mrf.mxu3 }
 0x595   : > { %v3799_v29 = vadd.f32 %v1067_v55, %v3374_v35  ;;  %v1326_v35 = vld [vmem:[#allocation2 + $0x100] sm:$0xff] }
 0x596   : > { %v3039_v49 = vpop.eup %3038  ;;  %v1165_v5 = vpop.f32.mrf.mxu0  ;;  %1388 = vmatpush.msrb.mxu3 %v1326_v35 }
 0x597   : > { %v1166_v31 = vadd.f32 %v1165_v5, %v3761_v34  ;;  %2725 = vmatmul.msk.f32.gmra.mxu0 %vm417_vm1, %v3799_v29  ;;  %2733 = vmatmul.msk.f32.gmra.mxu1 %vm417_vm1, %v3039_v49 }
 0x598   : > { %1389 = vmatpush.msrb.mxu3 %v1325_v8 }
 0x599   : > { %3040 = vtanh.f32 %v1166_v31 }
 0x59a   : > { %1390 = vmatpush.msrb.mxu3 %v1324_v22 }
 0x59e   : > { %v1168_v32 = vpop.f32.mrf.mxu0 }
 0x59f   : > { %v3041_v45 = vpop.eup %3040  ;;  %v1169_v38 = vadd.f32 %v1168_v32, %v3761_v34 }
 0x5a0   : > { %2734 = vmatmul.msk.f32.gmra.mxu1 %vm417_vm1, %v3041_v45 }
 0x5a1   : > { %3042 = vtanh.f32 %v1169_v38 }
 0x5a7   : > { %v3043_v39 = vpop.eup %3042 }
 0x5a8   : > { %2735 = vmatmul.msk.f32.gmra.mxu1 %vm417_vm1, %v3043_v39 }
 0x5c8   : > { %v1264_v21 = vpop.f32.mrf.mxu1 }
 0x5c9   : > { %v1265_v11 = vadd.f32 %v1264_v21, %v3809_v7 }
 0x5cb   : > { %v3813_v33 = vadd.f32 %v1265_v11, %v3689_v25 }
 0x5cd   : > { %2741 = vmatmul.msk.f32.vlgmr.msrb.gmra.mxu3 %vm417_vm1, %v3813_v33 }
 0x5d0   : > { %v1267_v14 = vpop.f32.mrf.mxu1 }
 0x5d1   : > { %v1268_v58 = vadd.f32 %v1267_v14, %v3809_v7 }
 0x5d3   : > { %v3819_v1 = vadd.f32 %v1268_v58, %v3694_v0 }
 0x5d5   : > { %2742 = vmatmul.msk.f32.gmra.mxu3 %vm417_vm1, %v3819_v1 }
 0x5d8   : > { %v1270_v59 = vpop.f32.mrf.mxu1 }
 0x5d9   : > { %v1271_v17 = vadd.f32 %v1270_v59, %v3809_v7 }
 0x5db   : > { %v3825_v37 = vadd.f32 %v1271_v17, %v3700_v9 }
 0x5dd   : > { %2743 = vmatmul.msk.f32.gmra.mxu3 %vm417_vm1, %v3825_v37 }
 0x5e0   : > { %v1273_v25 = vpop.f32.mrf.mxu1 }
 0x5e1   : > { %v1274_v20 = vadd.f32 %v1273_v25, %v3809_v7 }
 0x5e3   : > { %v3831_v36 = vadd.f32 %v1274_v20, %v3708_v53 }
 0x5e5   : > { %2744 = vmatmul.msk.f32.gmra.mxu3 %vm417_vm1, %v3831_v36 }
 0x5e8   : > { %v1276_v0 = vpop.f32.mrf.mxu1 }
 0x5e9   : > { %v1277_v4 = vadd.f32 %v1276_v0, %v3809_v7 }
 0x5eb   : > { %v3837_v48 = vadd.f32 %v1277_v4, %v3716_v10 }
 0x5ed   : > { %2745 = vmatmul.msk.f32.gmra.mxu3 %vm417_vm1, %v3837_v48 }
 0x5f0   : > { %v1279_v9 = vpop.f32.mrf.mxu1 }
 0x5f1   : > { %v1280_v43 = vadd.f32 %v1279_v9, %v3809_v7  ;;  %v3911_v9 = vld [vmem:[#allocation2 + $0x150] sm:$0xff] }
 0x5f3   : > { %v3843_v40 = vadd.f32 %v1280_v43, %v3723_v13 }
 0x5f4   : > { %v1171_v53 = vpop.f32.mrf.mxu0 }
 0x5f5   : > { %v1172_v47 = vadd.f32 %v1171_v53, %v3761_v34  ;;  %2746 = vmatmul.msk.f32.gmra.mxu3 %vm417_vm1, %v3843_v40 }
 0x5f7   : > { %3044 = vtanh.f32 %v1172_v47 }
 0x5f8   : > { %v1282_v6 = vpop.f32.mrf.mxu1 }
 0x5f9   : > { %v1283_v10 = vadd.f32 %v1282_v6, %v3809_v7 }
 0x5fb   : > { %v3850_v50 = vadd.f32 %v1283_v10, %v3732_v44 }
 0x5fc   : > { %v1174_v52 = vpop.f32.mrf.mxu0 }
 0x5fd   : > { %v3045_v57 = vpop.eup %3044  ;;  %v1175_v15 = vadd.f32 %v1174_v52, %v3761_v34  ;;  %2747 = vmatmul.msk.f32.gmra.mxu3 %vm417_vm1, %v3850_v50 }
 0x5fe   : > { %2736 = vmatmul.msk.f32.gmra.mxu1 %vm417_vm1, %v3045_v57 }
 0x5ff   : > { %3046 = vtanh.f32 %v1175_v15 }
 0x604   : > { %v1177_v13 = vpop.f32.mrf.mxu0 }
 0x605   : > { %v3047_v56 = vpop.eup %3046  ;;  %v1178_v3 = vadd.f32 %v1177_v13, %v3761_v34 }
 0x606   : > { %2737 = vmatmul.msk.f32.gmra.mxu1 %vm417_vm1, %v3047_v56 }
 0x607   : > { %3048 = vtanh.f32 %v1178_v3 }
 0x60c   : > { %v1180_v51 = vpop.f32.mrf.mxu0 }
 0x60d   : > { %v3049_v44 = vpop.eup %3048  ;;  %v1181_v60 = vadd.f32 %v1180_v51, %v3761_v34 }
 0x60e   : > { %2738 = vmatmul.msk.f32.gmra.mxu1 %vm417_vm1, %v3049_v44 }
 0x60f   : > { %3050 = vtanh.f32 %v1181_v60 }
 0x614   : > { %v1183_v12 = vpop.f32.mrf.mxu0  ;;  %v1285_v61 = vpop.f32.mrf.mxu1 }
 0x615   : > { %v3051_v46 = vpop.eup %3050  ;;  %v1184_v18 = vadd.f32 %v1183_v12, %v3761_v34  ;;  %v1286_v63 = vadd.f32 %v1285_v61, %v3809_v7 }
 0x616   : > { %2739 = vmatmul.msk.f32.gmra.mxu1 %vm417_vm1, %v3051_v46 }
 0x617   : > { %3052 = vtanh.f32 %v1184_v18  ;;  %v3864_v27 = vadd.f32 %v1286_v63, %v3743_v41 }
 0x619   : > { %2748 = vmatmul.msk.f32.gmra.mxu3 %vm417_vm1, %v3864_v27 }
 0x61d   : > { %v3053_v54 = vpop.eup %3052  ;;  %v1288_v23 = vpop.f32.mrf.mxu1 }
 0x61e   : > { %v1289_v2 = vadd.f32 %v1288_v23, %v3809_v7  ;;  %2740 = vmatmul.msk.f32.gmra.mxu1 %vm417_vm1, %v3053_v54 }
 0x620   : > { %v3871_v30 = vadd.f32 %v1289_v2, %v3749_v62 }
 0x622   : > { %2749 = vmatmul.msk.f32.gmra.mxu3 %vm417_vm1, %v3871_v30 }
 0x625   : > { %v1291_v34 = vpop.f32.mrf.mxu1 }
 0x626   : > { %v1292_v26 = vadd.f32 %v1291_v34, %v3809_v7 }
 0x628   : > { %v3877_v41 = vadd.f32 %v1292_v26, %v3754_v42 }
 0x62a   : > { %2750 = vmatmul.msk.f32.gmra.mxu3 %vm417_vm1, %v3877_v41 }
 0x67b   : > { %v1294_v55 = vpop.f32.mrf.mxu1 }
 0x67c   : > { %v1295_v49 = vadd.f32 %v1294_v55, %v3809_v7 }
 0x67e   : > { %v3883_v5 = vadd.f32 %v1295_v49, %v3777_v19 }
 0x680   : > { %2751 = vmatmul.msk.f32.gmra.mxu3 %vm417_vm1, %v3883_v5 }
 0x683   : > { %v1297_v62 = vpop.f32.mrf.mxu1 }
 0x684   : > { %v1298_v31 = vadd.f32 %v1297_v62, %v3809_v7 }
 0x686   : > { %v3889_v32 = vadd.f32 %v1298_v31, %v3783_v16 }
 0x688   : > { %2752 = vmatmul.msk.f32.gmra.mxu3 %vm417_vm1, %v3889_v32 }
 0x68b   : > { %v1300_v42 = vpop.f32.mrf.mxu1 }
 0x68c   : > { %v1301_v45 = vadd.f32 %v1300_v42, %v3809_v7 }
 0x68e   : > { %v3895_v38 = vadd.f32 %v1301_v45, %v3788_v24  ;;  %v1392_v24 = vpop.f32.mrf.mxu3 }
 0x690   : > { %2753 = vmatmul.msk.f32.gmra.mxu3 %vm417_vm1, %v3895_v38 }
 0x693   : > { %v1303_v19 = vpop.f32.mrf.mxu1 }
 0x694   : > { %v1304_v39 = vadd.f32 %v1303_v19, %v3809_v7 }
 0x696   : > { %v3901_v35 = vadd.f32 %v1304_v39, %v3793_v28  ;;  %v1395_v21 = vpop.f32.mrf.mxu3 }
 0x698   : > { %2754 = vmatmul.msk.f32.gmra.mxu3 %vm417_vm1, %v3901_v35 }
 0x69b   : > { %v1306_v16 = vpop.f32.mrf.mxu1 }
 0x69c   : > { %v1307_v8 = vadd.f32 %v1306_v16, %v3809_v7 }
 0x69e   : > { %v3907_v22 = vadd.f32 %v1307_v8, %v3799_v29  ;;  %v1398_v11 = vpop.f32.mrf.mxu3  ;;  %v1329_v29 = vperm.slane %v3911_v9, 0 }
 0x6a0   : > { %2755 = vmatmul.msk.f32.gmra.mxu3 %vm417_vm1, %v3907_v22  ;;  %v3942_v3 = vadd.f32 %v1398_v11, %v1329_v29  ;;  %v3961_v12 = vadd.f32 %v1395_v21, %v1329_v29  ;;  %v3976_v63 = vadd.f32 %v1392_v24, %v1329_v29 }
 0x6a6   : > { %v1401_v14 = vpop.f32.mrf.mxu3 }
 0x6a7   : > { %v3969_v46 = vadd.f32 %v1401_v14, %v1329_v29 }
 0x6ae   : > { %v1404_v58 = vpop.f32.mrf.mxu3 }
 0x6af   : > { %v3950_v51 = vadd.f32 %v1404_v58, %v1329_v29 }
 0x6b6   : > { %v1407_v59 = vpop.f32.mrf.mxu3 }
 0x6b7   : > { %v3930_v15 = vadd.f32 %v1407_v59, %v1329_v29 }
 0x6be   : > { %v1410_v28 = vpop.f32.mrf.mxu3 }
 0x6bf   : > { %v3963_v61 = vadd.f32 %v1410_v28, %v1329_v29 }
 0x6c6   : > { %v1413_v17 = vpop.f32.mrf.mxu3 }
 0x6c7   : > { %v3938_v13 = vadd.f32 %v1413_v17, %v1329_v29 }
 0x6ce   : > { %v1416_v25 = vpop.f32.mrf.mxu3 }
 0x6cf   : > { %v3918_v47 = vadd.f32 %v1416_v25, %v1329_v29 }
 0x6d1   : > { %v2938_v23 = vpack.i.bf16 %v3938_v13, %v3918_v47 }
 0x6d6   : > { %v1419_v20 = vpop.f32.mrf.mxu3 }
 0x6d7   : > { %v3952_v44 = vadd.f32 %v1419_v20, %v1329_v29 }
 0x703   : > { %v1422_v0 = vpop.f32.mrf.mxu3 }
 0x704   : > { %v3926_v52 = vadd.f32 %v1422_v0, %v1329_v29 }
 0x706   : > { %v2933_v54 = vpack.i.bf16 %v3952_v44, %v3926_v52 }
 0x70b   : > { %v1425_v4 = vpop.f32.mrf.mxu3 }
 0x70c   : > { %v3940_v56 = vadd.f32 %v1425_v4, %v1329_v29 }
 0x713   : > { %v1428_v7 = vpop.f32.mrf.mxu3 }
 0x714   : > { %v3914_v43 = vadd.f32 %v1428_v7, %v1329_v29 }
 0x716   : > { %1476 = vrot.lane.b32.xlu2 %v3914_v43, %s3268_s23  ;;  %v2928_v18 = vpack.i.bf16 %v3940_v56, %v3914_v43 }
 0x71b   : > { %v1431_v53 = vpop.f32.mrf.mxu3 }
 0x71c   : > { %v3920_v6 = vadd.f32 %v1431_v53, %v1329_v29 }
 0x71e   : > { %1478 = vrot.lane.b32.xlu1 %v3920_v6, %s3268_s23  ;;  %1468 = vrot.lane.b32.xlu2 %v3918_v47, %s3268_s23 }
 0x723   : > { %v1434_v10 = vpop.f32.mrf.mxu3 }
 0x724   : > { %v3928_v57 = vadd.f32 %v1434_v10, %v1329_v29 }
 0x726   : > { %1480 = vrot.lane.b32.xlu0 %v3928_v57, %s3268_s23  ;;  %1472 = vrot.lane.b32.xlu1 %v3926_v52, %s3268_s23  ;;  %v2943_v60 = vpack.i.bf16 %v3920_v6, %v3928_v57 }
 0x727   : > { %1462 = vrot.lane.b32.xlu2 %v3930_v15, %s3268_s23 }
 0x72e   : > { %1474 = vrot.lane.b32.xlu0 %v3940_v56, %s3268_s23  ;;  %1466 = vrot.lane.b32.xlu1 %v3938_v13, %s3268_s23 }
 0x72f   : > { %1456 = vrot.lane.b32.xlu2 %v3942_v3, %s3268_s23 }
 0x736   : > { %1470 = vrot.lane.b32.xlu0 %v3952_v44, %s3268_s23  ;;  %1460 = vrot.lane.b32.xlu1 %v3950_v51, %s3268_s23 }
 0x737   : > { %2944 = vrot.lane.b32.xlu2 %v2943_v60, %s3269_s24 }
 0x73e   : > { %1464 = vrot.lane.b32.xlu0 %v3963_v61, %s3268_s23  ;;  %1454 = vrot.lane.b32.xlu1 %v3961_v12, %s3268_s23 }
 0x746   : > { %1458 = vrot.lane.b32.xlu0 %v3969_v46, %s3268_s23  ;;  %2929 = vrot.lane.b32.xlu1 %v2928_v18, %s3269_s24 }
 0x74e   : > { %1452 = vrot.lane.b32.xlu0 %v3976_v63, %s3268_s23 }
 0x756   : > { %2934 = vrot.lane.b32.xlu0 %v2933_v54, %s3269_s24 }
 0x75e   : > { %2939 = vrot.lane.b32.xlu0 %v2938_v23, %s3269_s24 }
 0x770   : > { %v1477_v2 = vpop.permute.xlu2 %1476 }
 0x778   : > { %v1469_v34 = vpop.permute.xlu2 %1468 }
 0x781   : > { %v1463_v26 = vpop.permute.xlu2 %1462 }
 0x789   : > { %v1457_v55 = vpop.permute.xlu2 %1456 }
 0x790   : > { %v1479_v49 = vpop.permute.xlu1 %1478 }
 0x791   : > { %v2945_v62 = vpop.permute.xlu2 %2944 }
 0x792   : > { %v2946_v31 = vunpack.i.l.bf16 %v2945_v62  ;;  %v2947_v42 = vunpack.i.h.bf16 %v2945_v62 }
 0x794   : > { %1920 = vmatpush.msrb.mxu0 %v2946_v31 }
 0x796   : > { %1921 = vmatpush.msrb.mxu0 %v2947_v42 }
 0x798   : > { %v1481_v45 = vpop.permute.xlu0 %1480  ;;  %v1473_v19 = vpop.permute.xlu1 %1472 }
 0x799   : > { %2756 = vmatpush.xpose.msk.msrb.mxu2 %vm288_vm0, %v1481_v45  ;;  %v3209_v45 = vld [vmem:[#allocation2 + $0x198] sm:$0xff] }
 0x79d   : > { %2757 = vmatpush.xpose.msk.msrb.mxu2 %vm288_vm0, %v1479_v49  ;;  %v2948_v49 = vpack.i.bf16 %v3930_v15, %v3963_v61 }
 0x7a0   : > { %v1475_v39 = vpop.permute.xlu0 %1474  ;;  %v1467_v16 = vpop.permute.xlu1 %1466 }
 0x7a1   : > { %2758 = vmatpush.xpose.msk.msrb.mxu2 %vm288_vm0, %v1477_v2 }
 0x7a5   : > { %2759 = vmatpush.xpose.msk.msrb.mxu2 %vm288_vm0, %v1475_v39  ;;  %v3210_v39 = vld [vmem:[#allocation2 + $0x1b0] sm:$0xff] }
 0x7a8   : > { %v1471_v8 = vpop.permute.xlu0 %1470  ;;  %v1461_v24 = vpop.permute.xlu1 %1460 }
 0x7a9   : > { %2760 = vmatpush.xpose.msk.msrb.mxu2 %vm288_vm0, %v1473_v19 }
 0x7ad   : > { %2761 = vmatpush.xpose.msk.msrb.mxu2 %vm288_vm0, %v1471_v8 }
 0x7b0   : > { %v1465_v21 = vpop.permute.xlu0 %1464  ;;  %v1455_v11 = vpop.permute.xlu1 %1454 }
 0x7b1   : > { %2762 = vmatpush.xpose.msk.msrb.mxu2 %vm288_vm0, %v1469_v34  ;;  %v3208_v34 = vld [vmem:[#allocation2 + $0x1a0] sm:$0xff] }
 0x7b5   : > { %2763 = vmatpush.xpose.msk.msrb.mxu2 %vm288_vm0, %v1467_v16 }
 0x7b8   : > { %v1459_v14 = vpop.permute.xlu0 %1458  ;;  %v2930_v58 = vpop.permute.xlu1 %2929 }
 0x7b9   : > { %v2931_v59 = vunpack.i.l.bf16 %v2930_v58  ;;  %2764 = vmatpush.xpose.msk.msrb.mxu2 %vm288_vm0, %v1465_v21  ;;  %v2932_v28 = vunpack.i.h.bf16 %v2930_v58 }
 0x7bb   : > { %1922 = vmatpush.msrb.mxu0 %v2931_v59 }
 0x7bd   : > { %2765 = vmatpush.xpose.msk.msrb.mxu2 %vm288_vm0, %v1463_v26  ;;  %1923 = vmatpush.msrb.mxu0 %v2932_v28  ;;  %v3213_v28 = vld [vmem:[#allocation2 + $0x1c0] sm:$0xff] }
 0x7c0   : > { %v1453_v17 = vpop.permute.xlu0 %1452 }
 0x7c1   : > { %2766 = vmatpush.xpose.msk.msrb.mxu2 %vm288_vm0, %v1461_v24 }
 0x7c5   : > { %2767 = vmatpush.xpose.msk.msrb.mxu2 %vm288_vm0, %v1459_v14 }
 0x7c8   : > { %v2935_v25 = vpop.permute.xlu0 %2934 }
 0x7c9   : > { %v2936_v20 = vunpack.i.l.bf16 %v2935_v25  ;;  %2768 = vmatpush.xpose.msk.msrb.mxu2 %vm288_vm0, %v1457_v55  ;;  %v2937_v0 = vunpack.i.h.bf16 %v2935_v25 }
 0x7cb   : > { %1924 = vmatpush.msrb.mxu0 %v2936_v20 }
 0x7cd   : > { %2769 = vmatpush.xpose.msk.msrb.mxu2 %vm288_vm0, %v1455_v11  ;;  %1925 = vmatpush.msrb.mxu0 %v2937_v0  ;;  %v3212_v11 = vld [vmem:[#allocation2 + $0x1b8] sm:$0xff] }
 0x7ce   : > { %v3214_v0 = vld [vmem:[#allocation2 + $0x1d8] sm:$0xff] }
 0x7d0   : > { %v2940_v4 = vpop.permute.xlu0 %2939 }
 0x7d1   : > { %v2941_v29 = vunpack.i.l.bf16 %v2940_v4  ;;  %2770 = vmatpush.xpose.msk.msrb.mxu2 %vm288_vm0, %v1453_v17  ;;  %v2942_v7 = vunpack.i.h.bf16 %v2940_v4 }
 0x7d3   : > { %1926 = vmatpush.msrb.mxu0 %v2941_v29 }
 0x7d4   : > { %2771 = vmatmul.msk.f32.vlgmr.msrb.gmra.mxu2 %vm288_vm0, %v3976_v63 }
 0x7d5   : > { %1927 = vmatpush.msrb.mxu0 %v2942_v7 }
 0x7dc   : > { %2772 = vmatmul.msk.f32.gmra.mxu2 %vm288_vm0, %v3961_v12 }
 0x7e4   : > { %2773 = vmatmul.msk.f32.gmra.mxu2 %vm288_vm0, %v3942_v3 }
 0x7ec   : > { %2774 = vmatmul.msk.f32.gmra.mxu2 %vm288_vm0, %v3969_v46 }
 0x7f4   : > { %2775 = vmatmul.msk.f32.gmra.mxu2 %vm288_vm0, %v3950_v51 }
 0x7fc   : > { %2776 = vmatmul.msk.f32.gmra.mxu2 %vm288_vm0, %v3930_v15  ;;  %v3211_v15 = vld [vmem:[#allocation2 + $0x1a8] sm:$0xff] }
 0x804   : > { %2777 = vmatmul.msk.f32.gmra.mxu2 %vm288_vm0, %v3963_v61 }
 0x80c   : > { %2778 = vmatmul.msk.f32.gmra.mxu2 %vm288_vm0, %v3938_v13 }
 0x814   : > { %2779 = vmatmul.msk.f32.gmra.mxu2 %vm288_vm0, %v3918_v47  ;;  %v3205_v47 = vld [vmem:[#allocation2 + $0x180] sm:$0xff] }
 0x81c   : > { %2780 = vmatmul.msk.f32.gmra.mxu2 %vm288_vm0, %v3952_v44 }
 0x824   : > { %2781 = vmatmul.msk.f32.gmra.mxu2 %vm288_vm0, %v3926_v52  ;;  %v3206_v52 = vld [vmem:[#allocation2 + $0x188] sm:$0xff] }
 0x82c   : > { %2782 = vmatmul.msk.f32.gmra.mxu2 %vm288_vm0, %v3940_v56 }
 0x834   : > { %2783 = vmatmul.msk.f32.gmra.mxu2 %vm288_vm0, %v3914_v43  ;;  %v3207_v43 = vld [vmem:[#allocation2 + $0x190] sm:$0xff] }
 0x83c   : > { %2784 = vmatmul.msk.f32.gmra.mxu2 %vm288_vm0, %v3920_v6 }
 0x844   : > { %2785 = vmatmul.msk.f32.gmra.mxu2 %vm288_vm0, %v3928_v57  ;;  %v2953_v57 = vpack.i.bf16 %v3969_v46, %v3950_v51  ;;  %vm2348_vm0 = vcmask 23552  }
 0x857   : > { %v1559_v53 = vpop.f32.mrf.mxu2 }
 0x858   : > { %v1560_v10 = vadd.f32 %v3205_v47, %v1559_v53 }
 0x85a   : > { %v1604_v13 = vsel %vm692_vm2, %v1560_v10, -inf }
 0x85b   : > { %1605 = vmax.xlane.f32.xlu2 %v1604_v13 }
 0x85f   : > { %v1562_v44 = vpop.f32.mrf.mxu2 }
 0x860   : > { %v1563_v60 = vadd.f32 %v3206_v52, %v1562_v44 }
 0x862   : > { %v1607_v56 = vsel %vm692_vm2, %v1563_v60, -inf }
 0x863   : > { %1608 = vmax.xlane.f32.xlu1 %v1607_v56 }
 0x867   : > { %v1565_v18 = vpop.f32.mrf.mxu2 }
 0x868   : > { %v1566_v54 = vadd.f32 %v3207_v43, %v1565_v18 }
 0x86a   : > { %v1610_v6 = vsel %vm692_vm2, %v1566_v54, -inf }
 0x86b   : > { %1611 = vmax.xlane.f32.xlu0 %v1610_v6  ;;  %v3215_v6 = vld [vmem:[#allocation2 + $0x1c8] sm:$0xff] }
 0x86f   : > { %v1568_v23 = vpop.f32.mrf.mxu2 }
 0x870   : > { %v4044_v51 = vadd.f32 %v3209_v45, %v1568_v23 }
 0x872   : > { %v1613_v19 = vsel %vm692_vm2, %v4044_v51, -inf }
 0x873   : > { %2954 = vrot.lane.b32.xlu2 %v2953_v57, %s3269_s24 }
 0x877   : > { %v1571_v2 = vpop.f32.mrf.mxu2 }
 0x878   : > { %v4037_v26 = vadd.f32 %v3208_v34, %v1571_v2 }
 0x87a   : > { %v1616_v55 = vsel %vm692_vm2, %v4037_v26, -inf }
 0x87b   : > { %1617 = vmax.xlane.f32.xlu1 %v1616_v55 }
 0x87f   : > { %v1574_v62 = vpop.f32.mrf.mxu2  ;;  %2949 = vrot.lane.b32.xlu0 %v2948_v49, %s3269_s24 }
 0x880   : > { %v4052_v61 = vadd.f32 %v3211_v15, %v1574_v62 }
 0x882   : > { %v1619_v21 = vsel %vm692_vm2, %v4052_v61, -inf }
 0x887   : > { %v1577_v31 = vpop.f32.mrf.mxu2 }
 0x888   : > { %v4048_v16 = vadd.f32 %v3210_v39, %v1577_v31 }
 0x88a   : > { %v1622_v8 = vsel %vm692_vm2, %v4048_v16, -inf }
 0x88f   : > { %v1580_v42 = vpop.f32.mrf.mxu2 }
 0x890   : > { %v4056_v14 = vadd.f32 %v3212_v11, %v1580_v42 }
 0x892   : > { %v1625_v59 = vsel %vm692_vm2, %v4056_v14, -inf }
 0x897   : > { %v1583_v46 = vpop.f32.mrf.mxu2 }
 0x898   : > { %v4062_v17 = vadd.f32 %v3213_v28, %v1583_v46  ;;  %v2958_v46 = vpack.i.bf16 %v3961_v12, %v3942_v3 }
 0x89a   : > { %v1628_v25 = vsel %vm692_vm2, %v4062_v17, -inf }
 0x89c   : > { %1614 = vmax.xlane.f32.xlu2 %v1613_v19 }
 0x89f   : > { %v1586_v24 = vpop.f32.mrf.mxu2 }
 0x8a0   : > { %v4076_v23 = vadd.f32 %v3215_v6, %v1586_v24 }
 0x8a4   : > { %1623 = vmax.xlane.f32.xlu2 %v1622_v8 }
 0x8a7   : > { %v4058_v58 = vpop.f32.mrf.mxu2 }
 0x8a9   : > { %1620 = vmax.xlane.f32.xlu0 %v1619_v21 }
 0x8af   : > { %v1592_v20 = vpop.f32.mrf.mxu2 }
 0x8b0   : > { %v4066_v4 = vadd.f32 %v3214_v0, %v1592_v20 }
 0x8b1   : > { %1626 = vmax.xlane.f32.xlu0 %v1625_v59 }
 0x8b2   : > { %v1637_v29 = vsel %vm692_vm2, %v4066_v4, -inf }
 0x8b7   : > { %v1595_v15 = vpop.f32.mrf.mxu2 }
 0x8b9   : > { %1629 = vmax.xlane.f32.xlu0 %v1628_v25 }
 0x8bc   : > { %1829 = vrot.lane.b32.xlu2 %v3976_v63, %s3269_s24 }
 0x8bf   : > { %v1598_v12 = vpop.f32.mrf.mxu2 }
 0x8c1   : > { %1638 = vmax.xlane.f32.xlu0 %v1637_v29 }
 0x8ce   : > { %v1606_v7 = vpop.xlane.xlu2 %1605 }
 0x8cf   : > { %v1649_v53 = vsub.f32 %v1560_v10, %v1606_v7  ;;  %v3216_v7 = vld [vmem:[#allocation2 + $0x1d0] sm:$0xff] }
 0x8d1   : > { %v1664_v47 = vmul.f32 1.442695, %v1649_v53  ;;  %v4102_v53 = vadd.f32 %v3216_v7, %v4058_v58 }
 0x8d3   : > { %3054 = vpow2.f32 %v1664_v47 }
 0x8d6   : > { %v1609_v13 = vpop.xlane.xlu1 %1608  ;;  %v2955_v62 = vpop.permute.xlu2 %2954 }
 0x8d7   : > { %v1650_v44 = vsub.f32 %v1563_v60, %v1609_v13  ;;  %v1631_v60 = vsel %vm692_vm2, %v4076_v23, -inf  ;;  %v2956_v42 = vunpack.i.l.bf16 %v2955_v62  ;;  %v2957_v45 = vunpack.i.h.bf16 %v2955_v62 }
 0x8d9   : > { %v4072_v52 = vpop.eup %3054  ;;  %v1666_v56 = vmul.f32 1.442695, %v1650_v44 }
 0x8da   : > { %v1694_v18 = vsel %vm692_vm2, %v4072_v52, 0.0 }
 0x8db   : > { %3056 = vpow2.f32 %v1666_v56  ;;  %1695 = vadd.xlane.f32.xlu1 %v1694_v18  ;;  %v1634_v56 = vsel %vm692_vm2, %v4102_v53, -inf  ;;  %v1601_v18 = vpop.f32.mrf.mxu2 }
 0x8de   : > { %v1612_v43 = vpop.xlane.xlu0 %1611 }
 0x8df   : > { %v1651_v63 = vsub.f32 %v1566_v54, %v1612_v43 }
 0x8e1   : > { %v4078_v57 = vpop.eup %3056  ;;  %v1668_v10 = vmul.f32 1.442695, %v1651_v63  ;;  %v3217_v63 = vld [vmem:[#allocation2 + $0x1f0] sm:$0xff] }
 0x8e2   : > { %v1697_v2 = vsel %vm692_vm2, %v4078_v57, 0.0  ;;  %v4115_v6 = vadd.f32 %v3217_v63, %v1601_v18 }
 0x8e3   : > { %3058 = vpow2.f32 %v1668_v10  ;;  %1698 = vadd.xlane.f32.xlu1 %v1697_v2 }
 0x8e5   : > { %1632 = vmax.xlane.f32.xlu2 %v1631_v60 }
 0x8e9   : > { %v4084_v34 = vpop.eup %3058 }
 0x8ea   : > { %v1700_v54 = vsel %vm692_vm2, %v4084_v34, 0.0 }
 0x8eb   : > { %1701 = vadd.xlane.f32.xlu0 %v1700_v54  ;;  %v3218_v54 = vld [vmem:[#allocation2 + $0x1e0] sm:$0xff] }
 0x8ee   : > { %v1618_v19 = vpop.xlane.xlu1 %1617 }
 0x8ef   : > { %v1653_v24 = vsub.f32 %v4037_v26, %v1618_v19 }
 0x8f1   : > { %v2950_v55 = vpop.permute.xlu0 %2949  ;;  %v1672_v11 = vmul.f32 1.442695, %v1653_v24 }
 0x8f2   : > { %v2951_v49 = vunpack.i.l.bf16 %v2950_v55  ;;  %v2952_v31 = vunpack.i.h.bf16 %v2950_v55  ;;  %v4123_v55 = vadd.f32 %v3218_v54, %v1595_v15 }
 0x8f4   : > { %1928 = vmatpush.msrb.mxu0 %v2951_v49 }
 0x8f6   : > { %1929 = vmatpush.msrb.mxu0 %v2952_v31  ;;  %v1640_v31 = vsel %vm692_vm2, %v4123_v55, -inf }
 0x8f8   : > { %1930 = vmatpush.msrb.mxu0 %v2956_v42 }
 0x8fa   : > { %1931 = vmatpush.msrb.mxu0 %v2957_v45  ;;  %v3219_v45 = vld [vmem:[#allocation2 + $0x1e8] sm:$0xff] }
 0x8fc   : > { %2959 = vrot.lane.b32.xlu1 %v2958_v46, %s3269_s24  ;;  %v4130_v46 = vadd.f32 %v3219_v45, %v1598_v12 }
 0x90f   : > { %v1615_v39 = vpop.xlane.xlu2 %1614 }
 0x910   : > { %v1652_v8 = vsub.f32 %v4044_v51, %v1615_v39 }
 0x912   : > { %v1670_v21 = vmul.f32 1.442695, %v1652_v8  ;;  %v1643_v8 = vsel %vm692_vm2, %v4130_v46, -inf }
 0x914   : > { %3060 = vpow2.f32 %v1670_v21 }
 0x915   : > { %3062 = vpow2.f32 %v1672_v11 }
 0x917   : > { %v1624_v59 = vpop.xlane.xlu2 %1623 }
 0x918   : > { %v1655_v28 = vsub.f32 %v4048_v16, %v1624_v59 }
 0x91a   : > { %v4094_v25 = vpop.eup %3060  ;;  %v1676_v20 = vmul.f32 1.442695, %v1655_v28 }
 0x91b   : > { %v1703_v3 = vsel %vm692_vm2, %v4094_v25, 0.0  ;;  %v4099_v29 = vpop.eup %3062 }
 0x91c   : > { %3064 = vpow2.f32 %v1676_v20  ;;  %1704 = vadd.xlane.f32.xlu0 %v1703_v3  ;;  %v1621_v51 = vpop.xlane.xlu0 %1620  ;;  %v1706_v13 = vsel %vm692_vm2, %v4099_v29, 0.0 }
 0x91d   : > { %v1654_v0 = vsub.f32 %v4052_v61, %v1621_v51 }
 0x91f   : > { %v1674_v26 = vmul.f32 1.442695, %v1654_v0  ;;  %v1830_v59 = vpop.permute.xlu2 %1829 }
 0x921   : > { %3066 = vpow2.f32 %v1674_v26 }
 0x922   : > { %v4104_v16 = vpop.eup %3064 }
 0x923   : > { %v1712_v47 = vsel %vm692_vm2, %v4104_v16, 0.0 }
 0x924   : > { %1713 = vadd.xlane.f32.xlu2 %v1712_v47  ;;  %1707 = vadd.xlane.f32.xlu0 %v1706_v13  ;;  %v1627_v44 = vpop.xlane.xlu0 %1626 }
 0x925   : > { %v1656_v61 = vsub.f32 %v4056_v14, %v1627_v44  ;;  %v1646_v14 = vsel %vm692_vm2, %v4115_v6, -inf }
 0x926   : > { %1635 = vmax.xlane.f32.xlu1 %v1634_v56 }
 0x927   : > { %v1678_v58 = vmul.f32 1.442695, %v1656_v61  ;;  %v4113_v43 = vpop.eup %3066 }
 0x928   : > { %v1709_v10 = vsel %vm692_vm2, %v4113_v43, 0.0 }
 0x929   : > { %3068 = vpow2.f32 %v1678_v58 }
 0x92c   : > { %1710 = vadd.xlane.f32.xlu0 %v1709_v10  ;;  %v1630_v2 = vpop.xlane.xlu0 %1629 }
 0x92d   : > { %v1657_v62 = vsub.f32 %v4062_v17, %v1630_v2 }
 0x92e   : > { %1647 = vmax.xlane.f32.xlu1 %v1646_v14 }
 0x92f   : > { %v4121_v60 = vpop.eup %3068  ;;  %v1680_v42 = vmul.f32 1.442695, %v1657_v62 }
 0x930   : > { %v1715_v49 = vsel %vm692_vm2, %v4121_v60, 0.0 }
 0x931   : > { %1716 = vadd.xlane.f32.xlu2 %v1715_v49  ;;  %3070 = vpow2.f32 %v1680_v42 }
 0x934   : > { %1641 = vmax.xlane.f32.xlu0 %v1640_v31  ;;  %v1639_v19 = vpop.xlane.xlu0 %1638 }
 0x935   : > { %v1660_v39 = vsub.f32 %v4066_v4, %v1639_v19 }
 0x937   : > { %v1686_v15 = vmul.f32 1.442695, %v1660_v39  ;;  %v4135_v24 = vpop.eup %3070 }
 0x938   : > { %v1718_v17 = vsel %vm692_vm2, %v4135_v24, 0.0 }
 0x939   : > { %3072 = vpow2.f32 %v1686_v15 }
 0x93c   : > { %1644 = vmax.xlane.f32.xlu0 %v1643_v8 }
 0x93f   : > { %v4139_v21 = vpop.eup %3072 }
 0x940   : > { %v1727_v11 = vsel %vm692_vm2, %v4139_v21, 0.0 }
 0x944   : > { %1719 = vadd.xlane.f32.xlu0 %v1718_v17 }
 0x94c   : > { %1728 = vadd.xlane.f32.xlu0 %v1727_v11 }
 0x94e   : > { %v1696_v4 = vpop.xlane.xlu1 %1695 }
 0x94f   : > { %3074 = vrcp.f32 %v1696_v4 }
 0x955   : > { %v3075_v28 = vpop.eup %3074 }
 0x956   : > { %v1754_v20 = vmul.f32 %v3075_v28, %v1696_v4  ;;  %v1699_v3 = vpop.xlane.xlu1 %1698 }
 0x957   : > { %3076 = vrcp.f32 %v1699_v3 }
 0x958   : > { %v1769_v12 = vsub.f32 2.0, %v1754_v20  ;;  %v1633_v51 = vpop.xlane.xlu2 %1632 }
 0x959   : > { %v1658_v0 = vsub.f32 %v4076_v23, %v1633_v51 }
 0x95a   : > { %v1784_v26 = vmul.f32 %v3075_v28, %v1769_v12 }
 0x95b   : > { %v1682_v7 = vmul.f32 1.442695, %v1658_v0 }
 0x95c   : > { %v1799_v47 = vmul.f32 %v4072_v52, %v1784_v26 }
 0x95d   : > { %v3077_v13 = vpop.eup %3076  ;;  %3078 = vpow2.f32 %v1682_v7 }
 0x95e   : > { %1814 = vst.msk [vmem:[%s3620_s29 + $0xf0] sm:$0xff] %vm692_vm2, %v1799_v47  ;;  %v1755_v44 = vmul.f32 %v3077_v13, %v1699_v3  ;;  %v1702_v61 = vpop.xlane.xlu0 %1701 }
 0x95f   : > { %3080 = vrcp.f32 %v1702_v61 }
 0x960   : > { %v1770_v56 = vsub.f32 2.0, %v1755_v44 }
 0x962   : > { %v1785_v18 = vmul.f32 %v3077_v13, %v1770_v56 }
 0x963   : > { %v4147_v58 = vpop.eup %3078 }
 0x964   : > { %v1800_v63 = vmul.f32 %v4078_v57, %v1785_v18  ;;  %v1721_v23 = vsel %vm692_vm2, %v4147_v58, 0.0 }
 0x965   : > { %v3081_v10 = vpop.eup %3080  ;;  %1722 = vadd.xlane.f32.xlu2 %v1721_v23 }
 0x966   : > { %1815 = vst.msk [vmem:[%s3620_s29 + $0xf8] sm:$0xff] %vm692_vm2, %v1800_v63  ;;  %v1756_v52 = vmul.f32 %v3081_v10, %v1702_v61 }
 0x968   : > { %v1771_v2 = vsub.f32 2.0, %v1756_v52 }
 0x96a   : > { %v1786_v14 = vmul.f32 %v3081_v10, %v1771_v2 }
 0x96c   : > { %v1801_v54 = vmul.f32 %v4084_v34, %v1786_v14 }
 0x96e   : > { %1816 = vst.msk [vmem:[%s3620_s29 + $0x100] sm:$0xff] %vm692_vm2, %v1801_v54  ;;  %v2960_v49 = vpop.permute.xlu1 %2959 }
 0x96f   : > { %v2961_v62 = vunpack.i.l.bf16 %v2960_v49  ;;  %v2962_v31 = vunpack.i.h.bf16 %v2960_v49 }
 0x971   : > { %1932 = vmatpush.msrb.mxu0 %v2961_v62 }
 0x973   : > { %1933 = vmatpush.msrb.mxu0 %v2962_v31 }
 0x975   : > { %1934 = vmatpush.msrb.mxu0 %v1830_v59 }
 0x976   : > { %2786 = vmatmul.msk.f32.vlgmr.msrb.gmra.mxu0 %vm692_vm2, %v1799_v47 }
 0x97e   : > { %2787 = vmatmul.msk.f32.gmra.mxu0 %vm692_vm2, %v1800_v63 }
 0x986   : > { %2788 = vmatmul.msk.f32.gmra.mxu0 %vm692_vm2, %v1801_v54 }
 0x98f   : > { %v1705_v57 = vpop.xlane.xlu0 %1704 }
 0x990   : > { %3082 = vrcp.f32 %v1705_v57 }
 0x996   : > { %v3083_v42 = vpop.eup %3082 }
 0x997   : > { %v1757_v45 = vmul.f32 %v3083_v42, %v1705_v57  ;;  %v1714_v34 = vpop.xlane.xlu2 %1713  ;;  %v1708_v19 = vpop.xlane.xlu0 %1707 }
 0x998   : > { %3084 = vrcp.f32 %v1714_v34 }
 0x999   : > { %v1772_v39 = vsub.f32 2.0, %v1757_v45  ;;  %3086 = vrcp.f32 %v1708_v19  ;;  %v1636_v8 = vpop.xlane.xlu1 %1635 }
 0x99a   : > { %v1659_v15 = vsub.f32 %v4102_v53, %v1636_v8 }
 0x99b   : > { %v1787_v17 = vmul.f32 %v3083_v42, %v1772_v39 }
 0x99c   : > { %v1684_v11 = vmul.f32 1.442695, %v1659_v15 }
 0x99d   : > { %v1802_v4 = vmul.f32 %v4094_v25, %v1787_v17 }
 0x99e   : > { %v3085_v59 = vpop.eup %3084  ;;  %3088 = vpow2.f32 %v1684_v11 }
 0x99f   : > { %v3087_v28 = vpop.eup %3086  ;;  %1817 = vst.msk [vmem:[%s3620_s29 + $0x108] sm:$0xff] %vm692_vm2, %v1802_v4  ;;  %v1760_v20 = vmul.f32 %v3085_v59, %v1714_v34  ;;  %v1711_v3 = vpop.xlane.xlu0 %1710  ;;  %2789 = vmatmul.msk.f32.gmra.mxu0 %vm692_vm2, %v1802_v4 }
 0x9a0   : > { %v1758_v12 = vmul.f32 %v3087_v28, %v1708_v19  ;;  %3090 = vrcp.f32 %v1711_v3 }
 0x9a1   : > { %v1775_v51 = vsub.f32 2.0, %v1760_v20  ;;  %v1648_v0 = vpop.xlane.xlu1 %1647 }
 0x9a2   : > { %v1773_v26 = vsub.f32 2.0, %v1758_v12  ;;  %v1663_v53 = vsub.f32 %v4115_v6, %v1648_v0  ;;  %v1983_v12 = vld [vmem:[#allocation2 + $0x120] sm:$0xff] }
 0x9a3   : > { %v1790_v7 = vmul.f32 %v3085_v59, %v1775_v51 }
 0x9a4   : > { %v4166_v25 = vpop.eup %3088  ;;  %v1788_v47 = vmul.f32 %v3087_v28, %v1773_v26  ;;  %v1692_v13 = vmul.f32 1.442695, %v1663_v53  ;;  %v1717_v44 = vpop.xlane.xlu2 %1716  ;;  %v1982_v53 = vld [vmem:[#allocation2 + $0x118] sm:$0xff] }
 0x9a5   : > { %v1805_v61 = vmul.f32 %v4104_v16, %v1790_v7  ;;  %3092 = vrcp.f32 %v1717_v44  ;;  %v1724_v56 = vsel %vm692_vm2, %v4166_v25, 0.0 }
 0x9a6   : > { %v3091_v18 = vpop.eup %3090  ;;  %v1803_v63 = vmul.f32 %v4099_v29, %v1788_v47  ;;  %3094 = vpow2.f32 %v1692_v13  ;;  %1725 = vadd.xlane.f32.xlu1 %v1724_v56 }
 0x9a7   : > { %1820 = vst.msk [vmem:[%s3620_s29 + $0x120] sm:$0xff] %vm692_vm2, %v1805_v61  ;;  %v1759_v6 = vmul.f32 %v3091_v18, %v1711_v3  ;;  %v1642_v23 = vpop.xlane.xlu0 %1641  ;;  %v1984_v3 = vld [vmem:[#allocation2 + $0x128] sm:$0xff] }
 0x9a8   : > { %1818 = vst.msk [vmem:[%s3620_s29 + $0x110] sm:$0xff] %vm692_vm2, %v1803_v63  ;;  %v1661_v10 = vsub.f32 %v4123_v55, %v1642_v23  ;;  %2790 = vmatmul.msk.f32.gmra.mxu0 %vm692_vm2, %v1803_v63  ;;  %2047 = vmatpush.msrb.mxu1 %v1984_v3 }
 0x9a9   : > { %v1774_v16 = vsub.f32 2.0, %v1759_v6 }
 0x9aa   : > { %v1688_v52 = vmul.f32 1.442695, %v1661_v10  ;;  %2048 = vmatpush.msrb.mxu1 %v1983_v12  ;;  %v1987_v12 = vld [vmem:[#allocation2 + $0x140] sm:$0xff] }
 0x9ab   : > { %v3093_v2 = vpop.eup %3092  ;;  %v1789_v14 = vmul.f32 %v3091_v18, %v1774_v16 }
 0x9ac   : > { %v4178_v54 = vpop.eup %3094  ;;  %v1761_v29 = vmul.f32 %v3093_v2, %v1717_v44  ;;  %3096 = vpow2.f32 %v1688_v52  ;;  %2049 = vmatpush.msrb.mxu1 %v1982_v53 }
 0x9ad   : > { %v1804_v49 = vmul.f32 %v4113_v43, %v1789_v14  ;;  %v1736_v62 = vsel %vm692_vm2, %v4178_v54, 0.0 }
 0x9ae   : > { %v1776_v31 = vsub.f32 2.0, %v1761_v29  ;;  %1737 = vadd.xlane.f32.xlu0 %v1736_v62 }
 0x9af   : > { %1819 = vst.msk [vmem:[%s3620_s29 + $0x118] sm:$0xff] %vm692_vm2, %v1804_v49  ;;  %v1645_v55 = vpop.xlane.xlu0 %1644 }
 0x9b0   : > { %v1791_v57 = vmul.f32 %v3093_v2, %v1776_v31  ;;  %v1662_v42 = vsub.f32 %v4130_v46, %v1645_v55  ;;  %2791 = vmatmul.msk.f32.gmra.mxu0 %vm692_vm2, %v1804_v49 }
 0x9b2   : > { %v4187_v45 = vpop.eup %3096  ;;  %v1806_v34 = vmul.f32 %v4121_v60, %v1791_v57  ;;  %v1690_v19 = vmul.f32 1.442695, %v1662_v42 }
 0x9b3   : > { %v1730_v43 = vsel %vm692_vm2, %v4187_v45, 0.0 }
 0x9b4   : > { %1821 = vst.msk [vmem:[%s3620_s29 + $0x128] sm:$0xff] %vm692_vm2, %v1806_v34  ;;  %3098 = vpow2.f32 %v1690_v19  ;;  %1731 = vadd.xlane.f32.xlu2 %v1730_v43 }
 0x9b7   : > { %v1720_v39 = vpop.xlane.xlu0 %1719 }
 0x9b8   : > { %3100 = vrcp.f32 %v1720_v39  ;;  %2792 = vmatmul.msk.f32.gmra.mxu0 %vm692_vm2, %v1805_v61 }
 0x9ba   : > { %v4195_v46 = vpop.eup %3098 }
 0x9bb   : > { %v1733_v8 = vsel %vm692_vm2, %v4195_v46, 0.0 }
 0x9bc   : > { %1734 = vadd.xlane.f32.xlu1 %v1733_v8 }
 0x9be   : > { %v3101_v60 = vpop.eup %3100 }
 0x9bf   : > { %v1762_v15 = vmul.f32 %v3101_v60, %v1720_v39  ;;  %v1729_v17 = vpop.xlane.xlu0 %1728 }
 0x9c0   : > { %3102 = vrcp.f32 %v1729_v17  ;;  %2793 = vmatmul.msk.f32.gmra.mxu0 %vm692_vm2, %v1806_v34 }
 0x9c1   : > { %v1777_v11 = vsub.f32 2.0, %v1762_v15 }
 0x9c3   : > { %v1792_v4 = vmul.f32 %v3101_v60, %v1777_v11 }
 0x9c5   : > { %v1807_v59 = vmul.f32 %v4135_v24, %v1792_v4  ;;  %v1981_v24 = vld [vmem:[#allocation2 + $0x110] sm:$0xff] }
 0x9c6   : > { %v3103_v28 = vpop.eup %3102  ;;  %2050 = vmatpush.msrb.mxu1 %v1981_v24 }
 0x9c7   : > { %1822 = vst.msk [vmem:[%s3620_s29 + $0x130] sm:$0xff] %vm692_vm2, %v1807_v59  ;;  %v1765_v20 = vmul.f32 %v3103_v28, %v1729_v17 }
 0x9c8   : > { %2794 = vmatmul.msk.f32.gmra.mxu0 %vm692_vm2, %v1807_v59 }
 0x9c9   : > { %v1780_v51 = vsub.f32 2.0, %v1765_v20 }
 0x9cb   : > { %v1795_v0 = vmul.f32 %v3103_v28, %v1780_v51  ;;  %v1985_v51 = vld [vmem:[#allocation2 + $0x130] sm:$0xff] }
 0x9cd   : > { %v1810_v26 = vmul.f32 %v4139_v21, %v1795_v0 }
 0x9cf   : > { %1825 = vst.msk [vmem:[%s3620_s29 + $0x148] sm:$0xff] %vm692_vm2, %v1810_v26 }
 0x9d8   : > { %v1723_v7 = vpop.xlane.xlu2 %1722 }
 0x9d9   : > { %3104 = vrcp.f32 %v1723_v7 }
 0x9df   : > { %v3105_v47 = vpop.eup %3104 }
 0x9e0   : > { %v1763_v13 = vmul.f32 %v3105_v47, %v1723_v7 }
 0x9e2   : > { %v1778_v44 = vsub.f32 2.0, %v1763_v13 }
 0x9e4   : > { %v1793_v61 = vmul.f32 %v3105_v47, %v1778_v44 }
 0x9e6   : > { %v1808_v56 = vmul.f32 %v4147_v58, %v1793_v61 }
 0x9e8   : > { %1823 = vst.msk [vmem:[%s3620_s29 + $0x138] sm:$0xff] %vm692_vm2, %v1808_v56  ;;  %2795 = vmatmul.msk.f32.gmra.mxu0 %vm692_vm2, %v1808_v56 }
 0x9f3   : > { %v1936_v18 = vpop.f32.mrf.mxu0 }
 0x9f4   : > { %v4212_v21 = vadd.f32 %v1936_v18, %v3813_v33 }
 0x9f6   : > { %2801 = vmatmul.msk.f32.vlgmr.msrb.gmra.mxu1 %vm417_vm1, %v4212_v21 }
 0x9fb   : > { %v1939_v63 = vpop.f32.mrf.mxu0 }
 0x9fc   : > { %v4217_v6 = vadd.f32 %v1939_v63, %v3819_v1 }
 0x9fe   : > { %2802 = vmatmul.msk.f32.gmra.mxu1 %vm417_vm1, %v4217_v6 }
 0xa03   : > { %v1942_v23 = vpop.f32.mrf.mxu0 }
 0xa04   : > { %v4222_v58 = vadd.f32 %v1942_v23, %v3825_v37 }
 0xa06   : > { %2803 = vmatmul.msk.f32.gmra.mxu1 %vm417_vm1, %v4222_v58 }
 0xa19   : > { %v1726_v10 = vpop.xlane.xlu1 %1725 }
 0xa1a   : > { %3106 = vrcp.f32 %v1726_v10 }
 0xa1c   : > { %v1945_v33 = vpop.f32.mrf.mxu0 }
 0xa1d   : > { %v4227_v16 = vadd.f32 %v1945_v33, %v3831_v36 }
 0xa1f   : > { %2804 = vmatmul.msk.f32.gmra.mxu1 %vm417_vm1, %v4227_v16 }
 0xa20   : > { %v3107_v1 = vpop.eup %3106 }
 0xa21   : > { %v1764_v52 = vmul.f32 %v3107_v1, %v1726_v10  ;;  %v1738_v2 = vpop.xlane.xlu0 %1737 }
 0xa22   : > { %3108 = vrcp.f32 %v1738_v2 }
 0xa23   : > { %v1779_v14 = vsub.f32 2.0, %v1764_v52 }
 0xa25   : > { %v1794_v37 = vmul.f32 %v3107_v1, %v1779_v14  ;;  %v1948_v29 = vpop.f32.mrf.mxu0 }
 0xa26   : > { %v4232_v49 = vadd.f32 %v1948_v29, %v3837_v48 }
 0xa27   : > { %v1809_v62 = vmul.f32 %v4166_v25, %v1794_v37  ;;  %v1732_v31 = vpop.xlane.xlu2 %1731 }
 0xa28   : > { %v3109_v55 = vpop.eup %3108  ;;  %3110 = vrcp.f32 %v1732_v31  ;;  %2805 = vmatmul.msk.f32.gmra.mxu1 %vm417_vm1, %v4232_v49 }
 0xa29   : > { %1824 = vst.msk [vmem:[%s3620_s29 + $0x140] sm:$0xff] %vm692_vm2, %v1809_v62  ;;  %v1768_v36 = vmul.f32 %v3109_v55, %v1738_v2  ;;  %2796 = vmatmul.msk.f32.gmra.mxu0 %vm692_vm2, %v1809_v62 }
 0xa2b   : > { %v1783_v57 = vsub.f32 2.0, %v1768_v36 }
 0xa2d   : > { %v1798_v42 = vmul.f32 %v3109_v55, %v1783_v57  ;;  %v1951_v34 = vpop.f32.mrf.mxu0 }
 0xa2e   : > { %v3111_v48 = vpop.eup %3110  ;;  %v4241_v19 = vadd.f32 %v1951_v34, %v3843_v40 }
 0xa2f   : > { %v1813_v25 = vmul.f32 %v4178_v54, %v1798_v42  ;;  %v1766_v43 = vmul.f32 %v3111_v48, %v1732_v31  ;;  %v1735_v39 = vpop.xlane.xlu1 %1734 }
 0xa30   : > { %3112 = vrcp.f32 %v1735_v39  ;;  %2806 = vmatmul.msk.f32.gmra.mxu1 %vm417_vm1, %v4241_v19 }
 0xa31   : > { %1828 = vst.msk [vmem:[%s3620_s29 + $0x160] sm:$0xff] %vm692_vm2, %v1813_v25  ;;  %v1781_v8 = vsub.f32 2.0, %v1766_v43  ;;  %2797 = vmatmul.msk.f32.gmra.mxu0 %vm692_vm2, %v1810_v26 }
 0xa33   : > { %v1796_v60 = vmul.f32 %v3111_v48, %v1781_v8 }
 0xa35   : > { %v1811_v15 = vmul.f32 %v4187_v45, %v1796_v60  ;;  %v1954_v17 = vpop.f32.mrf.mxu0  ;;  %v2238_v60 = vld [vmem:[#allocation2 + $0x170] sm:$0xff] }
 0xa36   : > { %v3113_v40 = vpop.eup %3112  ;;  %v4251_v11 = vadd.f32 %v1954_v17, %v3850_v50  ;;  %2298 = vmatpush.msra.mxu2 %v2238_v60  ;;  %v2236_v17 = vld [vmem:[#allocation2 + $0x160] sm:$0xff] }
 0xa37   : > { %1826 = vst.msk [vmem:[%s3620_s29 + $0x150] sm:$0xff] %vm692_vm2, %v1811_v15  ;;  %v1767_v54 = vmul.f32 %v3113_v40, %v1735_v39 }
 0xa38   : > { %2807 = vmatmul.msk.f32.gmra.mxu1 %vm417_vm1, %v4251_v11 }
 0xa39   : > { %v1782_v4 = vsub.f32 2.0, %v1767_v54  ;;  %2798 = vmatmul.msk.f32.gmra.mxu0 %vm692_vm2, %v1811_v15  ;;  %v2237_v15 = vld [vmem:[#allocation2 + $0x168] sm:$0xff] }
 0xa3a   : > { %2299 = vmatpush.msra.mxu2 %v2237_v15 }
 0xa3b   : > { %v1797_v59 = vmul.f32 %v3113_v40, %v1782_v4  ;;  %v2235_v40 = vld [vmem:[#allocation2 + $0x158] sm:$0xff] }
 0xa3c   : > { %2300 = vmatpush.msra.mxu2 %v2236_v17 }
 0xa3d   : > { %v1812_v28 = vmul.f32 %v4195_v46, %v1797_v59  ;;  %v1957_v20 = vpop.f32.mrf.mxu0  ;;  %v1988_v46 = vld [vmem:[#allocation2 + $0x148] sm:$0xff]  ;;  %v3220_v59 = vld [vmem:[#allocation2 + $0x150] sm:$0xff] }
 0xa3e   : > { %v4260_v45 = vadd.f32 %v1957_v20, %v3864_v27  ;;  %2170 = vmatpush.msra.mxu3 %v1988_v46  ;;  %v1986_v27 = vld [vmem:[#allocation2 + $0x138] sm:$0xff]  ;;  %2301 = vmatpush.msra.mxu2 %v2235_v40 }
 0xa3f   : > { %1827 = vst.msk [vmem:[%s3620_s29 + $0x158] sm:$0xff] %vm692_vm2, %v1812_v28 }
 0xa40   : > { %2808 = vmatmul.msk.f32.gmra.mxu1 %vm417_vm1, %v4260_v45  ;;  %2171 = vmatpush.msra.mxu3 %v1987_v12 }
 0xa41   : > { %2799 = vmatmul.msk.f32.gmra.mxu0 %vm692_vm2, %v1812_v28  ;;  %v4326_v28 = vperm.slane %v3220_v59, 2 }
 0xa42   : > { %2172 = vmatpush.msra.mxu3 %v1986_v27 }
 0xa44   : > { %2173 = vmatpush.msra.mxu3 %v1985_v51 }
 0xa45   : > { %v1960_v50 = vpop.f32.mrf.mxu0 }
 0xa46   : > { %v4268_v3 = vadd.f32 %v1960_v50, %v3871_v30  ;;  %v4279_v30 = vperm.slane %v3911_v9, 1 }
 0xa48   : > { %2809 = vmatmul.msk.f32.gmra.mxu1 %vm417_vm1, %v4268_v3 }
 0xa49   : > { %2800 = vmatmul.msk.f32.gmra.mxu0 %vm692_vm2, %v1813_v25 }
 0xa65   : > { %v1963_v0 = vpop.f32.mrf.mxu0 }
 0xa66   : > { %v4274_v26 = vadd.f32 %v1963_v0, %v3877_v41 }
 0xa68   : > { %2810 = vmatmul.msk.f32.gmra.mxu1 %vm417_vm1, %v4274_v26 }
 0xa73   : > { %v2052_v53 = vpop.f32.mrf.mxu1 }
 0xa74   : > { %v2053_v24 = vadd.f32 %v2052_v53, %v4279_v30 }
 0xa76   : > { %3114 = vtanh.f32 %v2053_v24 }
 0xa7b   : > { %v2055_v7 = vpop.f32.mrf.mxu1 }
 0xa7c   : > { %v3115_v47 = vpop.eup %3114  ;;  %v2056_v13 = vadd.f32 %v2055_v7, %v4279_v30 }
 0xa7d   : > { %2816 = vmatmul.msk.f32.vlgmr.msra.gmra.mxu3 %vm417_vm1, %v3115_v47 }
 0xa7e   : > { %3116 = vtanh.f32 %v2056_v13 }
 0xa83   : > { %v2058_v44 = vpop.f32.mrf.mxu1 }
 0xa84   : > { %v3117_v41 = vpop.eup %3116  ;;  %v2059_v61 = vadd.f32 %v2058_v44, %v4279_v30 }
 0xa85   : > { %2817 = vmatmul.msk.f32.gmra.mxu3 %vm417_vm1, %v3117_v41 }
 0xa86   : > { %3118 = vtanh.f32 %v2059_v61 }
 0xa8c   : > { %v3119_v9 = vpop.eup %3118 }
 0xa8d   : > { %2818 = vmatmul.msk.f32.gmra.mxu3 %vm417_vm1, %v3119_v9 }
 0xa9c   : > { %v2061_v56 = vpop.f32.mrf.mxu1 }
 0xa9d   : > { %v2062_v18 = vadd.f32 %v2061_v56, %v4279_v30 }
 0xa9f   : > { %3120 = vtanh.f32 %v2062_v18 }
 0xaa5   : > { %v3121_v63 = vpop.eup %3120  ;;  %v2064_v23 = vpop.f32.mrf.mxu1 }
 0xaa6   : > { %v2065_v10 = vadd.f32 %v2064_v23, %v4279_v30  ;;  %v1966_v33 = vpop.f32.mrf.mxu0  ;;  %2819 = vmatmul.msk.f32.gmra.mxu3 %vm417_vm1, %v3121_v63 }
 0xaa7   : > { %v4291_v1 = vadd.f32 %v1966_v33, %v3883_v5 }
 0xaa8   : > { %3122 = vtanh.f32 %v2065_v10 }
 0xaa9   : > { %2811 = vmatmul.msk.f32.gmra.mxu1 %vm417_vm1, %v4291_v1 }
 0xaad   : > { %v2067_v52 = vpop.f32.mrf.mxu1 }
 0xaae   : > { %v3123_v2 = vpop.eup %3122  ;;  %v2068_v14 = vadd.f32 %v2067_v52, %v4279_v30  ;;  %v1969_v37 = vpop.f32.mrf.mxu0 }
 0xaaf   : > { %v4297_v29 = vadd.f32 %v1969_v37, %v3889_v32  ;;  %2820 = vmatmul.msk.f32.gmra.mxu3 %vm417_vm1, %v3123_v2 }
 0xab0   : > { %3124 = vtanh.f32 %v2068_v14 }
 0xab1   : > { %2812 = vmatmul.msk.f32.gmra.mxu1 %vm417_vm1, %v4297_v29 }
 0xab5   : > { %v2070_v5 = vpop.f32.mrf.mxu1 }
 0xab6   : > { %v3125_v62 = vpop.eup %3124  ;;  %v2071_v31 = vadd.f32 %v2070_v5, %v4279_v30  ;;  %v1972_v55 = vpop.f32.mrf.mxu0 }
 0xab7   : > { %v4304_v36 = vadd.f32 %v1972_v55, %v3895_v38  ;;  %2821 = vmatmul.msk.f32.gmra.mxu3 %vm417_vm1, %v3125_v62 }
 0xab8   : > { %3126 = vtanh.f32 %v2071_v31 }
 0xab9   : > { %2813 = vmatmul.msk.f32.gmra.mxu1 %vm417_vm1, %v4304_v36 }
 0xabd   : > { %v2073_v32 = vpop.f32.mrf.mxu1 }
 0xabe   : > { %v3127_v57 = vpop.eup %3126  ;;  %v2074_v42 = vadd.f32 %v2073_v32, %v4279_v30  ;;  %v1975_v34 = vpop.f32.mrf.mxu0 }
 0xabf   : > { %v4311_v48 = vadd.f32 %v1975_v34, %v3901_v35  ;;  %2822 = vmatmul.msk.f32.gmra.mxu3 %vm417_vm1, %v3127_v57 }
 0xac0   : > { %3128 = vtanh.f32 %v2074_v42 }
 0xac1   : > { %2814 = vmatmul.msk.f32.gmra.mxu1 %vm417_vm1, %v4311_v48 }
 0xac5   : > { %v2076_v38 = vpop.f32.mrf.mxu1 }
 0xac6   : > { %v3129_v25 = vpop.eup %3128  ;;  %v2077_v43 = vadd.f32 %v2076_v38, %v4279_v30  ;;  %v1978_v39 = vpop.f32.mrf.mxu0 }
 0xac7   : > { %v4318_v8 = vadd.f32 %v1978_v39, %v3907_v22  ;;  %2823 = vmatmul.msk.f32.gmra.mxu3 %vm417_vm1, %v3129_v25 }
 0xac8   : > { %3130 = vtanh.f32 %v2077_v43 }
 0xac9   : > { %2815 = vmatmul.msk.f32.gmra.mxu1 %vm417_vm1, %v4318_v8 }
 0xace   : > { %v3131_v35 = vpop.eup %3130 }
 0xacf   : > { %2824 = vmatmul.msk.f32.gmra.mxu3 %vm417_vm1, %v3131_v35 }
 0xae5   : > { %v2079_v54 = vpop.f32.mrf.mxu1 }
 0xae6   : > { %v2080_v22 = vadd.f32 %v2079_v54, %v4279_v30 }
 0xae8   : > { %3132 = vtanh.f32 %v2080_v22 }
 0xaee   : > { %v3133_v4 = vpop.eup %3132 }
 0xaef   : > { %2825 = vmatmul.msk.f32.gmra.mxu3 %vm417_vm1, %v3133_v4 }
 0xb00   : > { %v2175_v20 = vpop.f32.mrf.mxu3 }
 0xb01   : > { %v2176_v50 = vadd.f32 %v2175_v20, %v4326_v28 }
 0xb03   : > { %v2220_v46 = vadd.f32 %v2176_v50, %v4212_v21 }
 0xb05   : > { %2831 = vmatmul.msk.f32.vlgmr.msra.gmra.mxu2 %vm417_vm1, %v2220_v46 }
 0xb08   : > { %v2178_v12 = vpop.f32.mrf.mxu3 }
 0xb09   : > { %v2179_v27 = vadd.f32 %v2178_v12, %v4326_v28 }
 0xb0b   : > { %v2221_v51 = vadd.f32 %v2179_v27, %v4217_v6 }
 0xb0d   : > { %2832 = vmatmul.msk.f32.gmra.mxu2 %vm417_vm1, %v2221_v51 }
 0xb10   : > { %v2181_v0 = vpop.f32.mrf.mxu3 }
 0xb11   : > { %v2182_v53 = vadd.f32 %v2181_v0, %v4326_v28 }
 0xb13   : > { %v2222_v24 = vadd.f32 %v2182_v53, %v4222_v58 }
 0xb15   : > { %2833 = vmatmul.msk.f32.gmra.mxu2 %vm417_vm1, %v2222_v24 }
 0xb26   : > { %v2082_v7 = vpop.f32.mrf.mxu1 }
 0xb27   : > { %v2083_v47 = vadd.f32 %v2082_v7, %v4279_v30 }
 0xb29   : > { %3134 = vtanh.f32 %v2083_v47  ;;  %v2184_v21 = vpop.f32.mrf.mxu3 }
 0xb2a   : > { %v2185_v13 = vadd.f32 %v2184_v21, %v4326_v28 }
 0xb2c   : > { %v2223_v44 = vadd.f32 %v2185_v13, %v4227_v16 }
 0xb2e   : > { %v2085_v41 = vpop.f32.mrf.mxu1  ;;  %2834 = vmatmul.msk.f32.gmra.mxu2 %vm417_vm1, %v2223_v44 }
 0xb2f   : > { %v3135_v6 = vpop.eup %3134  ;;  %v2086_v61 = vadd.f32 %v2085_v41, %v4279_v30 }
 0xb30   : > { %2826 = vmatmul.msk.f32.gmra.mxu3 %vm417_vm1, %v3135_v6 }
 0xb31   : > { %3136 = vtanh.f32 %v2086_v61 }
 0xb32   : > { %v2187_v58 = vpop.f32.mrf.mxu3 }
 0xb33   : > { %v2188_v9 = vadd.f32 %v2187_v58, %v4326_v28 }
 0xb35   : > { %v2224_v56 = vadd.f32 %v2188_v9, %v4232_v49 }
 0xb36   : > { %v2088_v18 = vpop.f32.mrf.mxu1 }
 0xb37   : > { %v3137_v63 = vpop.eup %3136  ;;  %v2089_v23 = vadd.f32 %v2088_v18, %v4279_v30  ;;  %2835 = vmatmul.msk.f32.gmra.mxu2 %vm417_vm1, %v2224_v56 }
 0xb38   : > { %2827 = vmatmul.msk.f32.gmra.mxu3 %vm417_vm1, %v3137_v63 }
 0xb39   : > { %3138 = vtanh.f32 %v2089_v23 }
 0xb3a   : > { %v2190_v16 = vpop.f32.mrf.mxu3 }
 0xb3b   : > { %v2191_v10 = vadd.f32 %v2190_v16, %v4326_v28 }
 0xb3d   : > { %v2225_v33 = vadd.f32 %v2191_v10, %v4241_v19 }
 0xb3e   : > { %v2091_v52 = vpop.f32.mrf.mxu1 }
 0xb3f   : > { %v3139_v2 = vpop.eup %3138  ;;  %v2092_v14 = vadd.f32 %v2091_v52, %v4279_v30  ;;  %2836 = vmatmul.msk.f32.gmra.mxu2 %vm417_vm1, %v2225_v33 }
 0xb40   : > { %2828 = vmatmul.msk.f32.gmra.mxu3 %vm417_vm1, %v3139_v2 }
 0xb41   : > { %3140 = vtanh.f32 %v2092_v14 }
 0xb42   : > { %v2193_v49 = vpop.f32.mrf.mxu3 }
 0xb43   : > { %v2194_v37 = vadd.f32 %v2193_v49, %v4326_v28 }
 0xb45   : > { %v2226_v5 = vadd.f32 %v2194_v37, %v4251_v11 }
 0xb46   : > { %v2094_v62 = vpop.f32.mrf.mxu1 }
 0xb47   : > { %v3141_v31 = vpop.eup %3140  ;;  %v2095_v55 = vadd.f32 %v2094_v62, %v4279_v30  ;;  %2837 = vmatmul.msk.f32.gmra.mxu2 %vm417_vm1, %v2226_v5 }
 0xb48   : > { %2829 = vmatmul.msk.f32.gmra.mxu3 %vm417_vm1, %v3141_v31 }
 0xb49   : > { %3142 = vtanh.f32 %v2095_v55 }
 0xb4a   : > { %v2196_v19 = vpop.f32.mrf.mxu3 }
 0xb4b   : > { %v2197_v32 = vadd.f32 %v2196_v19, %v4326_v28 }
 0xb4d   : > { %v2227_v57 = vadd.f32 %v2197_v32, %v4260_v45  ;;  %v4368_v45 = vld [vmem:[#allocation2 + $0x178] ss:$0 sm:$0xff] }
 0xb4f   : > { %v3143_v42 = vpop.eup %3142  ;;  %2838 = vmatmul.msk.f32.gmra.mxu2 %vm417_vm1, %v2227_v57 }
 0xb50   : > { %2830 = vmatmul.msk.f32.gmra.mxu3 %vm417_vm1, %v3143_v42 }
 0xb52   : > { %v2199_v11 = vpop.f32.mrf.mxu3 }
 0xb53   : > { %v2200_v34 = vadd.f32 %v2199_v11, %v4326_v28 }
 0xb55   : > { %v2228_v30 = vadd.f32 %v2200_v34, %v4268_v3 }
 0xb57   : > { %2839 = vmatmul.msk.f32.gmra.mxu2 %vm417_vm1, %v2228_v30 }
 0xb72   : > { %v2202_v38 = vpop.f32.mrf.mxu3 }
 0xb73   : > { %v2203_v25 = vadd.f32 %v2202_v38, %v4326_v28 }
 0xb75   : > { %v2229_v43 = vadd.f32 %v2203_v25, %v4274_v26 }
 0xb77   : > { %2840 = vmatmul.msk.f32.gmra.mxu2 %vm417_vm1, %v2229_v43 }
 0xb88   : > { %v2303_v39 = vpop.f32.mrf.mxu2 }
 0xb89   : > { %v4371_v35 = vadd.f32 %v4368_v45, %v2303_v39 }
 0xb8b   : > { %v2349_v60 = vsel %vm2348_vm0, %v4371_v35, -inf }
 0xb8c   : > { %2350 = vmax.xlane.f32.xlu2 %v2349_v60 }
 0xb90   : > { %v2306_v3 = vpop.f32.mrf.mxu2 }
 0xb91   : > { %v4376_v15 = vadd.f32 %v4368_v45, %v2306_v3 }
 0xb93   : > { %v2352_v26 = vsel %vm2348_vm0, %v4376_v15, -inf }
 0xb94   : > { %2353 = vmax.xlane.f32.xlu1 %v2352_v26 }
 0xb98   : > { %v2309_v17 = vpop.f32.mrf.mxu2 }
 0xb99   : > { %v4381_v40 = vadd.f32 %v4368_v45, %v2309_v17 }
 0xb9b   : > { %v2355_v54 = vsel %vm2348_vm0, %v4381_v40, -inf }
 0xb9c   : > { %2356 = vmax.xlane.f32.xlu0 %v2355_v54 }
 0xbb1   : > { %v2312_v22 = vpop.f32.mrf.mxu2 }
 0xbb2   : > { %v4386_v4 = vadd.f32 %v4368_v45, %v2312_v22 }
 0xbb3   : > { %v2205_v59 = vpop.f32.mrf.mxu3 }
 0xbb4   : > { %v2206_v20 = vadd.f32 %v2205_v59, %v4326_v28  ;;  %v2358_v50 = vsel %vm2348_vm0, %v4386_v4, -inf }
 0xbb5   : > { %2359 = vmax.xlane.f32.xlu2 %v2358_v50 }
 0xbb6   : > { %v2230_v46 = vadd.f32 %v2206_v20, %v4291_v1 }
 0xbb8   : > { %2841 = vmatmul.msk.f32.gmra.mxu2 %vm417_vm1, %v2230_v46 }
 0xbba   : > { %v2315_v12 = vpop.f32.mrf.mxu2 }
 0xbbb   : > { %v4394_v27 = vadd.f32 %v4368_v45, %v2315_v12  ;;  %v2208_v51 = vpop.f32.mrf.mxu3 }
 0xbbc   : > { %v2209_v0 = vadd.f32 %v2208_v51, %v4326_v28 }
 0xbbd   : > { %v2361_v53 = vsel %vm2348_vm0, %v4394_v27, -inf }
 0xbbe   : > { %v2231_v24 = vadd.f32 %v2209_v0, %v4297_v29  ;;  %2362 = vmax.xlane.f32.xlu1 %v2361_v53 }
 0xbc0   : > { %2842 = vmatmul.msk.f32.gmra.mxu2 %vm417_vm1, %v2231_v24 }
 0xbc2   : > { %v2318_v7 = vpop.f32.mrf.mxu2 }
 0xbc3   : > { %v4402_v1 = vadd.f32 %v4368_v45, %v2318_v7  ;;  %v2211_v47 = vpop.f32.mrf.mxu3 }
 0xbc4   : > { %v2212_v21 = vadd.f32 %v2211_v47, %v4326_v28 }
 0xbc5   : > { %v2364_v13 = vsel %vm2348_vm0, %v4402_v1, -inf }
 0xbc6   : > { %v2232_v44 = vadd.f32 %v2212_v21, %v4304_v36  ;;  %2365 = vmax.xlane.f32.xlu0 %v2364_v13 }
 0xbc8   : > { %2843 = vmatmul.msk.f32.gmra.mxu2 %vm417_vm1, %v2232_v44 }
 0xbca   : > { %v2321_v41 = vpop.f32.mrf.mxu2 }
 0xbcb   : > { %v2322_v29 = vadd.f32 %v4368_v45, %v2321_v41  ;;  %v2214_v6 = vpop.f32.mrf.mxu3 }
 0xbcc   : > { %v2215_v61 = vadd.f32 %v2214_v6, %v4326_v28 }
 0xbcd   : > { %v2367_v58 = vsel %vm2348_vm0, %v2322_v29, -inf }
 0xbce   : > { %v2233_v9 = vadd.f32 %v2215_v61, %v4311_v48  ;;  %2368 = vmax.xlane.f32.xlu2 %v2367_v58 }
 0xbd0   : > { %2844 = vmatmul.msk.f32.gmra.mxu2 %vm417_vm1, %v2233_v9 }
 0xbd2   : > { %v2324_v56 = vpop.f32.mrf.mxu2 }
 0xbd3   : > { %v4415_v18 = vadd.f32 %v4368_v45, %v2324_v56  ;;  %v2217_v36 = vpop.f32.mrf.mxu3 }
 0xbd4   : > { %v2218_v63 = vadd.f32 %v2217_v36, %v4326_v28 }
 0xbd5   : > { %v2370_v23 = vsel %vm2348_vm0, %v4415_v18, -inf }
 0xbd6   : > { %v2234_v16 = vadd.f32 %v2218_v63, %v4318_v8  ;;  %2371 = vmax.xlane.f32.xlu1 %v2370_v23 }
 0xbd8   : > { %2845 = vmatmul.msk.f32.gmra.mxu2 %vm417_vm1, %v2234_v16 }
 0xbda   : > { %v2327_v10 = vpop.f32.mrf.mxu2 }
 0xbdb   : > { %v4423_v48 = vadd.f32 %v4368_v45, %v2327_v10 }
 0xbdd   : > { %v2373_v33 = vsel %vm2348_vm0, %v4423_v48, -inf }
 0xbde   : > { %2374 = vmax.xlane.f32.xlu0 %v2373_v33 }
 0xbfa   : > { %v2330_v52 = vpop.f32.mrf.mxu2 }
 0xbfb   : > { %v4428_v2 = vadd.f32 %v4368_v45, %v2330_v52 }
 0xbfd   : > { %v2376_v28 = vsel %vm2348_vm0, %v4428_v2, -inf }
 0xbfe   : > { %2377 = vmax.xlane.f32.xlu2 %v2376_v28 }
 0xbff   : > { %v2351_v37 = vpop.xlane.xlu2 %2350 }
 0xc00   : > { %v4441_v31 = vsub.f32 %v4371_v35, %v2351_v37 }
 0xc02   : > { %v2409_v19 = vmul.f32 1.442695, %v4441_v31 }
 0xc04   : > { %3144 = vpow2.f32 %v2409_v19 }
 0xc07   : > { %v2354_v32 = vpop.xlane.xlu1 %2353 }
 0xc08   : > { %v4450_v34 = vsub.f32 %v4376_v15, %v2354_v32 }
 0xc0a   : > { %v2411_v25 = vmul.f32 1.442695, %v4450_v34  ;;  %v3145_v60 = vpop.eup %3144 }
 0xc0b   : > { %v2439_v59 = vsel %vm2348_vm0, %v3145_v60, 0.0 }
 0xc0c   : > { %3146 = vpow2.f32 %v2411_v25 }
 0xc0f   : > { %v2357_v43 = vpop.xlane.xlu0 %2356 }
 0xc10   : > { %v4460_v17 = vsub.f32 %v4381_v40, %v2357_v43 }
 0xc12   : > { %v2413_v40 = vmul.f32 1.442695, %v4460_v17 }
 0xc28   : > { %v2360_v57 = vpop.xlane.xlu2 %2359 }
 0xc29   : > { %v4453_v30 = vsub.f32 %v4386_v4, %v2360_v57 }
 0xc2b   : > { %v2415_v39 = vmul.f32 1.442695, %v4453_v30 }
 0xc2d   : > { %3148 = vpow2.f32 %v2415_v39 }
 0xc2e   : > { %3150 = vpow2.f32 %v2413_v40 }
 0xc31   : > { %v2363_v35 = vpop.xlane.xlu1 %2362 }
 0xc32   : > { %v4466_v54 = vsub.f32 %v4394_v27, %v2363_v35  ;;  %v3147_v27 = vpop.eup %3146 }
 0xc33   : > { %v3149_v0 = vpop.eup %3148  ;;  %v2442_v21 = vsel %vm2348_vm0, %v3147_v27, 0.0 }
 0xc34   : > { %v2417_v20 = vmul.f32 1.442695, %v4466_v54  ;;  %v2448_v13 = vsel %vm2348_vm0, %v3149_v0, 0.0  ;;  %v3151_v44 = vpop.eup %3150 }
 0xc35   : > { %v2445_v58 = vsel %vm2348_vm0, %v3151_v44, 0.0 }
 0xc36   : > { %3152 = vpow2.f32 %v2417_v20 }
 0xc39   : > { %v2366_v50 = vpop.xlane.xlu0 %2365 }
 0xc3a   : > { %v4477_v53 = vsub.f32 %v4402_v1, %v2366_v50 }
 0xc3b   : > { %v2333_v8 = vpop.f32.mrf.mxu2 }
 0xc3c   : > { %v4433_v14 = vadd.f32 %v4368_v45, %v2333_v8  ;;  %v2419_v1 = vmul.f32 1.442695, %v4477_v53 }
 0xc3e   : > { %v2379_v49 = vsel %vm2348_vm0, %v4433_v14, -inf }
 0xc3f   : > { %2380 = vmax.xlane.f32.xlu1 %v2379_v49 }
 0xc41   : > { %v2369_v3 = vpop.xlane.xlu2 %2368 }
 0xc42   : > { %v4468_v22 = vsub.f32 %v2322_v29, %v2369_v3  ;;  %v3153_v29 = vpop.eup %3152 }
 0xc43   : > { %v2336_v5 = vpop.f32.mrf.mxu2  ;;  %v2451_v9 = vsel %vm2348_vm0, %v3153_v29, 0.0 }
 0xc44   : > { %v4438_v62 = vadd.f32 %v4368_v45, %v2336_v5  ;;  %v2421_v46 = vmul.f32 1.442695, %v4468_v22 }
 0xc46   : > { %v2382_v55 = vsel %vm2348_vm0, %v4438_v62, -inf  ;;  %3154 = vpow2.f32 %v2421_v46 }
 0xc47   : > { %2383 = vmax.xlane.f32.xlu0 %v2382_v55  ;;  %3156 = vpow2.f32 %v2419_v1 }
 0xc49   : > { %v2372_v12 = vpop.xlane.xlu1 %2371 }
 0xc4a   : > { %v4483_v7 = vsub.f32 %v4415_v18, %v2372_v12 }
 0xc4b   : > { %v2339_v42 = vpop.f32.mrf.mxu2 }
 0xc4c   : > { %v4447_v11 = vadd.f32 %v4368_v45, %v2339_v42  ;;  %v3155_v6 = vpop.eup %3154 }
 0xc4d   : > { %v2457_v56 = vsel %vm2348_vm0, %v3155_v6, 0.0  ;;  %v3157_v36 = vpop.eup %3156 }
 0xc4e   : > { %v2385_v38 = vsel %vm2348_vm0, %v4447_v11, -inf  ;;  %v2454_v23 = vsel %vm2348_vm0, %v3157_v36, 0.0 }
 0xc4f   : > { %2386 = vmax.xlane.f32.xlu2 %v2385_v38 }
 0xc51   : > { %v2375_v41 = vpop.xlane.xlu0 %2374 }
 0xc52   : > { %v4492_v61 = vsub.f32 %v4423_v48, %v2375_v41 }
 0xc53   : > { %v2342_v26 = vpop.f32.mrf.mxu2 }
 0xc54   : > { %v4463_v15 = vadd.f32 %v4368_v45, %v2342_v26  ;;  %v2425_v18 = vmul.f32 1.442695, %v4492_v61 }
 0xc56   : > { %v2388_v4 = vsel %vm2348_vm0, %v4463_v15, -inf }
 0xc57   : > { %2389 = vmax.xlane.f32.xlu1 %v2388_v4  ;;  %2440 = vadd.xlane.f32.xlu2 %v2439_v59 }
 0xc5b   : > { %v2345_v51 = vpop.f32.mrf.mxu2 }
 0xc5c   : > { %v4480_v24 = vadd.f32 %v4368_v45, %v2345_v51  ;;  %v2423_v45 = vmul.f32 1.442695, %v4483_v7 }
 0xc5e   : > { %v2391_v47 = vsel %vm2348_vm0, %v4480_v24, -inf  ;;  %3158 = vpow2.f32 %v2423_v45 }
 0xc5f   : > { %2392 = vmax.xlane.f32.xlu0 %v2391_v47  ;;  %2443 = vadd.xlane.f32.xlu1 %v2442_v21  ;;  %3160 = vpow2.f32 %v2425_v18 }
 0xc60   : > { %2449 = vadd.xlane.f32.xlu2 %v2448_v13 }
 0xc64   : > { %v3159_v63 = vpop.eup %3158 }
 0xc65   : > { %v2460_v16 = vsel %vm2348_vm0, %v3159_v63, 0.0  ;;  %v3161_v33 = vpop.eup %3160 }
 0xc66   : > { %v2463_v28 = vsel %vm2348_vm0, %v3161_v33, 0.0 }
 0xc67   : > { %2446 = vadd.xlane.f32.xlu0 %v2445_v58  ;;  %2452 = vadd.xlane.f32.xlu1 %v2451_v9 }
 0xc68   : > { %2458 = vadd.xlane.f32.xlu2 %v2457_v56 }
 0xc6f   : > { %2455 = vadd.xlane.f32.xlu0 %v2454_v23  ;;  %2461 = vadd.xlane.f32.xlu1 %v2460_v16 }
 0xc71   : > { %v2378_v10 = vpop.xlane.xlu2 %2377 }
 0xc72   : > { %v4501_v48 = vsub.f32 %v4428_v2, %v2378_v10 }
 0xc74   : > { %v2427_v52 = vmul.f32 1.442695, %v4501_v48 }
 0xc76   : > { %3162 = vpow2.f32 %v2427_v52 }
 0xc77   : > { %2464 = vadd.xlane.f32.xlu0 %v2463_v28 }
 0xc7c   : > { %v3163_v8 = vpop.eup %3162 }
 0xc7d   : > { %v2466_v49 = vsel %vm2348_vm0, %v3163_v8, 0.0 }
 0xc7e   : > { %2467 = vadd.xlane.f32.xlu2 %v2466_v49 }
 0xcb2   : > { %v2381_v37 = vpop.xlane.xlu1 %2380 }
 0xcb3   : > { %v4507_v5 = vsub.f32 %v4433_v14, %v2381_v37 }
 0xcb5   : > { %v2429_v55 = vmul.f32 1.442695, %v4507_v5 }
 0xcb7   : > { %3164 = vpow2.f32 %v2429_v55 }
 0xcba   : > { %v2384_v2 = vpop.xlane.xlu0 %2383 }
 0xcbb   : > { %v4511_v19 = vsub.f32 %v4438_v62, %v2384_v2 }
 0xcbd   : > { %v3165_v32 = vpop.eup %3164  ;;  %v2431_v57 = vmul.f32 1.442695, %v4511_v19 }
 0xcbe   : > { %v2469_v42 = vsel %vm2348_vm0, %v3165_v32, 0.0 }
 0xcbf   : > { %3166 = vpow2.f32 %v2431_v57  ;;  %2470 = vadd.xlane.f32.xlu1 %v2469_v42 }
 0xcc2   : > { %v2387_v38 = vpop.xlane.xlu2 %2386 }
 0xcc3   : > { %v4516_v25 = vsub.f32 %v4447_v11, %v2387_v38 }
 0xcc5   : > { %v3167_v14 = vpop.eup %3166  ;;  %v2433_v43 = vmul.f32 1.442695, %v4516_v25 }
 0xcc6   : > { %v2472_v39 = vsel %vm2348_vm0, %v3167_v14, 0.0 }
 0xcc7   : > { %3168 = vpow2.f32 %v2433_v43  ;;  %2473 = vadd.xlane.f32.xlu0 %v2472_v39 }
 0xcca   : > { %v2390_v62 = vpop.xlane.xlu1 %2389  ;;  %v2441_v35 = vpop.xlane.xlu2 %2440 }
 0xccb   : > { %v4521_v60 = vsub.f32 %v4463_v15, %v2390_v62  ;;  %3170 = vlog2.f32 %v2441_v35 }
 0xccd   : > { %v3169_v3 = vpop.eup %3168  ;;  %v2435_v26 = vmul.f32 1.442695, %v4521_v60 }
 0xcce   : > { %v2475_v11 = vsel %vm2348_vm0, %v3169_v3, 0.0 }
 0xccf   : > { %3172 = vpow2.f32 %v2435_v26  ;;  %2476 = vadd.xlane.f32.xlu2 %v2475_v11 }
 0xcd1   : > { %v3171_v4 = vpop.eup %3170 }
 0xcd2   : > { %v2485_v59 = vmul.f32 0.6931472, %v3171_v4  ;;  %v2393_v40 = vpop.xlane.xlu0 %2392  ;;  %v2444_v20 = vpop.xlane.xlu1 %2443 }
 0xcd3   : > { %v4526_v50 = vsub.f32 %v4480_v24, %v2393_v40  ;;  %3174 = vlog2.f32 %v2444_v20  ;;  %v2450_v46 = vpop.xlane.xlu2 %2449 }
 0xcd4   : > { %v2514_v15 = vsub.f32 %v4441_v31, %v2485_v59  ;;  %3176 = vlog2.f32 %v2450_v46 }
 0xcd5   : > { %v3173_v12 = vpop.eup %3172  ;;  %v2437_v27 = vmul.f32 1.442695, %v4526_v50 }
 0xcd6   : > { %2529 = vst.msk [vmem:[%s3620_s29] sm:$0xff] %vm2348_vm0, %v2514_v15  ;;  %v2478_v51 = vsel %vm2348_vm0, %v3173_v12, 0.0 }
 0xcd7   : > { %3178 = vpow2.f32 %v2437_v27  ;;  %2479 = vadd.xlane.f32.xlu1 %v2478_v51 }
 0xcd9   : > { %v3175_v0 = vpop.eup %3174 }
 0xcda   : > { %v3177_v47 = vpop.eup %3176  ;;  %v2487_v24 = vmul.f32 0.6931472, %v3175_v0  ;;  %v2447_v21 = vpop.xlane.xlu0 %2446 }
 0xcdb   : > { %v2453_v13 = vpop.xlane.xlu1 %2452  ;;  %v2491_v1 = vmul.f32 0.6931472, %v3177_v47  ;;  %3180 = vlog2.f32 %v2447_v21  ;;  %v2459_v31 = vpop.xlane.xlu2 %2458 }
 0xcdc   : > { %v2515_v45 = vsub.f32 %v4450_v34, %v2487_v24  ;;  %3182 = vlog2.f32 %v2453_v13 }
 0xcdd   : > { %v3179_v44 = vpop.eup %3178  ;;  %v2517_v41 = vsub.f32 %v4453_v30, %v2491_v1  ;;  %3184 = vlog2.f32 %v2459_v31 }
 0xcde   : > { %2530 = vst.msk [vmem:[%s3620_s29 + $0x8] sm:$0xff] %vm2348_vm0, %v2515_v45  ;;  %v2481_v29 = vsel %vm2348_vm0, %v3179_v44, 0.0 }
 0xcdf   : > { %2532 = vst.msk [vmem:[%s3620_s29 + $0x18] sm:$0xff] %vm2348_vm0, %v2517_v41  ;;  %2482 = vadd.xlane.f32.xlu0 %v2481_v29 }
 0xce1   : > { %v3181_v6 = vpop.eup %3180 }
 0xce2   : > { %v3183_v58 = vpop.eup %3182  ;;  %v2489_v9 = vmul.f32 0.6931472, %v3181_v6  ;;  %v2456_v56 = vpop.xlane.xlu0 %2455 }
 0xce3   : > { %v2462_v34 = vpop.xlane.xlu1 %2461  ;;  %v3185_v18 = vpop.eup %3184  ;;  %v2493_v36 = vmul.f32 0.6931472, %v3183_v58  ;;  %3186 = vlog2.f32 %v2456_v56 }
 0xce4   : > { %v2516_v30 = vsub.f32 %v4460_v17, %v2489_v9  ;;  %v2497_v63 = vmul.f32 0.6931472, %v3185_v18  ;;  %3188 = vlog2.f32 %v2462_v34 }
 0xce5   : > { %v2518_v23 = vsub.f32 %v4466_v54, %v2493_v36 }
 0xce6   : > { %2531 = vst.msk [vmem:[%s3620_s29 + $0x10] sm:$0xff] %vm2348_vm0, %v2516_v30  ;;  %v2520_v16 = vsub.f32 %v4468_v22, %v2497_v63 }
 0xce7   : > { %2533 = vst.msk [vmem:[%s3620_s29 + $0x20] sm:$0xff] %vm2348_vm0, %v2518_v23 }
 0xce8   : > { %2535 = vst.msk [vmem:[%s3620_s29 + $0x30] sm:$0xff] %vm2348_vm0, %v2520_v16 }
 0xce9   : > { %v3187_v10 = vpop.eup %3186 }
 0xcea   : > { %v3189_v33 = vpop.eup %3188  ;;  %v2495_v52 = vmul.f32 0.6931472, %v3187_v10  ;;  %v2465_v28 = vpop.xlane.xlu0 %2464 }
 0xceb   : > { %v2499_v17 = vmul.f32 0.6931472, %v3189_v33  ;;  %3190 = vlog2.f32 %v2465_v28 }
 0xcec   : > { %v2519_v8 = vsub.f32 %v4477_v53, %v2495_v52 }
 0xced   : > { %v2521_v54 = vsub.f32 %v4483_v7, %v2499_v17 }
 0xcee   : > { %2534 = vst.msk [vmem:[%s3620_s29 + $0x28] sm:$0xff] %vm2348_vm0, %v2519_v8 }
 0xcef   : > { %2536 = vst.msk [vmem:[%s3620_s29 + $0x38] sm:$0xff] %vm2348_vm0, %v2521_v54 }
 0xcf1   : > { %v3191_v22 = vpop.eup %3190  ;;  %v2468_v49 = vpop.xlane.xlu2 %2467 }
 0xcf2   : > { %v2501_v37 = vmul.f32 0.6931472, %v3191_v22  ;;  %3192 = vlog2.f32 %v2468_v49 }
 0xcf4   : > { %v2522_v55 = vsub.f32 %v4492_v61, %v2501_v37 }
 0xcf6   : > { %2537 = vst.msk [vmem:[%s3620_s29 + $0x40] sm:$0xff] %vm2348_vm0, %v2522_v55 }
 0xcf8   : > { %v3193_v2 = vpop.eup %3192 }
 0xcf9   : > { %v2503_v32 = vmul.f32 0.6931472, %v3193_v2 }
 0xcfb   : > { %v2523_v53 = vsub.f32 %v4501_v48, %v2503_v32 }
 0xcfd   : > { %2538 = vst.msk [vmem:[%s3620_s29 + $0x48] sm:$0xff] %vm2348_vm0, %v2523_v53 }
 0xd32   : > { %v2471_v7 = vpop.xlane.xlu1 %2470 }
 0xd33   : > { %3194 = vlog2.f32 %v2471_v7 }
 0xd39   : > { %v3195_v57 = vpop.eup %3194 }
 0xd3a   : > { %v2505_v42 = vmul.f32 0.6931472, %v3195_v57  ;;  %v2474_v38 = vpop.xlane.xlu0 %2473 }
 0xd3b   : > { %3196 = vlog2.f32 %v2474_v38 }
 0xd3c   : > { %v2524_v14 = vsub.f32 %v4507_v5, %v2505_v42 }
 0xd3e   : > { %2539 = vst.msk [vmem:[%s3620_s29 + $0x50] sm:$0xff] %vm2348_vm0, %v2524_v14 }
 0xd41   : > { %v3197_v61 = vpop.eup %3196 }
 0xd42   : > { %v2507_v43 = vmul.f32 0.6931472, %v3197_v61  ;;  %v2477_v39 = vpop.xlane.xlu2 %2476 }
 0xd43   : > { %3198 = vlog2.f32 %v2477_v39 }
 0xd44   : > { %v2525_v48 = vsub.f32 %v4511_v19, %v2507_v43 }
 0xd46   : > { %2540 = vst.msk [vmem:[%s3620_s29 + $0x58] sm:$0xff] %vm2348_vm0, %v2525_v48 }
 0xd49   : > { %v3199_v62 = vpop.eup %3198 }
 0xd4a   : > { %v2509_v35 = vmul.f32 0.6931472, %v3199_v62  ;;  %v2480_v3 = vpop.xlane.xlu1 %2479 }
 0xd4b   : > { %3200 = vlog2.f32 %v2480_v3 }
 0xd4c   : > { %v2526_v26 = vsub.f32 %v4516_v25, %v2509_v35 }
 0xd4e   : > { %2541 = vst.msk [vmem:[%s3620_s29 + $0x60] sm:$0xff] %vm2348_vm0, %v2526_v26 }
 0xd51   : > { %v3201_v5 = vpop.eup %3200 }
 0xd52   : > { %v2511_v11 = vmul.f32 0.6931472, %v3201_v5  ;;  %v2483_v4 = vpop.xlane.xlu0 %2482 }
 0xd53   : > { %3202 = vlog2.f32 %v2483_v4 }
 0xd54   : > { %v2527_v59 = vsub.f32 %v4521_v60, %v2511_v11 }
 0xd56   : > { %2542 = vst.msk [vmem:[%s3620_s29 + $0x68] sm:$0xff] %vm2348_vm0, %v2527_v59 }
 0xd59   : > { %v3203_v19 = vpop.eup %3202 }
 0xd5a   : > { %v2513_v40 = vmul.f32 0.6931472, %v3203_v19 }
 0xd5c   : > { %v2528_v20 = vsub.f32 %v4526_v50, %v2513_v40 }
 0xd5e   : > { %2543 = vst.msk [vmem:[%s3620_s29 + $0x70] sm:$0xff] %vm2348_vm0, %v2528_v20 }
 0xd5f PF: > { %s13_s9 = sadd.s32 1, %s3261_s9  }
 0xd60   : > { %p10_p8 = scmp.ge.s32.totalorder %s13_s9, 4  }
 0xd62   :  { %12 = sbr.rel (!%p10_p8) target bundleno = 1 (0x1), region = 63 }
 0xd67   :  { %2566 = vsyncpa [#allocation3], 1 }
 0xd68   :  { %2568 = vsyncpa [#allocation3 + $0x1], 1 }

</bundles_post_ra>
